<compile_context>
chip_gen: v7x
topology: tpu7x:2x2x1
jax: 0.10.0
libtpu: 0.0.40
codegen_flags: <defaults>
</compile_context>

<pallas_src>
import functools

import numpy as np
import jax
import jax.numpy as jnp
from jax.experimental import pallas as pl
from jax.experimental.pallas import tpu as pltpu


def _round_up(v, m):
    return (v + m - 1) // m * m


def _vmem_capacity_bytes():
    """Generation-aware VMEM size (128 MiB v5e/v6e, 64 MiB per TC on v7x)."""
    try:
        info = pltpu.get_tpu_info()
        cap = getattr(info, "vmem_capacity_bytes", None)
        if cap:
            return int(cap)
    except Exception:
        pass
    return 64 << 20  # conservative: v7x per-TensorCore budget


def _agg_kernel(kidx_ref, cnt_ref, a_ref, x_ref, o_ref, *scratch, tk, max_nk,
                x_resident, acc_into_out):
    """grid = (n_pad // tm, max_nk); kk (last axis) is the compacted reduction."""
    i = pl.program_id(0)
    kk = pl.program_id(1)
    acc_ref = o_ref if acc_into_out else scratch[0]
    cnt = cnt_ref[i]

    # Only real (nonzero) k-tiles of this row tile do work; padded steps
    # (kk >= cnt) repeat the previous block index, so no extra DMA occurs.
    @pl.when(kk < cnt)
    def _():
        if x_resident:
            kblk = kidx_ref[i * max_nk + kk]             # SMEM scalar read
            start = pl.multiple_of(kblk * tk, tk)
            x_tile = x_ref[pl.ds(start, tk), :]          # slice of resident x
        else:
            x_tile = x_ref[...]                          # streamed (tk, d) tile
        prod = jnp.dot(a_ref[...], x_tile, preferred_element_type=jnp.float32)

        @pl.when(kk == 0)
        def _():
            acc_ref[...] = prod.astype(acc_ref.dtype)    # direct write, no zero-init

        @pl.when(kk > 0)
        def _():
            acc_ref[...] += prod.astype(acc_ref.dtype)

    # Row tiles with no nonzero k-blocks still need a defined (zero) output.
    @pl.when((kk == 0) & (cnt == 0))
    def _():
        acc_ref[...] = jnp.zeros_like(acc_ref)

    if not acc_into_out:
        @pl.when(kk == pl.num_programs(1) - 1)
        def _():
            o_ref[...] = scratch[0][...].astype(o_ref.dtype)


def build_lightgcn_plan(A, *, tm=512, tk=512):
    """Per-(row-tile, k-tile) block-sparsity metadata. Build ONCE per graph.

    The block-nonzero reduction runs on device; only the small (gi, gk) bool
    map comes to the host. Do not call this inside jit / the per-step path.
    """
    assert A.ndim == 2 and A.shape[0] == A.shape[1]
    n = A.shape[0]
    n_pad = _round_up(n, int(np.lcm(tm, tk)))
    gi, gk = n_pad // tm, n_pad // tk

    A_dev = jnp.asarray(A)
    A_blk = jnp.pad(A_dev, ((0, n_pad - n), (0, n_pad - n)))
    tile_nz = np.asarray(
        jax.device_get((A_blk.reshape(gi, tm, gk, tk) != 0).any(axis=(1, 3))))

    counts = tile_nz.sum(axis=1).astype(np.int32)                # (gi,)
    max_nk = max(int(counts.max()) if gi > 0 else 0, 1)
    kidx = np.zeros((gi, max_nk), dtype=np.int32)
    for r in range(gi):
        nz = np.flatnonzero(tile_nz[r]).astype(np.int32)
        if nz.size:
            kidx[r, :nz.size] = nz
            kidx[r, nz.size:] = nz[-1]     # repeat last index -> no extra DMA
    return {
        "tm": tm, "tk": tk, "n": n, "n_pad": n_pad, "gi": gi, "gk": gk,
        "max_nk": max_nk,
        "kidx": jnp.asarray(kidx.reshape(-1)),   # 1-D -> SMEM-friendly
        "counts": jnp.asarray(counts),
    }


def lightgcn_agg(A, x, *, plan=None, tm=512, tk=512):
    """out = A @ x   (LightGCN neighborhood aggregation).

    A: (n, n) dense adjacency (possibly mostly zero), x: (n, d) features.
    Pass `plan` (from build_lightgcn_plan) to keep the per-call path free of
    host-side metadata work.
    """
    assert A.ndim == 2 and x.ndim == 2
    n, k = A.shape
    k2, d = x.shape
    assert k == n and k2 == n, "A must be (n, n) and x (n, d)"

    if plan is None:
        plan = build_lightgcn_plan(A, tm=tm, tk=tk)
    tm, tk = plan["tm"], plan["tk"]
    n_pad, gi, max_nk = plan["n_pad"], plan["gi"], plan["max_nk"]
    assert plan["n"] == n

    out_dtype = x.dtype
    acc_into_out = (out_dtype == jnp.float32)

    # bf16 inputs (MXU-native, halves the dominant A HBM stream); padded
    # tiles are all-zero and therefore skipped by the sparsity metadata.
    d_pad = _round_up(d, 128)                    # lane-dense unmasked stores
    A_pad = jnp.pad(A.astype(jnp.bfloat16), ((0, n_pad - n), (0, n_pad - n)))
    x_pad = jnp.pad(x.astype(jnp.bfloat16), ((0, n_pad - n), (0, d_pad - d)))

    a_b = A_pad.dtype.itemsize
    x_b = x_pad.dtype.itemsize
    o_b = np.dtype(out_dtype).itemsize

    vmem_cap = _vmem_capacity_bytes()
    acc_bytes = 0 if acc_into_out else tm * d_pad * 4
    fixed = 2 * tm * tk * a_b + 2 * tm * d_pad * o_b + acc_bytes
    x_full = n_pad * d_pad * x_b
    margin = 4 << 20

    # Candidate configs, best first:
    #   resident1: x fully VMEM-resident, single-buffered (fetched once)
    #   resident2: resident, default double-buffering (if Buffered(1) fails)
    #   stream:    (tk, d_pad) x tiles streamed per k step
    modes = []
    if fixed + x_full + margin <= int(0.75 * vmem_cap):
        modes.append("resident1")
    if fixed + 2 * x_full + margin <= int(0.85 * vmem_cap):
        modes.append("resident2")
    modes.append("stream")

    scratch_shapes = [] if acc_into_out else [pltpu.VMEM((tm, d_pad), jnp.float32)]

    def run(mode):
        if mode == "stream":
            x_resident = False
            x_bytes = 2 * tk * d_pad * x_b
            x_spec = pl.BlockSpec(
                (tk, d_pad), lambda i, kk, kidx, cnt: (kidx[i * max_nk + kk], 0))
        else:
            x_resident = True
            if mode == "resident1":
                x_bytes = x_full
                x_spec = pl.BlockSpec((n_pad, d_pad),
                                      lambda i, kk, kidx, cnt: (0, 0),
                                      pipeline_mode=pl.Buffered(1))
            else:
                x_bytes = 2 * x_full
                x_spec = pl.BlockSpec((n_pad, d_pad),
                                      lambda i, kk, kidx, cnt: (0, 0))

        a_spec = pl.BlockSpec(
            (tm, tk), lambda i, kk, kidx, cnt: (i, kidx[i * max_nk + kk]))
        out_spec = pl.BlockSpec((tm, d_pad), lambda i, kk, kidx, cnt: (i, 0))

        est = fixed + x_bytes
        vmem_limit = int(min(max(est + margin, 32 << 20), int(0.9 * vmem_cap)))

        kernel = functools.partial(
            _agg_kernel, tk=tk, max_nk=max_nk,
            x_resident=x_resident, acc_into_out=acc_into_out)

        return pl.pallas_call(
            kernel,
            out_shape=jax.ShapeDtypeStruct((n_pad, d_pad), out_dtype),
            grid_spec=pltpu.PrefetchScalarGridSpec(
                num_scalar_prefetch=2,
                grid=(gi, max_nk),
                in_specs=[a_spec, x_spec],
                out_specs=out_spec,
                scratch_shapes=scratch_shapes,
            ),
            compiler_params=pltpu.CompilerParams(
                dimension_semantics=("parallel", "arbitrary"),
                vmem_limit_bytes=vmem_limit,
            ),
        )(plan["kidx"], plan["counts"], A_pad, x_pad)

    out_pad = None
    last_err = None
    for mode in modes:
        try:
            out_pad = run(mode)
            break
        except Exception as e:     # fall back to the next-safest config
            last_err = e
    if out_pad is None:
        raise last_err

    return out_pad[:n, :d]


if __name__ == "__main__":
    # Small, deliberately non-tile-aligned shapes: n nodes, hidden_size = d.
    n = 640
    hidden_size = 64     # == LightGCNAgg(hidden_size).dim

    key = jax.random.PRNGKey(0)
    k_a, k_x, k_mask = jax.random.split(key, 3)

    # Sparse-ish adjacency (dense storage, ~5% nonzeros) with a couple of
    # fully-zero 256x256 blocks to exercise the block-sparse skipping path.
    mask = (jax.random.uniform(k_mask, (n, n)) < 0.05).astype(jnp.float32)
    vals = jax.random.uniform(k_a, (n, n), dtype=jnp.float32)
    A = mask * vals
    A = A.at[0:256, 256:640].set(0.0)
    A = A.at[256:512, 0:256].set(0.0)
    # symmetric-normalize like LightGCN: D^-1/2 A D^-1/2
    deg = jnp.maximum(A.sum(axis=1), 1e-6)
    d_inv_sqrt = 1.0 / jnp.sqrt(deg)
    A = A * d_inv_sqrt[:, None] * d_inv_sqrt[None, :]

    x = jax.random.normal(k_x, (n, hidden_size), dtype=jnp.float32)

    # Plan built once per graph; small tiles here so skipping fires at n=640.
    plan = build_lightgcn_plan(A, tm=256, tk=256)
    out = jax.block_until_ready(lightgcn_agg(A, x, plan=plan))

    # Default (512-tile) config as tuned for realistic graph sizes.
    out_big = jax.block_until_ready(lightgcn_agg(A, x))

    # Reference checks: bf16-cast reference (tight) + full-f32 ref (loose,
    # tolerance relaxed because A/x are fed to the MXU as bfloat16).
    A_bf = A.astype(jnp.bfloat16).astype(jnp.float32)
    x_bf = x.astype(jnp.bfloat16).astype(jnp.float32)
    ref_bf = A_bf @ x_bf
    ref_f32 = A @ x

    assert out.shape == (n, hidden_size)
    assert out_big.shape == (n, hidden_size)
    assert jnp.allclose(out, ref_bf, atol=2e-3, rtol=2e-3), float(
        jnp.abs(out - ref_bf).max())
    assert jnp.allclose(out_big, ref_bf, atol=2e-3, rtol=2e-3), float(
        jnp.abs(out_big - ref_bf).max())
    assert jnp.allclose(out, ref_f32, atol=3e-2, rtol=3e-2), float(
        jnp.abs(out - ref_f32).max())

    print("KERNEL_OK")
</pallas_src>

<mosaic_0001>
module attributes {stable_mosaic.version = 11 : i64} {
  func.func @_agg_kernel(%arg0: i32, %arg1: i32, %arg2: memref<9xi32, #tpu.memory_space<smem>>, %arg3: memref<3xi32, #tpu.memory_space<smem>>, %arg4: memref<256x256xbf16, #tpu.memory_space<vmem>>, %arg5: memref<768x128xbf16, #tpu.memory_space<vmem>>, %arg6: memref<256x128xf32, #tpu.memory_space<vmem>>) attributes {dimension_semantics = [#tpu.dimension_semantics<parallel>, #tpu.dimension_semantics<arbitrary>], iteration_bounds = array<i64: 3, 3>, scalar_prefetch = 2 : i64, scratch_operands = 0 : i64, tpu.core_type = #tpu.core_type<tc>, window_params = [{transform_indices = @transform_0, window_bounds = array<i64: 256, 256>}, {pipeline_mode = #tpu.pipeline_mode<synchronous>, transform_indices = @transform_1, window_bounds = array<i64: 768, 128>}, {transform_indices = @transform_2, window_bounds = array<i64: 256, 128>}]} {
    %0 = arith.index_cast %arg0 : i32 to index
    %1 = memref.load %arg3[%0] : memref<3xi32, #tpu.memory_space<smem>>
    %2 = arith.cmpi slt, %arg1, %1 : i32
    %3 = arith.extui %2 : i1 to i32
    %c0_i32 = arith.constant 0 : i32
    %4 = arith.cmpi ne, %3, %c0_i32 : i32
    scf.if %4 {
      %c3_i32 = arith.constant 3 : i32
      %10 = arith.muli %arg0, %c3_i32 : i32
      %11 = arith.addi %10, %arg1 : i32
      %12 = arith.index_cast %11 : i32 to index
      %13 = memref.load %arg2[%12] : memref<9xi32, #tpu.memory_space<smem>>
      %c256_i32 = arith.constant 256 : i32
      %14 = arith.muli %13, %c256_i32 : i32
      %15 = tpu.assume_multiple %14, 256 : i32
      %16 = arith.index_cast %15 : i32 to index
      %c0 = arith.constant 0 : index
      %17 = vector.load %arg5[%16, %c0] : memref<768x128xbf16, #tpu.memory_space<vmem>>, vector<256x128xbf16>
      %c0_3 = arith.constant 0 : index
      %c0_4 = arith.constant 0 : index
      %18 = vector.load %arg4[%c0_3, %c0_4] : memref<256x256xbf16, #tpu.memory_space<vmem>>, vector<256x256xbf16>
      %cst = arith.constant dense<0.000000e+00> : vector<256x128xf32>
      %19 = tpu.matmul %18, %17, %cst {dimension_numbers = #tpu.dot_dimension_numbers<[1], [0], [0], [1], [0, 0, 1, 1], [], []>} : vector<256x256xbf16>, vector<256x128xbf16>, vector<256x128xf32> -> vector<256x128xf32>
      %c0_i32_5 = arith.constant 0 : i32
      %20 = arith.cmpi eq, %arg1, %c0_i32_5 : i32
      %21 = arith.extui %20 : i1 to i32
      %c0_i32_6 = arith.constant 0 : i32
      %22 = arith.cmpi ne, %21, %c0_i32_6 : i32
      scf.if %22 {
        %c0_9 = arith.constant 0 : index
        %c0_10 = arith.constant 0 : index
        %26 = vector.load %arg6[%c0_9, %c0_10] : memref<256x128xf32, #tpu.memory_space<vmem>>, vector<256x128xf32>
        tpu.vector_store %arg6[%c0_9, %c0_10], %19 {strides = array<i32>} : memref<256x128xf32, #tpu.memory_space<vmem>>, vector<256x128xf32>,
      } else {
      }
      %c0_i32_7 = arith.constant 0 : i32
      %23 = arith.cmpi sgt, %arg1, %c0_i32_7 : i32
      %24 = arith.extui %23 : i1 to i32
      %c0_i32_8 = arith.constant 0 : i32
      %25 = arith.cmpi ne, %24, %c0_i32_8 : i32
      scf.if %25 {
        %c0_9 = arith.constant 0 : index
        %c0_10 = arith.constant 0 : index
        %26 = vector.load %arg6[%c0_9, %c0_10] : memref<256x128xf32, #tpu.memory_space<vmem>>, vector<256x128xf32>
        %27 = arith.addf %26, %19 : vector<256x128xf32>
        %c0_11 = arith.constant 0 : index
        %c0_12 = arith.constant 0 : index
        %28 = vector.load %arg6[%c0_11, %c0_12] : memref<256x128xf32, #tpu.memory_space<vmem>>, vector<256x128xf32>
        tpu.vector_store %arg6[%c0_11, %c0_12], %27 {strides = array<i32>} : memref<256x128xf32, #tpu.memory_space<vmem>>, vector<256x128xf32>,
      } else {
      }
    } else {
    }
    %c0_i32_0 = arith.constant 0 : i32
    %5 = arith.cmpi eq, %arg1, %c0_i32_0 : i32
    %c0_i32_1 = arith.constant 0 : i32
    %6 = arith.cmpi eq, %1, %c0_i32_1 : i32
    %7 = arith.andi %5, %6 : i1
    %8 = arith.extui %7 : i1 to i32
    %c0_i32_2 = arith.constant 0 : i32
    %9 = arith.cmpi ne, %8, %c0_i32_2 : i32
    scf.if %9 {
      %cst = arith.constant 0.000000e+00 : f32
      %10 = vector.broadcast %cst : f32 to vector<256x128xf32>
      %c0 = arith.constant 0 : index
      %c0_3 = arith.constant 0 : index
      %11 = vector.load %arg6[%c0, %c0_3] : memref<256x128xf32, #tpu.memory_space<vmem>>, vector<256x128xf32>
      tpu.vector_store %arg6[%c0, %c0_3], %10 {strides = array<i32>} : memref<256x128xf32, #tpu.memory_space<vmem>>, vector<256x128xf32>,
    } else {
    }
    return
  }
  func.func @transform_0(%arg0: i32, %arg1: i32, %arg2: memref<9xi32, #tpu.memory_space<smem>>, %arg3: memref<3xi32, #tpu.memory_space<smem>>) -> (i32, i32) {
    %c3_i32 = arith.constant 3 : i32
    %0 = arith.muli %arg0, %c3_i32 : i32
    %1 = arith.addi %0, %arg1 : i32
    %2 = arith.index_cast %1 : i32 to index
    %3 = memref.load %arg2[%2] : memref<9xi32, #tpu.memory_space<smem>>
    %c0_i32 = arith.constant 0 : i32
    return %arg0, %3 : i32, i32
  }
  func.func @transform_1(%arg0: i32, %arg1: i32, %arg2: memref<9xi32, #tpu.memory_space<smem>>, %arg3: memref<3xi32, #tpu.memory_space<smem>>) -> (i32, i32) {
    %c0_i32 = arith.constant 0 : i32
    %c0_i32_0 = arith.constant 0 : i32
    %c0_i32_1 = arith.constant 0 : i32
    return %c0_i32, %c0_i32_0 : i32, i32
  }
  func.func @transform_2(%arg0: i32, %arg1: i32, %arg2: memref<9xi32, #tpu.memory_space<smem>>, %arg3: memref<3xi32, #tpu.memory_space<smem>>) -> (i32, i32) {
    %c0_i32 = arith.constant 0 : i32
    %c0_i32_0 = arith.constant 0 : i32
    return %arg0, %c0_i32 : i32, i32
  }
}

module attributes {stable_mosaic.version = 11 : i64} {
  func.func @_agg_kernel(%arg0: i32, %arg1: i32, %arg2: memref<9xi32, #tpu.memory_space<smem>>, %arg3: memref<3xi32, #tpu.memory_space<smem>>, %arg4: memref<256x256xbf16, #tpu.memory_space<vmem>>, %arg5: memref<768x128xbf16, #tpu.memory_space<vmem>>, %arg6: memref<256x128xf32, #tpu.memory_space<vmem>>) attributes {dimension_semantics = [#tpu.dimension_semantics<parallel>, #tpu.dimension_semantics<arbitrary>], iteration_bounds = array<i64: 3, 3>, scalar_prefetch = 2 : i64, scratch_operands = 0 : i64, tpu.core_type = #tpu.core_type<tc>, window_params = [{transform_indices = @transform_0, window_bounds = array<i64: 256, 256>}, {pipeline_mode = #tpu.pipeline_mode<synchronous>, transform_indices = @transform_1, window_bounds = array<i64: 768, 128>}, {transform_indices = @transform_2, window_bounds = array<i64: 256, 128>}]} {
    %0 = arith.index_cast %arg0 : i32 to index
    %1 = memref.load %arg3[%0] : memref<3xi32, #tpu.memory_space<smem>>
    %2 = arith.cmpi slt, %arg1, %1 : i32
    %3 = arith.extui %2 : i1 to i32
    %c0_i32 = arith.constant 0 : i32
    %4 = arith.cmpi ne, %3, %c0_i32 : i32
    scf.if %4 {
      %c3_i32 = arith.constant 3 : i32
      %10 = arith.muli %arg0, %c3_i32 : i32
      %11 = arith.addi %10, %arg1 : i32
      %12 = arith.index_cast %11 : i32 to index
      %13 = memref.load %arg2[%12] : memref<9xi32, #tpu.memory_space<smem>>
      %c256_i32 = arith.constant 256 : i32
      %14 = arith.muli %13, %c256_i32 : i32
      %15 = tpu.assume_multiple %14, 256 : i32
      %16 = arith.index_cast %15 : i32 to index
      %c0 = arith.constant 0 : index
      %17 = vector.load %arg5[%16, %c0] : memref<768x128xbf16, #tpu.memory_space<vmem>>, vector<256x128xbf16>
      %c0_3 = arith.constant 0 : index
      %c0_4 = arith.constant 0 : index
      %18 = vector.load %arg4[%c0_3, %c0_4] : memref<256x256xbf16, #tpu.memory_space<vmem>>, vector<256x256xbf16>
      %cst = arith.constant dense<0.000000e+00> : vector<256x128xf32>
      %19 = tpu.matmul %18, %17, %cst {dimension_numbers = #tpu.dot_dimension_numbers<[1], [0], [0], [1], [0, 0, 1, 1], [], []>} : vector<256x256xbf16>, vector<256x128xbf16>, vector<256x128xf32> -> vector<256x128xf32>
      %c0_i32_5 = arith.constant 0 : i32
      %20 = arith.cmpi eq, %arg1, %c0_i32_5 : i32
      %21 = arith.extui %20 : i1 to i32
      %c0_i32_6 = arith.constant 0 : i32
      %22 = arith.cmpi ne, %21, %c0_i32_6 : i32
      scf.if %22 {
        %c0_9 = arith.constant 0 : index
        %c0_10 = arith.constant 0 : index
        %26 = vector.load %arg6[%c0_9, %c0_10] : memref<256x128xf32, #tpu.memory_space<vmem>>, vector<256x128xf32>
        tpu.vector_store %arg6[%c0_9, %c0_10], %19 {strides = array<i32>} : memref<256x128xf32, #tpu.memory_space<vmem>>, vector<256x128xf32>,
      } else {
      }
      %c0_i32_7 = arith.constant 0 : i32
      %23 = arith.cmpi sgt, %arg1, %c0_i32_7 : i32
      %24 = arith.extui %23 : i1 to i32
      %c0_i32_8 = arith.constant 0 : i32
      %25 = arith.cmpi ne, %24, %c0_i32_8 : i32
      scf.if %25 {
        %c0_9 = arith.constant 0 : index
        %c0_10 = arith.constant 0 : index
        %26 = vector.load %arg6[%c0_9, %c0_10] : memref<256x128xf32, #tpu.memory_space<vmem>>, vector<256x128xf32>
        %27 = arith.addf %26, %19 : vector<256x128xf32>
        %c0_11 = arith.constant 0 : index
        %c0_12 = arith.constant 0 : index
        %28 = vector.load %arg6[%c0_11, %c0_12] : memref<256x128xf32, #tpu.memory_space<vmem>>, vector<256x128xf32>
        tpu.vector_store %arg6[%c0_11, %c0_12], %27 {strides = array<i32>} : memref<256x128xf32, #tpu.memory_space<vmem>>, vector<256x128xf32>,
      } else {
      }
    } else {
    }
    %c0_i32_0 = arith.constant 0 : i32
    %5 = arith.cmpi eq, %arg1, %c0_i32_0 : i32
    %c0_i32_1 = arith.constant 0 : i32
    %6 = arith.cmpi eq, %1, %c0_i32_1 : i32
    %7 = arith.andi %5, %6 : i1
    %8 = arith.extui %7 : i1 to i32
    %c0_i32_2 = arith.constant 0 : i32
    %9 = arith.cmpi ne, %8, %c0_i32_2 : i32
    scf.if %9 {
      %cst = arith.constant 0.000000e+00 : f32
      %10 = vector.broadcast %cst : f32 to vector<256x128xf32>
      %c0 = arith.constant 0 : index
      %c0_3 = arith.constant 0 : index
      %11 = vector.load %arg6[%c0, %c0_3] : memref<256x128xf32, #tpu.memory_space<vmem>>, vector<256x128xf32>
      tpu.vector_store %arg6[%c0, %c0_3], %10 {strides = array<i32>} : memref<256x128xf32, #tpu.memory_space<vmem>>, vector<256x128xf32>,
    } else {
    }
    return
  }
  func.func @transform_0(%arg0: i32, %arg1: i32, %arg2: memref<9xi32, #tpu.memory_space<smem>>, %arg3: memref<3xi32, #tpu.memory_space<smem>>) -> (i32, i32) {
    %c3_i32 = arith.constant 3 : i32
    %0 = arith.muli %arg0, %c3_i32 : i32
    %1 = arith.addi %0, %arg1 : i32
    %2 = arith.index_cast %1 : i32 to index
    %3 = memref.load %arg2[%2] : memref<9xi32, #tpu.memory_space<smem>>
    %c0_i32 = arith.constant 0 : i32
    return %arg0, %3 : i32, i32
  }
  func.func @transform_1(%arg0: i32, %arg1: i32, %arg2: memref<9xi32, #tpu.memory_space<smem>>, %arg3: memref<3xi32, #tpu.memory_space<smem>>) -> (i32, i32) {
    %c0_i32 = arith.constant 0 : i32
    %c0_i32_0 = arith.constant 0 : i32
    %c0_i32_1 = arith.constant 0 : i32
    return %c0_i32, %c0_i32_0 : i32, i32
  }
  func.func @transform_2(%arg0: i32, %arg1: i32, %arg2: memref<9xi32, #tpu.memory_space<smem>>, %arg3: memref<3xi32, #tpu.memory_space<smem>>) -> (i32, i32) {
    %c0_i32 = arith.constant 0 : i32
    %c0_i32_0 = arith.constant 0 : i32
    return %arg0, %c0_i32 : i32, i32
  }
}

module attributes {stable_mosaic.version = 11 : i64} {
  func.func @_agg_kernel(%arg0: i32, %arg1: i32, %arg2: memref<9xi32, #tpu.memory_space<smem>>, %arg3: memref<3xi32, #tpu.memory_space<smem>>, %arg4: memref<256x256xbf16, #tpu.memory_space<vmem>>, %arg5: memref<256x128xbf16, #tpu.memory_space<vmem>>, %arg6: memref<256x128xf32, #tpu.memory_space<vmem>>) attributes {dimension_semantics = [#tpu.dimension_semantics<parallel>, #tpu.dimension_semantics<arbitrary>], iteration_bounds = array<i64: 3, 3>, scalar_prefetch = 2 : i64, scratch_operands = 0 : i64, tpu.core_type = #tpu.core_type<tc>, window_params = [{transform_indices = @transform_0, window_bounds = array<i64: 256, 256>}, {transform_indices = @transform_1, window_bounds = array<i64: 256, 128>}, {transform_indices = @transform_2, window_bounds = array<i64: 256, 128>}]} {
    %0 = arith.index_cast %arg0 : i32 to index
    %1 = memref.load %arg3[%0] : memref<3xi32, #tpu.memory_space<smem>>
    %2 = arith.cmpi slt, %arg1, %1 : i32
    %3 = arith.extui %2 : i1 to i32
    %c0_i32 = arith.constant 0 : i32
    %4 = arith.cmpi ne, %3, %c0_i32 : i32
    scf.if %4 {
      %c0 = arith.constant 0 : index
      %c0_3 = arith.constant 0 : index
      %10 = vector.load %arg5[%c0, %c0_3] : memref<256x128xbf16, #tpu.memory_space<vmem>>, vector<256x128xbf16>
      %c0_4 = arith.constant 0 : index
      %c0_5 = arith.constant 0 : index
      %11 = vector.load %arg4[%c0_4, %c0_5] : memref<256x256xbf16, #tpu.memory_space<vmem>>, vector<256x256xbf16>
      %cst = arith.constant dense<0.000000e+00> : vector<256x128xf32>
      %12 = tpu.matmul %11, %10, %cst {dimension_numbers = #tpu.dot_dimension_numbers<[1], [0], [0], [1], [0, 0, 1, 1], [], []>} : vector<256x256xbf16>, vector<256x128xbf16>, vector<256x128xf32> -> vector<256x128xf32>
      %c0_i32_6 = arith.constant 0 : i32
      %13 = arith.cmpi eq, %arg1, %c0_i32_6 : i32
      %14 = arith.extui %13 : i1 to i32
      %c0_i32_7 = arith.constant 0 : i32
      %15 = arith.cmpi ne, %14, %c0_i32_7 : i32
      scf.if %15 {
        %c0_10 = arith.constant 0 : index
        %c0_11 = arith.constant 0 : index
        %19 = vector.load %arg6[%c0_10, %c0_11] : memref<256x128xf32, #tpu.memory_space<vmem>>, vector<256x128xf32>
        tpu.vector_store %arg6[%c0_10, %c0_11], %12 {strides = array<i32>} : memref<256x128xf32, #tpu.memory_space<vmem>>, vector<256x128xf32>,
      } else {
      }
      %c0_i32_8 = arith.constant 0 : i32
      %16 = arith.cmpi sgt, %arg1, %c0_i32_8 : i32
      %17 = arith.extui %16 : i1 to i32
      %c0_i32_9 = arith.constant 0 : i32
      %18 = arith.cmpi ne, %17, %c0_i32_9 : i32
      scf.if %18 {
        %c0_10 = arith.constant 0 : index
        %c0_11 = arith.constant 0 : index
        %19 = vector.load %arg6[%c0_10, %c0_11] : memref<256x128xf32, #tpu.memory_space<vmem>>, vector<256x128xf32>
        %20 = arith.addf %19, %12 : vector<256x128xf32>
        %c0_12 = arith.constant 0 : index
        %c0_13 = arith.constant 0 : index
        %21 = vector.load %arg6[%c0_12, %c0_13] : memref<256x128xf32, #tpu.memory_space<vmem>>, vector<256x128xf32>
        tpu.vector_store %arg6[%c0_12, %c0_13], %20 {strides = array<i32>} : memref<256x128xf32, #tpu.memory_space<vmem>>, vector<256x128xf32>,
      } else {
      }
    } else {
    }
    %c0_i32_0 = arith.constant 0 : i32
    %5 = arith.cmpi eq, %arg1, %c0_i32_0 : i32
    %c0_i32_1 = arith.constant 0 : i32
    %6 = arith.cmpi eq, %1, %c0_i32_1 : i32
    %7 = arith.andi %5, %6 : i1
    %8 = arith.extui %7 : i1 to i32
    %c0_i32_2 = arith.constant 0 : i32
    %9 = arith.cmpi ne, %8, %c0_i32_2 : i32
    scf.if %9 {
      %cst = arith.constant 0.000000e+00 : f32
      %10 = vector.broadcast %cst : f32 to vector<256x128xf32>
      %c0 = arith.constant 0 : index
      %c0_3 = arith.constant 0 : index
      %11 = vector.load %arg6[%c0, %c0_3] : memref<256x128xf32, #tpu.memory_space<vmem>>, vector<256x128xf32>
      tpu.vector_store %arg6[%c0, %c0_3], %10 {strides = array<i32>} : memref<256x128xf32, #tpu.memory_space<vmem>>, vector<256x128xf32>,
    } else {
    }
    return
  }
  func.func @transform_0(%arg0: i32, %arg1: i32, %arg2: memref<9xi32, #tpu.memory_space<smem>>, %arg3: memref<3xi32, #tpu.memory_space<smem>>) -> (i32, i32) {
    %c3_i32 = arith.constant 3 : i32
    %0 = arith.muli %arg0, %c3_i32 : i32
    %1 = arith.addi %0, %arg1 : i32
    %2 = arith.index_cast %1 : i32 to index
    %3 = memref.load %arg2[%2] : memref<9xi32, #tpu.memory_space<smem>>
    %c0_i32 = arith.constant 0 : i32
    return %arg0, %3 : i32, i32
  }
  func.func @transform_1(%arg0: i32, %arg1: i32, %arg2: memref<9xi32, #tpu.memory_space<smem>>, %arg3: memref<3xi32, #tpu.memory_space<smem>>) -> (i32, i32) {
    %c3_i32 = arith.constant 3 : i32
    %0 = arith.muli %arg0, %c3_i32 : i32
    %1 = arith.addi %0, %arg1 : i32
    %2 = arith.index_cast %1 : i32 to index
    %3 = memref.load %arg2[%2] : memref<9xi32, #tpu.memory_space<smem>>
    %c0_i32 = arith.constant 0 : i32
    %c0_i32_0 = arith.constant 0 : i32
    return %3, %c0_i32 : i32, i32
  }
  func.func @transform_2(%arg0: i32, %arg1: i32, %arg2: memref<9xi32, #tpu.memory_space<smem>>, %arg3: memref<3xi32, #tpu.memory_space<smem>>) -> (i32, i32) {
    %c0_i32 = arith.constant 0 : i32
    %c0_i32_0 = arith.constant 0 : i32
    return %arg0, %c0_i32 : i32, i32
  }
}

</mosaic_0001>

<bundles_post_ra>
// kernel: tpu_custom_call.1
= control target key start
LH: loop header
LB: loop body
LE: loop exit
PB: predicated region body
PF: predicated region fallthrough
CT: control target
= control target key end

     0   :  { %s2274_s0 = inlined_call_operand.hbm [shape: s32[9], index: 0, kind: input, shape index: {}]   ;;  %s2275_s2 = inlined_call_operand.hbm [shape: bf16[768,768], index: 2, kind: input, shape index: {}]   ;;  %s2276_s3 = inlined_call_operand.hbm [shape: bf16[768,128], index: 3, kind: input, shape index: {}]   ;;  %s2277_s4 = inlined_call_operand.hbm [shape: f32[768,128], index: 4, kind: output, shape index: {}]   ;;  %s2278_s1 = inlined_call_operand.hbm [shape: s32[3], index: 1, kind: input, shape index: {}]  }
   0x1   :  { %2294 = sst [smem:[#allocation25_spill]] %s2276_s3  ;;  %s1392_s17 = scalar_lea.hbm %s2274_s0, 16 }
   0x2   :  { %2295 = sst [smem:[#allocation26_spill]] %s2277_s4  ;;  %p1393_p0 = scmp.ne.s32.totalorder %s2274_s0, %s1392_s17 }
   0x3   :  { %p1396_p1 = scmp.lt.u32.totalorder %s1392_s17, %s2274_s0 }
   0x5   :  { %p1398_p2 = pnand %p1396_p1, %p1393_p0 }
   0x7   :  { %1401 = shalt.err (!%p1398_p2)  }
   0x8   :  { %s1600_s22 = smov [#allocation3]   ;;  %s1402_s27 = scalar_lea.hbm %s2278_s1, 16 }
   0x9   :  { %10 = dma.hbm_to_smem %s2274_s0, 16, %s1600_s22, [#allocation2] }
   0xa   :  { %p1403_p3 = scmp.ne.s32.totalorder %s2278_s1, %s1402_s27  ;;  %p1406_p4 = scmp.lt.u32.totalorder %s1402_s27, %s2278_s1 }
   0xc   :  { %p1408_p5 = pnand %p1406_p4, %p1403_p3 }
   0xe   :  { %1411 = shalt.err (!%p1408_p5)  }
   0xf   :  { %s1601_s6 = smov [#allocation4]  }
  0x10   :  { %12 = dma.hbm_to_smem %s2278_s1, 16, %s1601_s6, [#allocation2] }
  0x11   :  { %1542 = dma.done.wait [#allocation2], 32 }
  0x12   :  { %1543 = vsyncadd [#allocation2], 4294967264 }
  0x13   :  { %14 = sfence }
  0x14   :  { %15 = vsyncpa [#allocation6], 0 }
  0x15   :  { %17 = vsyncpa [#allocation6 + $0x1], 0 }
  0x16   :  { %18 = vsyncpa [#allocation9], 0 }
  0x17   :  { %19 = vsyncpa [#allocation7], 0 }
  0x18   :  { %21 = vsyncpa [#allocation7 + $0x1], 0  ;;  %s1662_s0 = smov 0   ;;  %s1664_s9 = smov 0  }
  0x19   :  { %s1666_s10 = smov 0   ;;  %s1668_s11 = smov 0  }
  0x1a   :  { %s1670_s12 = smov 0   ;;  %s1672_s13 = smov 0  }
  0x1b   :  { %s1674_s1 = smov 0   ;;  %s1676_s14 = smov 0  }
  0x1c   :  { %s1678_s15 = smov 0   ;;  %s1680_s16 = smov 0  }
  0x1d   :  { %s1682_s17 = smov 0  }
  0x1e LB: > { %2296 = sst [smem:[#allocation17_spill]] %s1558_s0  ;;  %s999_s18 = sadd.s32 4294967295, %s1598_s17   ;;  %s1598_s17 = sphi %s1682_s17, %s27_s17   ;;  %s1594_s16 = sphi %s1680_s16, %s2338_s16   ;;  %s1590_s15 = sphi %s1678_s15, %s2329_s15   ;;  %s1586_s14 = sphi %s1676_s14, %s2337_s14   ;;  %s1582_s1 = sphi %s1674_s1, %s2336_s1   ;;  %s1578_s13 = sphi %s1672_s13, %s2335_s13   ;;  %s1574_s12 = sphi %s1670_s12, %s2334_s12   ;;  %s1570_s11 = sphi %s1668_s11, %s2333_s11   ;;  %s1566_s10 = sphi %s1666_s10, %s2327_s10   ;;  %s1562_s9 = sphi %s1664_s9, %s2332_s9   ;;  %s1558_s0 = sphi %s1662_s0, %s2331_s0  }
  0x1f   : > { %2297 = sst [smem:[#allocation18_spill]] %s1566_s10  ;;  %s1000_s19 = sadd.s32 4294967294, %s1598_s17  }
  0x20   : > { %2298 = sst [smem:[#allocation19_spill]] %s1590_s15  ;;  %p67_p6 = scmp.ne.s32.totalorder %s1574_s12, %s1570_s11 }
  0x21   : > { %2299 = sst [smem:[#allocation20_spill]] %s1598_s17  ;;  %p1720_p8 = scmp.eq.s32.totalorder %s999_s18, 0 }
  0x22   : > { %p111_p10 = scmp.ne.s32.totalorder %s1566_s10, %s1562_s9  ;;  %p112_p12 = scmp.eq.s32.totalorder %s999_s18, 8 }
  0x23   : > { %s2300_s20 = scalar_select %p1720_p8, 1, 0 }
  0x24   : > { %p1729_p11 = por %p1720_p8, %p67_p6  ;;  %p117_p13 = scmp.ne.s32.totalorder %s1562_s9, %s1558_s0 }
  0x25   : > { %p118_p0 = scmp.eq.s32.totalorder %s1000_s19, 8  ;;  %p1735_p1 = por %p112_p12, %p111_p10 }
  0x26   : > { %s2301_s21 = scalar_select %p1729_p11, 1, 0 }
  0x27   : > { %s2302_s22 = scalar_select %p1735_p1, 1, 0 }
  0x28   : > { %p1001_p2 = scmp.ge.s32.totalorder %s1598_s17, 1  ;;  %p1740_p3 = por %p118_p0, %p117_p13 }
  0x29   : > { %p125_p4 = scmp.lt.s32.totalorder %s1598_s17, 10  ;;  %s1602_s25 = smov [#allocation8]  }
  0x2a   : > { %s2303_s23 = scalar_select %p1740_p3, 1, 0 }
  0x2b   : > { %p1745_p5 = pnand %p1001_p2, %p125_p4  ;;  %s137_s26 = sshll.u32 %s1602_s25, 4  ;;  %s138_s26 = int_to_ptr.vmem [resolvable:$true] %s137_s26 }
  0x2c   : > { %2304 = sst [smem:[#allocation21_spill]] %s2303_s23  ;;  %s36_s28 = sadd.s32 1, %s1590_s15 }
  0x2d   : > { %s2305_s24 = scalar_select %p1745_p5, 1, 0 }
  0x2e   : > { %p1211_p6 = pneg %p1745_p5  ;;  %s2307_s3 = sld [smem:[#allocation25_spill]] }
  0x30   : > { %p1753_p10 = pnand %p1211_p6, %p1720_p8 }
  0x32   : > { %p1414_p13 = pneg %p1753_p10 }
  0x34   : > { %s1412_s5 = scalar_lea.hbm %s2307_s3, 6144 }
  0x35   : > { %p1413_p12 = scmp.ne.s32.totalorder %s2307_s3, %s1412_s5  ;;  %p1419_p4 = scmp.lt.u32.totalorder %s1412_s5, %s2307_s3 }
  0x37   : > { %p1415_p0 = pnand %p1414_p13, %p1413_p12 }
  0x39   : > { %p1416_p2 = pneg %p1415_p0 }
  0x3b   : > { %p1421_p6 = pnand %p1419_p4, %p1416_p2 }
  0x3d   : > { %1424 = shalt.err (!%p1421_p6)
}
  0x3e   : > { %s1425_s18 = scalar_lea.vmem %s138_s26, 6144  ;;  %p1433_p1 = scmp.lt.s32.totalorder %s138_s26, %s138_s26 }
  0x3f   : > { %p1426_p9 = scmp.ne.s32.totalorder %s138_s26, %s1425_s18  ;;  %p1434_p8 = scmp.lt.s32.totalorder %s1425_s18, %s1425_s18 }
  0x41   : > { %p1428_p7 = pnand %p1426_p9, %p1414_p13  ;;  %p1435_p11 = por %p1434_p8, %p1433_p1 }
  0x43   : > { %p1429_p3 = pneg %p1428_p7 }
  0x45   : > { %p1436_p5 = pnand %p1435_p11, %p1429_p3 }
  0x47   : > { %1439 = shalt.err (!%p1436_p5)
}
  0x48   : > { %s1603_s19 = smov 64   ;;  %s1604_s25 = smov 4  }
  0x49   : > { %1214 = dma.hbm_to_vmem [thread:$0]  (!%p1753_p10), %s2307_s3, 6144, %s138_s26, [#allocation9], %s1603_s19, %s1603_s19, %s1604_s25  }
  0x4a   : > { %p37_p7 = scmp.ge.s32.totalorder %s36_s28, 3  ;;  %s39_s5 = sadd.s32 1, %s1594_s16 }
  0x4b   : > { %p2308_p8 = scmp.ne.s32.totalorder %s1578_s13, %s1574_s12  ;;  %p2309_p9 = scmp.eq.s32.totalorder %s1598_s17, 0 }
  0x4c   : > { %s101_s8 = sadd.s32 1, %s1566_s10  ;;  %s2340_s5 = smov (!%p37_p7, %s39_s5), %s1594_s16 }
  0x4d   : > { %p1783_p11 = por %p2309_p9, %p2308_p8  ;;  %s43_s27 = smul.u32 3, %s1594_s16 }
  0x4e   : > { %p1226_p1 = scmp.lt.s32.totalorder %s1598_s17, 9  ;;  %p41_p3 = scmp.ge.s32.totalorder %s2340_s5, 3 }
  0x4f   : > { %s2285_s26 = sand.u32 1, %s1578_s13   ;;  %s2342_s28 = smov (%p37_p7, %s36_s28), 0 }
  0x50   : > { %2311 = sst [smem:[#allocation22_spill]] %s2342_s28  ;;  %s2344_s5 = smov (%p41_p3, %s2340_s5), 0 }
  0x51   : > { %2312 = sst [smem:[#allocation23_spill]] %s2344_s5  ;;  %s44_s11 = sadd.s32 %s1590_s15, %s43_s27 }
  0x52   : > { %s1004_s18 = sshll.u32 %s2285_s26, 8  ;;  %s46_s19 = smul.u32 3, %s2344_s5 }
  0x53   : > { %s49_s25 = ssub.s32 %s1594_s16, %s2344_s5  ;;  %s45_s29 = sld [smem:[#allocation3 + %s44_s11]] }
  0x54   : > { %p99_p5 = scmp.eq.s32.totalorder %s49_s25, 0  ;;  %s47_s30 = sadd.s32 %s46_s19, %s2342_s28 }
  0x55   : > { %s48_s6 = sld [smem:[#allocation3 + %s47_s30]]  ;;  %p1809_p10 = pnand %p1226_p1, %p1783_p11 }
  0x56   : > { %s1814_s23 = scalar_select %p99_p5, %s1566_s10, %s101_s8  }
  0x57   : > { %s1203_s27 = scalar_select %p1783_p11, [#allocation3], [#allocation11] }
  0x58   : > { %2314 = sst [smem:[#allocation24_spill]] %s1814_s23  ;;  %s2346_s11 = smov (!%p1783_p11, %s44_s11), 0 }
  0x59   : > { %s2348_s27 = smov (!%p1226_p1, %s1203_s27), [#allocation12]  ;;  %s2350_s11 = smov (!%p1226_p1, %s2346_s11), 0 }
  0x5a   : > { %s158_s30 = sld [smem:[%s2348_s27 + %s2350_s11]]  ;;  %s1200_s5 = smul.u32 192, %s1594_s16 }
  0x5b   : > { %s50_s26 = ssub.s32 %s45_s29, %s48_s6  ;;  %s155_s28 = scalar_lea.vmem [#allocation5], %s1004_s18 }
  0x5c   : > { %s51_s19 = sor.u32 %s50_s26, %s49_s25  ;;  %s168_s15 = sshll.u32 %s155_s28, 4  ;;  %s1830_s15 = int_to_ptr.vmem [resolvable:$true] %s168_s15 }
  0x5d   : > { %p52_p12 = scmp.eq.s32.totalorder %s51_s19, 0  ;;  %s2315_s8 = sadd.s32 1, %s1578_s13 }
  0x5e   : > { %s2316_s26 = sand.u32 1, %s1578_s13   ;;  %p1442_p0 = pneg %p1809_p10 }
  0x5f   : > { %s1828_s23 = scalar_select %p52_p12, %s1578_s13, %s2315_s8  }
  0x60   : > { %s1006_s7 = sshll.u32 %s158_s30, 1  ;;  %s1839_s11 = scalar_lea.sflag [#allocation6], %s2316_s26 }
  0x61   : > { %s165_s10 = sadd.s32 %s1200_s5, %s1006_s7  ;;  %s1445_s4 = scalar_lea.hbm %s2275_s2, 36864 }
  0x62   : > { %s1008_s0 = sshll.u32 %s165_s10, 6 }
  0x63   : > { %s1835_s6 = scalar_lea.hbm %s2275_s2, %s1008_s0 }
  0x64   : > { %s1440_s28 = scalar_lea.hbm %s1835_s6, 4096  ;;  %p1446_p6 = scmp.lt.u32.totalorder %s1835_s6, %s2275_s2 }
  0x65   : > { %p1441_p13 = scmp.ne.s32.totalorder %s1835_s6, %s1440_s28  ;;  %p1447_p7 = scmp.lt.u32.totalorder %s1445_s4, %s1440_s28 }
  0x66   : > { %p1449_p9 = scmp.lt.u32.totalorder %s1440_s28, %s1835_s6 }
  0x67   : > { %p1443_p2 = pnand %p1442_p0, %p1441_p13  ;;  %p1448_p8 = por %p1447_p7, %p1446_p6 }
  0x69   : > { %p1444_p4 = pneg %p1443_p2  ;;  %p1450_p11 = por %p1449_p9, %p1448_p8 }
  0x6b   : > { %p1451_p1 = pnand %p1450_p11, %p1444_p4 }
  0x6d   : > { %1454 = shalt.err (!%p1451_p1)
}
  0x6e   : > { %s1455_s18 = scalar_lea.vmem %s1830_s15, 4096  ;;  %s1605_s25 = smov [#allocation5]  }
  0x6f   : > { %p1456_p3 = scmp.ne.s32.totalorder %s1830_s15, %s1455_s18  ;;  %s1460_s29 = sshll.u32 %s1605_s25, 4  ;;  %s1461_s29 = int_to_ptr.vmem [resolvable:$false] %s1460_s29 }
  0x70   : > { %s1462_s27 = scalar_lea.vmem %s1461_s29, 8192  ;;  %p1463_p13 = scmp.lt.s32.totalorder %s1830_s15, %s1461_s29 }
  0x71   : > { %p1458_p5 = pnand %p1456_p3, %p1442_p0  ;;  %p1464_p2 = scmp.lt.s32.totalorder %s1462_s27, %s1455_s18 }
  0x73   : > { %p1459_p12 = pneg %p1458_p5  ;;  %p1465_p6 = por %p1464_p2, %p1463_p13 }
  0x75   : > { %p1466_p7 = pnand %p1465_p6, %p1459_p12 }
  0x77   : > { %1469 = shalt.err (!%p1466_p7)
}
  0x78   : > { %s1606_s19 = smov 384   ;;  %s1607_s30 = smov 128  }
  0x79   : > { %s1608_s8 = smov 8   ;;  %p2317_p0 = scmp.ne.s32.totalorder %s2305_s24, 0 }
  0x7a   : > { %1220 = dma.hbm_to_vmem [thread:$0]  (!%p1809_p10), %s1835_s6, 4096, %s1830_s15, %s1839_s11, %s1606_s19, %s1607_s30, %s1608_s8  }
  0x7b   : > { %180 = sbr.rel (%p2317_p0) target bundleno = 528 (0x210), region = 28  ;;  %s182_s7 = sand.u32 (!%p2317_p0), 1, %s1574_s12  }
  0x7c   : > { %s1010_s26 = sshll.u32 (!%p2317_p0), %s182_s7, 8  ;;  %s183_s28 = scalar_lea.sflag (!%p2317_p0), [#allocation6], %s182_s7 }
  0x7d   : > { %s1870_s10 = scalar_lea.vmem (!%p2317_p0), [#allocation5], %s1010_s26  ;;  %p2318_p4 = scmp.ne.s32.totalorder (!%p2317_p0), %s2301_s21, 0 }
  0x82   : > { %1545 = dma.done.wait (%p2318_p4), %s183_s28, 4096  }
  0x83   : > { %1547 = vsyncadd (%p2318_p4), %s183_s28, 4294963200  ;;  %p2319_p8 = scmp.ne.s32.totalorder %s2300_s20, 0 }
  0x85   : > { %1549 = dma.done.wait (%p2319_p8), [#allocation9], 6144  }
  0x86   : > { %1551 = vsyncadd (%p2319_p8), [#allocation9], 4294961152  ;;  %s208_s3 = sand.u32 1, %s1562_s9   ;;  %s1882_s15 = sld [smem:[#allocation4 + %s1586_s14]] }
  0x87   : > { %s1012_s24 = sshll.u32 %s208_s3, 8 }
  0x88   : > { %s1886_s6 = scalar_lea.vmem [#allocation10], %s1012_s24 }
  0x8c   : > { %p1013_p10 = scmp.ge.s32.totalorder %s1582_s1, %s1882_s15 }
  0x8d   : > { %s223_s20 = smul.u32 (!%p1013_p10), 3, %s1586_s14  ;;  %v1346_v0 = vld [vmem:[%s1870_s10 + $0x4] ss:$8 sps:$4 sm:$0xff] (!%p1013_p10)   ;;  %v1344_v18 = vld [vmem:[%s1870_s10] ss:$8 sps:$4 sm:$0xff] (!%p1013_p10)   ;;  %p1064_p9 = scmp.ne.s32.totalorder (!%p1013_p10), %s1582_s1, 0 }
  0x8e   : > { %222 = sbr.rel (%p1013_p10) target bundleno = 481 (0x1e1), region = 40  ;;  %v1349_v1 = vld [vmem:[%s1870_s10 + $0x84] ss:$8 sps:$4 sm:$0xff] (!%p1013_p10)   ;;  %583 = vmatprep.mubr.bf16.mxu0 (!%p1013_p10), %v1346_v0  ;;  %v1347_v19 = vld [vmem:[%s1870_s10 + $0x80] ss:$8 sps:$4 sm:$0xff] (!%p1013_p10)  }
  0x8f   : > { %s224_s21 = sadd.s32 (!%p1013_p10), %s1582_s1, %s223_s20  ;;  %647 = vmatprep.mubr.bf16.mxu1 (!%p1013_p10), %v1349_v1  ;;  %v1350_v20 = vld [vmem:[%s1870_s10 + $0x14] ss:$8 sps:$4 sm:$0xff] (!%p1013_p10)   ;;  %v1354_v22 = vld [vmem:[%s1870_s10 + $0x10] ss:$8 sps:$4 sm:$0xff] (!%p1013_p10)   ;;  %v1356_v24 = vld [vmem:[%s1870_s10 + $0x24] ss:$8 sps:$4 sm:$0xff] (!%p1013_p10)  }
  0x90   : > { %s225_s11 = sld [smem:[#allocation3 + %s224_s21]] (!%p1013_p10)  ;;  %v1352_v21 = vld [vmem:[%s1870_s10 + $0x94] ss:$8 sps:$4 sm:$0xff] (!%p1013_p10)   ;;  %v1355_v23 = vld [vmem:[%s1870_s10 + $0x90] ss:$8 sps:$4 sm:$0xff] (!%p1013_p10)  }
  0x91   : > { %v1358_v25 = vld [vmem:[%s1870_s10 + $0xa4] ss:$8 sps:$4 sm:$0xff] (!%p1013_p10)   ;;  %v1360_v26 = vld [vmem:[%s1870_s10 + $0x20] ss:$8 sps:$4 sm:$0xff] (!%p1013_p10)   ;;  %v1362_v28 = vld [vmem:[%s1870_s10 + $0x34] ss:$8 sps:$4 sm:$0xff] (!%p1013_p10)  }
  0x92   : > { %v1361_v27 = vld [vmem:[%s1870_s10 + $0xa0] ss:$8 sps:$4 sm:$0xff] (!%p1013_p10)   ;;  %v1364_v29 = vld [vmem:[%s1870_s10 + $0xb4] ss:$8 sps:$4 sm:$0xff] (!%p1013_p10)   ;;  %v1366_v30 = vld [vmem:[%s1870_s10 + $0x30] ss:$8 sps:$4 sm:$0xff] (!%p1013_p10)  }
  0x93   : > { %v1367_v31 = vld [vmem:[%s1870_s10 + $0xb0] ss:$8 sps:$4 sm:$0xff] (!%p1013_p10)   ;;  %v1368_v32 = vld [vmem:[%s1870_s10 + $0x44] ss:$8 sps:$4 sm:$0xff] (!%p1013_p10)   ;;  %v1372_v34 = vld [vmem:[%s1870_s10 + $0x40] ss:$8 sps:$4 sm:$0xff] (!%p1013_p10)  }
  0x94   : > { %v1370_v33 = vld [vmem:[%s1870_s10 + $0xc4] ss:$8 sps:$4 sm:$0xff] (!%p1013_p10)   ;;  %v1373_v35 = vld [vmem:[%s1870_s10 + $0xc0] ss:$8 sps:$4 sm:$0xff] (!%p1013_p10)   ;;  %v1374_v36 = vld [vmem:[%s1870_s10 + $0x54] ss:$8 sps:$4 sm:$0xff] (!%p1013_p10)  }
  0x95   : > { %v1376_v37 = vld [vmem:[%s1870_s10 + $0xd4] ss:$8 sps:$4 sm:$0xff]   ;;  %v1378_v38 = vld [vmem:[%s1870_s10 + $0x50] ss:$8 sps:$4 sm:$0xff]   ;;  %v1380_v40 = vld [vmem:[%s1870_s10 + $0x64] ss:$8 sps:$4 sm:$0xff]  }
  0x96   : > { %s1014_s5 = sshll.u32 %s225_s11, 8  ;;  %v1379_v39 = vld [vmem:[%s1870_s10 + $0xd0] ss:$8 sps:$4 sm:$0xff]   ;;  %v1382_v41 = vld [vmem:[%s1870_s10 + $0xe4] ss:$8 sps:$4 sm:$0xff]  }
  0x97   : > { %s227_s4 = sshra.s32 %s1014_s5, 3  ;;  %v1384_v42 = vld [vmem:[%s1870_s10 + $0x60] ss:$8 sps:$4 sm:$0xff]   ;;  %v1386_v44 = vld [vmem:[%s1870_s10 + $0x74] ss:$8 sps:$4 sm:$0xff]  }
  0x98   : > { %s1015_s0 = sshll.u32 %s227_s4, 2  ;;  %v1385_v43 = vld [vmem:[%s1870_s10 + $0xe0] ss:$8 sps:$4 sm:$0xff]   ;;  %v1388_v45 = vld [vmem:[%s1870_s10 + $0xf4] ss:$8 sps:$4 sm:$0xff]  }
  0x99   : > { %s1894_s17 = scalar_lea.vmem [#allocation8], %s1015_s0  ;;  %v1390_v46 = vld [vmem:[%s1870_s10 + $0x70] ss:$8 sps:$4 sm:$0xff]  }
  0x9a   : > { %v1328_v2 = vld [vmem:[%s1894_s17 + $0x40] sm:$0xff]   ;;  %v1330_v4 = vld [vmem:[%s1894_s17 + $0x48] sm:$0xff]   ;;  %v1332_v6 = vld [vmem:[%s1894_s17 + $0x50] sm:$0xff]  }
  0x9b   : > { %v1329_v3 = vld [vmem:[%s1894_s17] sm:$0xff]   ;;  %1072 = vmatprep.subr.bf16.mxu0 %v1328_v2  ;;  %1184 = vmatprep.subr.bf16.mxu1 %v1328_v2  ;;  %v1331_v5 = vld [vmem:[%s1894_s17 + $0x8] sm:$0xff]   ;;  %v1333_v7 = vld [vmem:[%s1894_s17 + $0x10] sm:$0xff]  }
  0x9c   : > { %1073 = vmatpush3.bf16.msra.mxu0 %v1329_v3  ;;  %1192 = vmatpush3.bf16.msra.mxu1 %v1329_v3  ;;  %v1334_v8 = vld [vmem:[%s1894_s17 + $0x58] sm:$0xff]   ;;  %v1336_v10 = vld [vmem:[%s1894_s17 + $0x60] sm:$0xff]   ;;  %v1338_v12 = vld [vmem:[%s1894_s17 + $0x68] sm:$0xff]  }
  0x9d   : > { %1074 = vmatprep.subr.bf16.mxu0 %v1330_v4  ;;  %1185 = vmatprep.subr.bf16.mxu1 %v1330_v4  ;;  %v1335_v9 = vld [vmem:[%s1894_s17 + $0x18] sm:$0xff]   ;;  %v1337_v11 = vld [vmem:[%s1894_s17 + $0x20] sm:$0xff]   ;;  %v1339_v13 = vld [vmem:[%s1894_s17 + $0x28] sm:$0xff]  }
  0x9e   : > { %v1340_v14 = vld [vmem:[%s1894_s17 + $0x70] sm:$0xff]   ;;  %v1342_v16 = vld [vmem:[%s1894_s17 + $0x78] sm:$0xff]  }
  0x9f   : > { %v1341_v15 = vld [vmem:[%s1894_s17 + $0x30] sm:$0xff]   ;;  %v1343_v17 = vld [vmem:[%s1894_s17 + $0x38] sm:$0xff]  }
  0xa0   : > { %1075 = vmatpush3.bf16.msra.mxu0 %v1331_v5  ;;  %1193 = vmatpush3.bf16.msra.mxu1 %v1331_v5  ;;  %v1391_v47 = vld [vmem:[%s1870_s10 + $0xf0] ss:$8 sps:$4 sm:$0xff]  }
  0xa1   : > { %1076 = vmatprep.subr.bf16.mxu0 %v1332_v6  ;;  %1186 = vmatprep.subr.bf16.mxu1 %v1332_v6 }
  0xa4   : > { %1077 = vmatpush3.bf16.msra.mxu0 %v1333_v7  ;;  %1194 = vmatpush3.bf16.msra.mxu1 %v1333_v7 }
  0xa5   : > { %1078 = vmatprep.subr.bf16.mxu0 %v1334_v8  ;;  %1187 = vmatprep.subr.bf16.mxu1 %v1334_v8 }
  0xa8   : > { %1079 = vmatpush3.bf16.msra.mxu0 %v1335_v9  ;;  %1195 = vmatpush3.bf16.msra.mxu1 %v1335_v9 }
  0xa9   : > { %1080 = vmatprep.subr.bf16.mxu0 %v1336_v10  ;;  %1188 = vmatprep.subr.bf16.mxu1 %v1336_v10 }
  0xac   : > { %1081 = vmatpush3.bf16.msra.mxu0 %v1337_v11  ;;  %1196 = vmatpush3.bf16.msra.mxu1 %v1337_v11 }
  0xad   : > { %1082 = vmatprep.subr.bf16.mxu0 %v1338_v12  ;;  %1189 = vmatprep.subr.bf16.mxu1 %v1338_v12 }
  0xb0   : > { %1083 = vmatpush3.bf16.msra.mxu0 %v1339_v13  ;;  %1197 = vmatpush3.bf16.msra.mxu1 %v1339_v13 }
  0xb1   : > { %1084 = vmatprep.subr.bf16.mxu0 %v1340_v14  ;;  %1190 = vmatprep.subr.bf16.mxu1 %v1340_v14 }
  0xb4   : > { %1085 = vmatpush3.bf16.msra.mxu0 %v1341_v15  ;;  %1198 = vmatpush3.bf16.msra.mxu1 %v1341_v15 }
  0xb5   : > { %1086 = vmatprep.subr.bf16.mxu0 %v1342_v16  ;;  %1191 = vmatprep.subr.bf16.mxu1 %v1342_v16 }
  0xb8   : > { %1087 = vmatpush3.bf16.msra.mxu0 %v1343_v17  ;;  %1199 = vmatpush3.bf16.msra.mxu1 %v1343_v17 }
  0xbb   : > { %584 = vmatmul.mubr.bf16.vlgmr.msra.gmra.mrb[0].mxu0 %v1344_v18  ;;  %648 = vmatmul.mubr.bf16.vlgmr.msra.gmra.mrb[0].mxu1 %v1347_v19 }
  0xbc   : > { %591 = vmatprep.mubr.bf16.mxu0 %v1350_v20  ;;  %655 = vmatprep.mubr.bf16.mxu1 %v1352_v21 }
  0xc3   : > { %592 = vmatmul.mubr.bf16.gmra.mrb[4].mxu0 %v1354_v22  ;;  %656 = vmatmul.mubr.bf16.gmra.mrb[4].mxu1 %v1355_v23 }
  0xc4   : > { %599 = vmatprep.mubr.bf16.mxu0 %v1356_v24  ;;  %663 = vmatprep.mubr.bf16.mxu1 %v1358_v25 }
  0xcb   : > { %600 = vmatmul.mubr.bf16.gmra.mrb[8].mxu0 %v1360_v26  ;;  %664 = vmatmul.mubr.bf16.gmra.mrb[8].mxu1 %v1361_v27 }
  0xcc   : > { %607 = vmatprep.mubr.bf16.mxu0 %v1362_v28  ;;  %671 = vmatprep.mubr.bf16.mxu1 %v1364_v29 }
  0xd3   : > { %608 = vmatmul.mubr.bf16.gmra.mrb[12].mxu0 %v1366_v30  ;;  %672 = vmatmul.mubr.bf16.gmra.mrb[12].mxu1 %v1367_v31 }
  0xd4   : > { %615 = vmatprep.mubr.bf16.mxu0 %v1368_v32  ;;  %679 = vmatprep.mubr.bf16.mxu1 %v1370_v33 }
  0xdb   : > { %616 = vmatmul.mubr.bf16.gmra.mrb[16].mxu0 %v1372_v34  ;;  %680 = vmatmul.mubr.bf16.gmra.mrb[16].mxu1 %v1373_v35 }
  0xdc   : > { %623 = vmatprep.mubr.bf16.mxu0 %v1374_v36  ;;  %687 = vmatprep.mubr.bf16.mxu1 %v1376_v37 }
  0xe3   : > { %624 = vmatmul.mubr.bf16.gmra.mrb[20].mxu0 %v1378_v38  ;;  %688 = vmatmul.mubr.bf16.gmra.mrb[20].mxu1 %v1379_v39 }
  0xe4   : > { %631 = vmatprep.mubr.bf16.mxu0 %v1380_v40  ;;  %695 = vmatprep.mubr.bf16.mxu1 %v1382_v41 }
  0xeb   : > { %632 = vmatmul.mubr.bf16.gmra.mrb[24].mxu0 %v1384_v42  ;;  %696 = vmatmul.mubr.bf16.gmra.mrb[24].mxu1 %v1385_v43 }
  0xec   : > { %639 = vmatprep.mubr.bf16.mxu0 %v1386_v44  ;;  %703 = vmatprep.mubr.bf16.mxu1 %v1388_v45 }
  0xf3   : > { %640 = vmatmul.mubr.bf16.gmra.mrb[28].mxu0 %v1390_v46  ;;  %704 = vmatmul.mubr.bf16.gmra.mrb[28].mxu1 %v1391_v47 }
 0x18e   : > { %v1088_v48 = vpop.f32.mrb[0].mxu0  ;;  %v1136_v49 = vpop.f32.mrb[0].mxu1 }
 0x18f   : > { %v1089_v50 = vpop.f32.mrb[1].mxu0  ;;  %v1137_v51 = vpop.f32.mrb[1].mxu1 }
 0x190   : > { %v1942_v52 = vadd.f32 %v1089_v50, %v1088_v48  ;;  %v1944_v53 = vadd.f32 %v1137_v51, %v1136_v49  ;;  %v1091_v54 = vpop.f32.mrb[2].mxu0  ;;  %v1139_v55 = vpop.f32.mrb[2].mxu1 }
 0x191   : > { %v1092_v56 = vpop.f32.mrb[3].mxu0  ;;  %v1140_v57 = vpop.f32.mrb[3].mxu1 }
 0x192   : > { %v1946_v58 = vadd.f32 %v1092_v56, %v1091_v54  ;;  %v1948_v59 = vadd.f32 %v1140_v57, %v1139_v55  ;;  %716 = vst [vmem:[%s1886_s6] sm:$0xff] (!%p1064_p9), %v1942_v52  ;;  %732 = vst [vmem:[%s1886_s6 + $0x80] sm:$0xff] (!%p1064_p9), %v1944_v53 }
 0x194   : > { %717 = vst [vmem:[%s1886_s6 + $0x8] sm:$0xff] (!%p1064_p9), %v1946_v58  ;;  %733 = vst [vmem:[%s1886_s6 + $0x88] sm:$0xff] (!%p1064_p9), %v1948_v59 }
 0x196   : > { %v1094_v60 = vpop.f32.mrb[4].mxu0  ;;  %v1142_v61 = vpop.f32.mrb[4].mxu1 }
 0x197   : > { %v1095_v62 = vpop.f32.mrb[5].mxu0  ;;  %v1143_v63 = vpop.f32.mrb[5].mxu1 }
 0x198   : > { %v1950_v0 = vadd.f32 %v1095_v62, %v1094_v60  ;;  %v1952_v1 = vadd.f32 %v1143_v63, %v1142_v61  ;;  %v1097_v2 = vpop.f32.mrb[6].mxu0  ;;  %v1145_v3 = vpop.f32.mrb[6].mxu1 }
 0x199   : > { %v1098_v4 = vpop.f32.mrb[7].mxu0  ;;  %v1146_v5 = vpop.f32.mrb[7].mxu1 }
 0x19a   : > { %v1954_v6 = vadd.f32 %v1098_v4, %v1097_v2  ;;  %v1956_v7 = vadd.f32 %v1146_v5, %v1145_v3  ;;  %718 = vst [vmem:[%s1886_s6 + $0x10] sm:$0xff] (!%p1064_p9), %v1950_v0  ;;  %734 = vst [vmem:[%s1886_s6 + $0x90] sm:$0xff] (!%p1064_p9), %v1952_v1 }
 0x19c   : > { %719 = vst [vmem:[%s1886_s6 + $0x18] sm:$0xff] (!%p1064_p9), %v1954_v6  ;;  %735 = vst [vmem:[%s1886_s6 + $0x98] sm:$0xff] (!%p1064_p9), %v1956_v7 }
 0x19e   : > { %v1100_v8 = vpop.f32.mrb[8].mxu0  ;;  %v1148_v9 = vpop.f32.mrb[8].mxu1 }
 0x19f   : > { %v1101_v10 = vpop.f32.mrb[9].mxu0  ;;  %v1149_v11 = vpop.f32.mrb[9].mxu1 }
 0x1a0   : > { %v1958_v12 = vadd.f32 %v1101_v10, %v1100_v8  ;;  %v1960_v13 = vadd.f32 %v1149_v11, %v1148_v9  ;;  %v1103_v14 = vpop.f32.mrb[10].mxu0  ;;  %v1151_v15 = vpop.f32.mrb[10].mxu1 }
 0x1a1   : > { %v1104_v16 = vpop.f32.mrb[11].mxu0  ;;  %v1152_v17 = vpop.f32.mrb[11].mxu1 }
 0x1a2   : > { %v1962_v18 = vadd.f32 %v1104_v16, %v1103_v14  ;;  %v1964_v19 = vadd.f32 %v1152_v17, %v1151_v15  ;;  %720 = vst [vmem:[%s1886_s6 + $0x20] sm:$0xff] (!%p1064_p9), %v1958_v12  ;;  %736 = vst [vmem:[%s1886_s6 + $0xa0] sm:$0xff] (!%p1064_p9), %v1960_v13 }
 0x1a4   : > { %721 = vst [vmem:[%s1886_s6 + $0x28] sm:$0xff] (!%p1064_p9), %v1962_v18  ;;  %737 = vst [vmem:[%s1886_s6 + $0xa8] sm:$0xff] (!%p1064_p9), %v1964_v19 }
 0x1a6   : > { %v1106_v20 = vpop.f32.mrb[12].mxu0  ;;  %v1154_v21 = vpop.f32.mrb[12].mxu1 }
 0x1a7   : > { %v1107_v22 = vpop.f32.mrb[13].mxu0  ;;  %v1155_v23 = vpop.f32.mrb[13].mxu1 }
 0x1a8   : > { %v1966_v24 = vadd.f32 %v1107_v22, %v1106_v20  ;;  %v1968_v25 = vadd.f32 %v1155_v23, %v1154_v21  ;;  %v1109_v26 = vpop.f32.mrb[14].mxu0  ;;  %v1157_v27 = vpop.f32.mrb[14].mxu1 }
 0x1a9   : > { %v1110_v28 = vpop.f32.mrb[15].mxu0  ;;  %v1158_v29 = vpop.f32.mrb[15].mxu1 }
 0x1aa   : > { %v1970_v30 = vadd.f32 %v1110_v28, %v1109_v26  ;;  %v1972_v31 = vadd.f32 %v1158_v29, %v1157_v27  ;;  %722 = vst [vmem:[%s1886_s6 + $0x30] sm:$0xff] (!%p1064_p9), %v1966_v24  ;;  %738 = vst [vmem:[%s1886_s6 + $0xb0] sm:$0xff] (!%p1064_p9), %v1968_v25 }
 0x1ac   : > { %723 = vst [vmem:[%s1886_s6 + $0x38] sm:$0xff] (!%p1064_p9), %v1970_v30  ;;  %739 = vst [vmem:[%s1886_s6 + $0xb8] sm:$0xff] (!%p1064_p9), %v1972_v31 }
 0x1ae   : > { %v1112_v32 = vpop.f32.mrb[16].mxu0  ;;  %v1160_v33 = vpop.f32.mrb[16].mxu1 }
 0x1af   : > { %v1113_v34 = vpop.f32.mrb[17].mxu0  ;;  %v1161_v35 = vpop.f32.mrb[17].mxu1 }
 0x1b0   : > { %v1974_v36 = vadd.f32 %v1113_v34, %v1112_v32  ;;  %v1976_v37 = vadd.f32 %v1161_v35, %v1160_v33  ;;  %v1115_v38 = vpop.f32.mrb[18].mxu0  ;;  %v1163_v39 = vpop.f32.mrb[18].mxu1 }
 0x1b1   : > { %v1116_v40 = vpop.f32.mrb[19].mxu0  ;;  %v1164_v41 = vpop.f32.mrb[19].mxu1 }
 0x1b2   : > { %v1978_v42 = vadd.f32 %v1116_v40, %v1115_v38  ;;  %v1980_v43 = vadd.f32 %v1164_v41, %v1163_v39  ;;  %724 = vst [vmem:[%s1886_s6 + $0x40] sm:$0xff] (!%p1064_p9), %v1974_v36  ;;  %740 = vst [vmem:[%s1886_s6 + $0xc0] sm:$0xff] (!%p1064_p9), %v1976_v37 }
 0x1b4   : > { %725 = vst [vmem:[%s1886_s6 + $0x48] sm:$0xff] (!%p1064_p9), %v1978_v42  ;;  %741 = vst [vmem:[%s1886_s6 + $0xc8] sm:$0xff] (!%p1064_p9), %v1980_v43 }
 0x1b6   : > { %v1118_v44 = vpop.f32.mrb[20].mxu0  ;;  %v1166_v45 = vpop.f32.mrb[20].mxu1 }
 0x1b7   : > { %v1119_v46 = vpop.f32.mrb[21].mxu0  ;;  %v1167_v47 = vpop.f32.mrb[21].mxu1 }
 0x1b8   : > { %v1982_v48 = vadd.f32 %v1119_v46, %v1118_v44  ;;  %v1984_v49 = vadd.f32 %v1167_v47, %v1166_v45  ;;  %v1121_v50 = vpop.f32.mrb[22].mxu0  ;;  %v1169_v51 = vpop.f32.mrb[22].mxu1 }
 0x1b9   : > { %v1122_v54 = vpop.f32.mrb[23].mxu0  ;;  %v1170_v55 = vpop.f32.mrb[23].mxu1 }
 0x1ba   : > { %v1986_v56 = vadd.f32 %v1122_v54, %v1121_v50  ;;  %v1988_v57 = vadd.f32 %v1170_v55, %v1169_v51  ;;  %726 = vst [vmem:[%s1886_s6 + $0x50] sm:$0xff] (!%p1064_p9), %v1982_v48  ;;  %742 = vst [vmem:[%s1886_s6 + $0xd0] sm:$0xff] (!%p1064_p9), %v1984_v49 }
 0x1bc   : > { %727 = vst [vmem:[%s1886_s6 + $0x58] sm:$0xff] (!%p1064_p9), %v1986_v56  ;;  %743 = vst [vmem:[%s1886_s6 + $0xd8] sm:$0xff] (!%p1064_p9), %v1988_v57 }
 0x1be   : > { %v1124_v60 = vpop.f32.mrb[24].mxu0  ;;  %v1172_v61 = vpop.f32.mrb[24].mxu1 }
 0x1bf   : > { %v1125_v62 = vpop.f32.mrb[25].mxu0  ;;  %v1173_v63 = vpop.f32.mrb[25].mxu1 }
 0x1c0   : > { %v1990_v2 = vadd.f32 %v1125_v62, %v1124_v60  ;;  %v1992_v3 = vadd.f32 %v1173_v63, %v1172_v61  ;;  %v1127_v4 = vpop.f32.mrb[26].mxu0  ;;  %v1175_v5 = vpop.f32.mrb[26].mxu1 }
 0x1c1   : > { %v1128_v8 = vpop.f32.mrb[27].mxu0  ;;  %v1176_v9 = vpop.f32.mrb[27].mxu1 }
 0x1c2   : > { %v1994_v10 = vadd.f32 %v1128_v8, %v1127_v4  ;;  %v1996_v11 = vadd.f32 %v1176_v9, %v1175_v5  ;;  %728 = vst [vmem:[%s1886_s6 + $0x60] sm:$0xff] (!%p1064_p9), %v1990_v2  ;;  %744 = vst [vmem:[%s1886_s6 + $0xe0] sm:$0xff] (!%p1064_p9), %v1992_v3 }
 0x1c4   : > { %715 = sbr.rel (%p1064_p9) target bundleno = 461 (0x1cd), region = 44  ;;  %729 = vst [vmem:[%s1886_s6 + $0x68] sm:$0xff] (!%p1064_p9), %v1994_v10  ;;  %745 = vst [vmem:[%s1886_s6 + $0xe8] sm:$0xff] (!%p1064_p9), %v1996_v11 }
 0x1c6   : > { %v1130_v14 = vpop.f32.mrb[28].mxu0  ;;  %v1178_v15 = vpop.f32.mrb[28].mxu1 }
 0x1c7   : > { %v1131_v16 = vpop.f32.mrb[29].mxu0  ;;  %v1179_v17 = vpop.f32.mrb[29].mxu1 }
 0x1c8   : > { %v1998_v20 = vadd.f32 %v1131_v16, %v1130_v14  ;;  %v2000_v21 = vadd.f32 %v1179_v17, %v1178_v15  ;;  %v1133_v22 = vpop.f32.mrb[30].mxu0  ;;  %v1181_v23 = vpop.f32.mrb[30].mxu1 }
 0x1c9   : > { %v1134_v26 = vpop.f32.mrb[31].mxu0  ;;  %v1182_v27 = vpop.f32.mrb[31].mxu1 }
 0x1ca   : > { %v2002_v28 = vadd.f32 %v1134_v26, %v1133_v22  ;;  %v2004_v29 = vadd.f32 %v1182_v27, %v1181_v23  ;;  %730 = vst [vmem:[%s1886_s6 + $0x70] sm:$0xff] (!%p1064_p9), %v1998_v20  ;;  %746 = vst [vmem:[%s1886_s6 + $0xf0] sm:$0xff] (!%p1064_p9), %v2000_v21 }
 0x1cc   : > { %731 = vst [vmem:[%s1886_s6 + $0x78] sm:$0xff] %v2002_v28  ;;  %747 = vst [vmem:[%s1886_s6 + $0xf8] sm:$0xff] %v2004_v29 }
 0x1cd PF: > { %p1065_p11 = scmp.le.s32.totalorder %s1582_s1, 0 }
 0x1ce   : > { %v752_v32 = vld [vmem:[%s1886_s6] sm:$0xff] (!%p1065_p11)  ;;  %v753_v33 = vld [vmem:[%s1886_s6 + $0x8] sm:$0xff] (!%p1065_p11)  ;;  %v754_v34 = vld [vmem:[%s1886_s6 + $0x10] sm:$0xff] (!%p1065_p11) }
 0x1cf   : > { %751 = sbr.rel (%p1065_p11) target bundleno = 481 (0x1e1), region = 48  ;;  %v784_v35 = vadd.f32 (!%p1065_p11), %v1942_v52, %v752_v32  ;;  %v785_v38 = vadd.f32 (!%p1065_p11), %v1946_v58, %v753_v33  ;;  %v786_v39 = vadd.f32 (!%p1065_p11), %v1950_v0, %v754_v34  ;;  %v755_v40 = vld [vmem:[%s1886_s6 + $0x18] sm:$0xff] (!%p1065_p11)  ;;  %v756_v41 = vld [vmem:[%s1886_s6 + $0x20] sm:$0xff] (!%p1065_p11)  ;;  %v757_v44 = vld [vmem:[%s1886_s6 + $0x28] sm:$0xff] (!%p1065_p11) }
 0x1d0   : > { %v787_v45 = vadd.f32 (!%p1065_p11), %v1954_v6, %v755_v40  ;;  %v788_v46 = vadd.f32 (!%p1065_p11), %v1958_v12, %v756_v41  ;;  %v789_v47 = vadd.f32 (!%p1065_p11), %v1962_v18, %v757_v44  ;;  %v758_v52 = vld [vmem:[%s1886_s6 + $0x30] sm:$0xff] (!%p1065_p11)  ;;  %v759_v50 = vld [vmem:[%s1886_s6 + $0x38] sm:$0xff] (!%p1065_p11)  ;;  %v760_v58 = vld [vmem:[%s1886_s6 + $0x40] sm:$0xff] (!%p1065_p11) }
 0x1d1   : > { %816 = vst [vmem:[%s1886_s6] sm:$0xff] (!%p1065_p11), %v784_v35  ;;  %817 = vst [vmem:[%s1886_s6 + $0x8] sm:$0xff] (!%p1065_p11), %v785_v38  ;;  %v790_v0 = vadd.f32 (!%p1065_p11), %v1966_v24, %v758_v52  ;;  %v791_v6 = vadd.f32 (!%p1065_p11), %v1970_v30, %v759_v50  ;;  %v792_v12 = vadd.f32 (!%p1065_p11), %v1974_v36, %v760_v58  ;;  %v761_v51 = vld [vmem:[%s1886_s6 + $0x48] sm:$0xff] (!%p1065_p11)  ;;  %v762_v18 = vld [vmem:[%s1886_s6 + $0x50] sm:$0xff] (!%p1065_p11) }
 0x1d2   : > { %818 = vst [vmem:[%s1886_s6 + $0x10] sm:$0xff] (!%p1065_p11), %v786_v39  ;;  %v763_v54 = vld [vmem:[%s1886_s6 + $0x58] sm:$0xff] (!%p1065_p11)  ;;  %819 = vst [vmem:[%s1886_s6 + $0x18] sm:$0xff] (!%p1065_p11), %v787_v45  ;;  %v793_v55 = vadd.f32 (!%p1065_p11), %v1978_v42, %v761_v51  ;;  %v794_v24 = vadd.f32 (!%p1065_p11), %v1982_v48, %v762_v18  ;;  %v764_v60 = vld [vmem:[%s1886_s6 + $0x60] sm:$0xff] (!%p1065_p11) }
 0x1d3   : > { %820 = vst [vmem:[%s1886_s6 + $0x20] sm:$0xff] (!%p1065_p11), %v788_v46  ;;  %821 = vst [vmem:[%s1886_s6 + $0x28] sm:$0xff] (!%p1065_p11), %v789_v47  ;;  %v795_v30 = vadd.f32 (!%p1065_p11), %v1986_v56, %v763_v54  ;;  %v765_v36 = vld [vmem:[%s1886_s6 + $0x68] sm:$0xff] (!%p1065_p11)  ;;  %v766_v61 = vld [vmem:[%s1886_s6 + $0x70] sm:$0xff] (!%p1065_p11)  ;;  %v796_v62 = vadd.f32 (!%p1065_p11), %v1990_v2, %v764_v60 }
 0x1d4   : > { %822 = vst [vmem:[%s1886_s6 + $0x30] sm:$0xff] (!%p1065_p11), %v790_v0  ;;  %823 = vst [vmem:[%s1886_s6 + $0x38] sm:$0xff] (!%p1065_p11), %v791_v6  ;;  %v797_v42 = vadd.f32 (!%p1065_p11), %v1994_v10, %v765_v36  ;;  %v798_v48 = vadd.f32 (!%p1065_p11), %v1998_v20, %v766_v61  ;;  %v767_v63 = vld [vmem:[%s1886_s6 + $0x78] sm:$0xff] (!%p1065_p11)  ;;  %v768_v56 = vld [vmem:[%s1886_s6 + $0x80] sm:$0xff] (!%p1065_p11) }
 0x1d5   : > { %824 = vst [vmem:[%s1886_s6 + $0x40] sm:$0xff] (!%p1065_p11), %v792_v12  ;;  %v769_v4 = vld [vmem:[%s1886_s6 + $0x88] sm:$0xff] (!%p1065_p11)  ;;  %825 = vst [vmem:[%s1886_s6 + $0x48] sm:$0xff] (!%p1065_p11), %v793_v55  ;;  %v799_v5 = vadd.f32 (!%p1065_p11), %v2002_v28, %v767_v63  ;;  %v800_v2 = vadd.f32 (!%p1065_p11), %v1944_v53, %v768_v56  ;;  %v770_v9 = vld [vmem:[%s1886_s6 + $0x90] sm:$0xff] (!%p1065_p11) }
 0x1d6   : > { %826 = vst [vmem:[%s1886_s6 + $0x50] sm:$0xff] %v794_v24  ;;  %827 = vst [vmem:[%s1886_s6 + $0x58] sm:$0xff] %v795_v30  ;;  %v801_v8 = vadd.f32 %v1948_v59, %v769_v4  ;;  %v771_v10 = vld [vmem:[%s1886_s6 + $0x98] sm:$0xff]  ;;  %v772_v14 = vld [vmem:[%s1886_s6 + $0xa0] sm:$0xff]  ;;  %v802_v15 = vadd.f32 %v1952_v1, %v770_v9 }
 0x1d7   : > { %828 = vst [vmem:[%s1886_s6 + $0x60] sm:$0xff] %v796_v62  ;;  %829 = vst [vmem:[%s1886_s6 + $0x68] sm:$0xff] %v797_v42  ;;  %v803_v16 = vadd.f32 %v1956_v7, %v771_v10  ;;  %v804_v53 = vadd.f32 %v1960_v13, %v772_v14  ;;  %v773_v17 = vld [vmem:[%s1886_s6 + $0xa8] sm:$0xff]  ;;  %v774_v59 = vld [vmem:[%s1886_s6 + $0xb0] sm:$0xff] }
 0x1d8   : > { %830 = vst [vmem:[%s1886_s6 + $0x70] sm:$0xff] %v798_v48  ;;  %v775_v20 = vld [vmem:[%s1886_s6 + $0xb8] sm:$0xff]  ;;  %831 = vst [vmem:[%s1886_s6 + $0x78] sm:$0xff] %v799_v5  ;;  %v805_v22 = vadd.f32 %v1964_v19, %v773_v17  ;;  %v806_v1 = vadd.f32 %v1968_v25, %v774_v59  ;;  %v776_v23 = vld [vmem:[%s1886_s6 + $0xc0] sm:$0xff] }
 0x1d9   : > { %832 = vst [vmem:[%s1886_s6 + $0x80] sm:$0xff] %v800_v2  ;;  %833 = vst [vmem:[%s1886_s6 + $0x88] sm:$0xff] %v801_v8  ;;  %v807_v7 = vadd.f32 %v1972_v31, %v775_v20  ;;  %v777_v13 = vld [vmem:[%s1886_s6 + $0xc8] sm:$0xff]  ;;  %v778_v26 = vld [vmem:[%s1886_s6 + $0xd0] sm:$0xff]  ;;  %v808_v27 = vadd.f32 %v1976_v37, %v776_v23 }
 0x1da   : > { %834 = vst [vmem:[%s1886_s6 + $0x90] sm:$0xff] %v802_v15  ;;  %835 = vst [vmem:[%s1886_s6 + $0x98] sm:$0xff] %v803_v16  ;;  %v809_v19 = vadd.f32 %v1980_v43, %v777_v13  ;;  %v810_v25 = vadd.f32 %v1984_v49, %v778_v26  ;;  %v779_v28 = vld [vmem:[%s1886_s6 + $0xd8] sm:$0xff]  ;;  %v780_v31 = vld [vmem:[%s1886_s6 + $0xe0] sm:$0xff] }
 0x1db   : > { %836 = vst [vmem:[%s1886_s6 + $0xa0] sm:$0xff] %v804_v53  ;;  %v781_v32 = vld [vmem:[%s1886_s6 + $0xe8] sm:$0xff]  ;;  %837 = vst [vmem:[%s1886_s6 + $0xa8] sm:$0xff] %v805_v22  ;;  %v811_v33 = vadd.f32 %v1988_v57, %v779_v28  ;;  %v812_v37 = vadd.f32 %v1992_v3, %v780_v31  ;;  %v782_v43 = vld [vmem:[%s1886_s6 + $0xf0] sm:$0xff] }
 0x1dc   : > { %838 = vst [vmem:[%s1886_s6 + $0xb0] sm:$0xff] %v806_v1  ;;  %839 = vst [vmem:[%s1886_s6 + $0xb8] sm:$0xff] %v807_v7  ;;  %v813_v34 = vadd.f32 %v1996_v11, %v781_v32  ;;  %v783_v35 = vld [vmem:[%s1886_s6 + $0xf8] sm:$0xff]  ;;  %v814_v49 = vadd.f32 %v2000_v21, %v782_v43 }
 0x1dd   : > { %840 = vst [vmem:[%s1886_s6 + $0xc0] sm:$0xff] %v808_v27  ;;  %841 = vst [vmem:[%s1886_s6 + $0xc8] sm:$0xff] %v809_v19  ;;  %v815_v38 = vadd.f32 %v2004_v29, %v783_v35 }
 0x1de   : > { %842 = vst [vmem:[%s1886_s6 + $0xd0] sm:$0xff] %v810_v25  ;;  %843 = vst [vmem:[%s1886_s6 + $0xd8] sm:$0xff] %v811_v33 }
 0x1df   : > { %844 = vst [vmem:[%s1886_s6 + $0xe0] sm:$0xff] %v812_v37  ;;  %845 = vst [vmem:[%s1886_s6 + $0xe8] sm:$0xff] %v813_v34 }
 0x1e0   : > { %846 = vst [vmem:[%s1886_s6 + $0xf0] sm:$0xff] %v814_v49  ;;  %847 = vst [vmem:[%s1886_s6 + $0xf8] sm:$0xff] %v815_v38 }
 0x1e1 PF: > { %p848_p1 = scmp.eq.s32.totalorder %s1582_s1, 0  ;;  %p849_p3 = scmp.eq.s32.totalorder %s1882_s15, 0 }
 0x1e3   : > { %p850_p5 = pnand %p849_p3, %p848_p1 }
 0x1e4   : > { %v1609_v57 = vmov (!%p850_p5), 0.0  }
 0x1e5   : > { %853 = sbr.rel (%p850_p5) target bundleno = 501 (0x1f5), region = 52  ;;  %854 = vst [vmem:[%s1886_s6] sm:$0xff] (!%p850_p5), %v1609_v57  ;;  %855 = vst [vmem:[%s1886_s6 + $0x8] sm:$0xff] (!%p850_p5), %v1609_v57 }
 0x1e6   : > { %856 = vst [vmem:[%s1886_s6 + $0x10] sm:$0xff] (!%p850_p5), %v1609_v57  ;;  %857 = vst [vmem:[%s1886_s6 + $0x18] sm:$0xff] (!%p850_p5), %v1609_v57 }
 0x1e7   : > { %858 = vst [vmem:[%s1886_s6 + $0x20] sm:$0xff] (!%p850_p5), %v1609_v57  ;;  %859 = vst [vmem:[%s1886_s6 + $0x28] sm:$0xff] (!%p850_p5), %v1609_v57 }
 0x1e8   : > { %860 = vst [vmem:[%s1886_s6 + $0x30] sm:$0xff] (!%p850_p5), %v1609_v57  ;;  %861 = vst [vmem:[%s1886_s6 + $0x38] sm:$0xff] (!%p850_p5), %v1609_v57 }
 0x1e9   : > { %862 = vst [vmem:[%s1886_s6 + $0x40] sm:$0xff] (!%p850_p5), %v1609_v57  ;;  %863 = vst [vmem:[%s1886_s6 + $0x48] sm:$0xff] (!%p850_p5), %v1609_v57 }
 0x1ea   : > { %864 = vst [vmem:[%s1886_s6 + $0x50] sm:$0xff] (!%p850_p5), %v1609_v57  ;;  %865 = vst [vmem:[%s1886_s6 + $0x58] sm:$0xff] (!%p850_p5), %v1609_v57 }
 0x1eb   : > { %866 = vst [vmem:[%s1886_s6 + $0x60] sm:$0xff] (!%p850_p5), %v1609_v57  ;;  %867 = vst [vmem:[%s1886_s6 + $0x68] sm:$0xff] (!%p850_p5), %v1609_v57 }
 0x1ec   : > { %868 = vst [vmem:[%s1886_s6 + $0x70] sm:$0xff] %v1609_v57  ;;  %869 = vst [vmem:[%s1886_s6 + $0x78] sm:$0xff] %v1609_v57 }
 0x1ed   : > { %870 = vst [vmem:[%s1886_s6 + $0x80] sm:$0xff] %v1609_v57  ;;  %871 = vst [vmem:[%s1886_s6 + $0x88] sm:$0xff] %v1609_v57 }
 0x1ee   : > { %872 = vst [vmem:[%s1886_s6 + $0x90] sm:$0xff] %v1609_v57  ;;  %873 = vst [vmem:[%s1886_s6 + $0x98] sm:$0xff] %v1609_v57 }
 0x1ef   : > { %874 = vst [vmem:[%s1886_s6 + $0xa0] sm:$0xff] %v1609_v57  ;;  %875 = vst [vmem:[%s1886_s6 + $0xa8] sm:$0xff] %v1609_v57 }
 0x1f0   : > { %876 = vst [vmem:[%s1886_s6 + $0xb0] sm:$0xff] %v1609_v57  ;;  %877 = vst [vmem:[%s1886_s6 + $0xb8] sm:$0xff] %v1609_v57 }
 0x1f1   : > { %878 = vst [vmem:[%s1886_s6 + $0xc0] sm:$0xff] %v1609_v57  ;;  %879 = vst [vmem:[%s1886_s6 + $0xc8] sm:$0xff] %v1609_v57 }
 0x1f2   : > { %880 = vst [vmem:[%s1886_s6 + $0xd0] sm:$0xff] %v1609_v57  ;;  %881 = vst [vmem:[%s1886_s6 + $0xd8] sm:$0xff] %v1609_v57 }
 0x1f3   : > { %882 = vst [vmem:[%s1886_s6 + $0xe0] sm:$0xff] %v1609_v57  ;;  %883 = vst [vmem:[%s1886_s6 + $0xe8] sm:$0xff] %v1609_v57 }
 0x1f4   : > { %884 = vst [vmem:[%s1886_s6 + $0xf0] sm:$0xff] %v1609_v57  ;;  %885 = vst [vmem:[%s1886_s6 + $0xf8] sm:$0xff] %v1609_v57 }
 0x1f5 PF: > { %s1071_s1 = sshll.u32 %s1586_s14, 12  ;;  %s2320_s29 = sld [smem:[#allocation26_spill]] }
 0x1f6   : > { %s900_s19 = sshll.u32 %s1886_s6, 4  ;;  %s2213_s30 = scalar_lea.sflag [#allocation7], %s208_s3  ;;  %s2209_s19 = int_to_ptr.vmem [resolvable:$true] %s900_s19 }
 0x1f7   : > { %s1470_s8 = scalar_lea.vmem %s2209_s19, 4096  ;;  %p2321_p13 = scmp.ne.s32.totalorder %s2302_s22, 0 }
 0x1f8   : > { %p1471_p12 = scmp.ne.s32.totalorder %s2209_s19, %s1470_s8  ;;  %s1610_s14 = smov [#allocation10]  }
 0x1f9   : > { %s1474_s7 = sshll.u32 %s1610_s14, 4  ;;  %s1475_s7 = int_to_ptr.vmem [resolvable:$false] %s1474_s7 }
 0x1fa   : > { %p1472_p2 = pnand %p1471_p12, %p2321_p13  ;;  %s1476_s26 = scalar_lea.vmem %s1475_s7, 8192 }
 0x1fb   : > { %s2206_s27 = scalar_lea.hbm %s2320_s29, %s1071_s1  ;;  %p1477_p7 = scmp.lt.s32.totalorder %s2209_s19, %s1475_s7 }
 0x1fc   : > { %p1473_p6 = pneg %p1472_p2  ;;  %p1478_p0 = scmp.lt.s32.totalorder %s1476_s26, %s1470_s8 }
 0x1fe   : > { %p1479_p4 = por %p1478_p0, %p1477_p7 }
 0x200   : > { %p1480_p8 = pnand %p1479_p4, %p1473_p6 }
 0x202   : > { %1483 = shalt.err (!%p1480_p8)
}
 0x203   : > { %s1484_s28 = scalar_lea.hbm %s2206_s27, 4096  ;;  %s1488_s15 = scalar_lea.hbm %s2320_s29, 12288 }
 0x204   : > { %p1485_p10 = scmp.ne.s32.totalorder %s2206_s27, %s1484_s28  ;;  %p1489_p1 = scmp.lt.u32.totalorder %s2206_s27, %s2320_s29 }
 0x205   : > { %p1490_p3 = scmp.lt.u32.totalorder %s1488_s15, %s1484_s28  ;;  %p1492_p12 = scmp.lt.u32.totalorder %s1484_s28, %s2206_s27 }
 0x206   : > { %p1486_p9 = pnand %p1485_p10, %p2321_p13 }
 0x207   : > { %p1491_p5 = por %p1490_p3, %p1489_p1 }
 0x208   : > { %p1487_p11 = pneg %p1486_p9 }
 0x209   : > { %p1493_p2 = por %p1492_p12, %p1491_p5 }
 0x20b   : > { %p1494_p6 = pnand %p1493_p2, %p1487_p11 }
 0x20d   : > { %1497 = shalt.err (!%p1494_p6)
}
 0x20e   : > { %s1611_s20 = smov 128   ;;  %s1612_s21 = smov 8  }
 0x20f   : > { %1209 = dma.vmem_to_hbm [thread:$0]  (%p2321_p13), %s2209_s19, 4096, %s2206_s27, %s2213_s30, %s1611_s20, %s1611_s20, %s1612_s21  }
 0x210 PF: > { %s2322_s11 = sld [smem:[#allocation20_spill]]  ;;  %s2323_s5 = sld [smem:[#allocation17_spill]] }
 0x211   : > { %s2324_s4 = sld [smem:[#allocation21_spill]] }
 0x216   : > { %p1228_p7 = scmp.ge.s32.totalorder %s2322_s11, 2  ;;  %s915_s0 = sand.u32 1, %s2323_s5  }
 0x217   : > { %p2325_p0 = scmp.ne.s32.totalorder %s2324_s4, 0  ;;  %s916_s17 = scalar_lea.sflag [#allocation7], %s915_s0 }
 0x219   : > { %p1222_p4 = pnand %p1228_p7, %p2325_p0 }
 0x21b   : > { %1553 = dma.done.wait (!%p1222_p4), %s916_s17, 4096  }
 0x21c   : > { %1555 = vsyncadd (!%p1222_p4), %s916_s17, 4294963200  ;;  %s27_s17 = sadd.s32 1, %s2322_s11   ;;  %s2326_s1 = sld [smem:[#allocation18_spill]] }
 0x21d   : > { %p24_p8 = scmp.ge.s32.totalorder %s27_s17, 11   ;;  %s2327_s10 = sld [smem:[#allocation24_spill]] }
 0x21e   : > { %s2328_s22 = sld [smem:[#allocation19_spill]]  ;;  %s2329_s15 = sld [smem:[#allocation22_spill]] }
 0x21f   : > { %s2330_s18 = sld [smem:[#allocation23_spill]]  ;;  %s2331_s0 = smov %s1562_s9 }
 0x220   : > { %s2333_s11 = smov %s1574_s12  ;;  %s2334_s12 = smov %s1578_s13 }
 0x221   : > { %s2335_s13 = smov %s1828_s23  ;;  %s2337_s14 = smov %s1594_s16 }
 0x222   : > { %s2332_s9 = smov %s2326_s1  ;;  %26 = sbr.rel (!%p24_p8) target bundleno = 30 (0x1e), region = 94 }
 0x224   : > { %s2336_s1 = smov %s2328_s22 }
 0x225   : > { %s2338_s16 = smov %s2330_s18 }
 0x229   :  { %921 = vsyncpa [#allocation6], 1 }
 0x22a   :  { %923 = vsyncpa [#allocation6 + $0x1], 1 }
 0x22b   :  { %924 = vsyncpa [#allocation9], 1 }
 0x22c   :  { %925 = vsyncpa [#allocation7], 1 }
 0x22d   :  { %927 = vsyncpa [#allocation7 + $0x1], 1 }

// kernel: tpu_custom_call.1
= control target key start
LH: loop header
LB: loop body
LE: loop exit
PB: predicated region body
PF: predicated region fallthrough
CT: control target
= control target key end

     0   :  { %s2274_s0 = inlined_call_operand.hbm [shape: s32[9], index: 0, kind: input, shape index: {}]   ;;  %s2275_s2 = inlined_call_operand.hbm [shape: bf16[768,768], index: 2, kind: input, shape index: {}]   ;;  %s2276_s3 = inlined_call_operand.hbm [shape: bf16[768,128], index: 3, kind: input, shape index: {}]   ;;  %s2277_s4 = inlined_call_operand.hbm [shape: f32[768,128], index: 4, kind: output, shape index: {}]   ;;  %s2278_s1 = inlined_call_operand.hbm [shape: s32[3], index: 1, kind: input, shape index: {}]  }
   0x1   :  { %2294 = sst [smem:[#allocation25_spill]] %s2276_s3  ;;  %s1392_s17 = scalar_lea.hbm %s2274_s0, 16 }
   0x2   :  { %2295 = sst [smem:[#allocation26_spill]] %s2277_s4  ;;  %p1393_p0 = scmp.ne.s32.totalorder %s2274_s0, %s1392_s17 }
   0x3   :  { %p1396_p1 = scmp.lt.u32.totalorder %s1392_s17, %s2274_s0 }
   0x5   :  { %p1398_p2 = pnand %p1396_p1, %p1393_p0 }
   0x7   :  { %1401 = shalt.err (!%p1398_p2)  }
   0x8   :  { %s1600_s22 = smov [#allocation3]   ;;  %s1402_s27 = scalar_lea.hbm %s2278_s1, 16 }
   0x9   :  { %10 = dma.hbm_to_smem %s2274_s0, 16, %s1600_s22, [#allocation2] }
   0xa   :  { %p1403_p3 = scmp.ne.s32.totalorder %s2278_s1, %s1402_s27  ;;  %p1406_p4 = scmp.lt.u32.totalorder %s1402_s27, %s2278_s1 }
   0xc   :  { %p1408_p5 = pnand %p1406_p4, %p1403_p3 }
   0xe   :  { %1411 = shalt.err (!%p1408_p5)  }
   0xf   :  { %s1601_s6 = smov [#allocation4]  }
  0x10   :  { %12 = dma.hbm_to_smem %s2278_s1, 16, %s1601_s6, [#allocation2] }
  0x11   :  { %1542 = dma.done.wait [#allocation2], 32 }
  0x12   :  { %1543 = vsyncadd [#allocation2], 4294967264 }
  0x13   :  { %14 = sfence }
  0x14   :  { %15 = vsyncpa [#allocation6], 0 }
  0x15   :  { %17 = vsyncpa [#allocation6 + $0x1], 0 }
  0x16   :  { %18 = vsyncpa [#allocation9], 0 }
  0x17   :  { %19 = vsyncpa [#allocation7], 0 }
  0x18   :  { %21 = vsyncpa [#allocation7 + $0x1], 0  ;;  %s1662_s0 = smov 0   ;;  %s1664_s9 = smov 0  }
  0x19   :  { %s1666_s10 = smov 0   ;;  %s1668_s11 = smov 0  }
  0x1a   :  { %s1670_s12 = smov 0   ;;  %s1672_s13 = smov 0  }
  0x1b   :  { %s1674_s1 = smov 0   ;;  %s1676_s14 = smov 0  }
  0x1c   :  { %s1678_s15 = smov 0   ;;  %s1680_s16 = smov 0  }
  0x1d   :  { %s1682_s17 = smov 0  }
  0x1e LB: > { %2296 = sst [smem:[#allocation17_spill]] %s1558_s0  ;;  %s999_s18 = sadd.s32 4294967295, %s1598_s17   ;;  %s1598_s17 = sphi %s1682_s17, %s27_s17   ;;  %s1594_s16 = sphi %s1680_s16, %s2338_s16   ;;  %s1590_s15 = sphi %s1678_s15, %s2329_s15   ;;  %s1586_s14 = sphi %s1676_s14, %s2337_s14   ;;  %s1582_s1 = sphi %s1674_s1, %s2336_s1   ;;  %s1578_s13 = sphi %s1672_s13, %s2335_s13   ;;  %s1574_s12 = sphi %s1670_s12, %s2334_s12   ;;  %s1570_s11 = sphi %s1668_s11, %s2333_s11   ;;  %s1566_s10 = sphi %s1666_s10, %s2327_s10   ;;  %s1562_s9 = sphi %s1664_s9, %s2332_s9   ;;  %s1558_s0 = sphi %s1662_s0, %s2331_s0  }
  0x1f   : > { %2297 = sst [smem:[#allocation18_spill]] %s1566_s10  ;;  %s1000_s19 = sadd.s32 4294967294, %s1598_s17  }
  0x20   : > { %2298 = sst [smem:[#allocation19_spill]] %s1590_s15  ;;  %p67_p6 = scmp.ne.s32.totalorder %s1574_s12, %s1570_s11 }
  0x21   : > { %2299 = sst [smem:[#allocation20_spill]] %s1598_s17  ;;  %p1720_p8 = scmp.eq.s32.totalorder %s999_s18, 0 }
  0x22   : > { %p111_p10 = scmp.ne.s32.totalorder %s1566_s10, %s1562_s9  ;;  %p112_p12 = scmp.eq.s32.totalorder %s999_s18, 8 }
  0x23   : > { %s2300_s20 = scalar_select %p1720_p8, 1, 0 }
  0x24   : > { %p1729_p11 = por %p1720_p8, %p67_p6  ;;  %p117_p13 = scmp.ne.s32.totalorder %s1562_s9, %s1558_s0 }
  0x25   : > { %p118_p0 = scmp.eq.s32.totalorder %s1000_s19, 8  ;;  %p1735_p1 = por %p112_p12, %p111_p10 }
  0x26   : > { %s2301_s21 = scalar_select %p1729_p11, 1, 0 }
  0x27   : > { %s2302_s22 = scalar_select %p1735_p1, 1, 0 }
  0x28   : > { %p1001_p2 = scmp.ge.s32.totalorder %s1598_s17, 1  ;;  %p1740_p3 = por %p118_p0, %p117_p13 }
  0x29   : > { %p125_p4 = scmp.lt.s32.totalorder %s1598_s17, 10  ;;  %s1602_s25 = smov [#allocation8]  }
  0x2a   : > { %s2303_s23 = scalar_select %p1740_p3, 1, 0 }
  0x2b   : > { %p1745_p5 = pnand %p1001_p2, %p125_p4  ;;  %s137_s26 = sshll.u32 %s1602_s25, 4  ;;  %s138_s26 = int_to_ptr.vmem [resolvable:$true] %s137_s26 }
  0x2c   : > { %2304 = sst [smem:[#allocation21_spill]] %s2303_s23  ;;  %s36_s28 = sadd.s32 1, %s1590_s15 }
  0x2d   : > { %s2305_s24 = scalar_select %p1745_p5, 1, 0 }
  0x2e   : > { %p1211_p6 = pneg %p1745_p5  ;;  %s2307_s3 = sld [smem:[#allocation25_spill]] }
  0x30   : > { %p1753_p10 = pnand %p1211_p6, %p1720_p8 }
  0x32   : > { %p1414_p13 = pneg %p1753_p10 }
  0x34   : > { %s1412_s5 = scalar_lea.hbm %s2307_s3, 6144 }
  0x35   : > { %p1413_p12 = scmp.ne.s32.totalorder %s2307_s3, %s1412_s5  ;;  %p1419_p4 = scmp.lt.u32.totalorder %s1412_s5, %s2307_s3 }
  0x37   : > { %p1415_p0 = pnand %p1414_p13, %p1413_p12 }
  0x39   : > { %p1416_p2 = pneg %p1415_p0 }
  0x3b   : > { %p1421_p6 = pnand %p1419_p4, %p1416_p2 }
  0x3d   : > { %1424 = shalt.err (!%p1421_p6)
}
  0x3e   : > { %s1425_s18 = scalar_lea.vmem %s138_s26, 6144  ;;  %p1433_p1 = scmp.lt.s32.totalorder %s138_s26, %s138_s26 }
  0x3f   : > { %p1426_p9 = scmp.ne.s32.totalorder %s138_s26, %s1425_s18  ;;  %p1434_p8 = scmp.lt.s32.totalorder %s1425_s18, %s1425_s18 }
  0x41   : > { %p1428_p7 = pnand %p1426_p9, %p1414_p13  ;;  %p1435_p11 = por %p1434_p8, %p1433_p1 }
  0x43   : > { %p1429_p3 = pneg %p1428_p7 }
  0x45   : > { %p1436_p5 = pnand %p1435_p11, %p1429_p3 }
  0x47   : > { %1439 = shalt.err (!%p1436_p5)
}
  0x48   : > { %s1603_s19 = smov 64   ;;  %s1604_s25 = smov 4  }
  0x49   : > { %1214 = dma.hbm_to_vmem [thread:$0]  (!%p1753_p10), %s2307_s3, 6144, %s138_s26, [#allocation9], %s1603_s19, %s1603_s19, %s1604_s25  }
  0x4a   : > { %p37_p7 = scmp.ge.s32.totalorder %s36_s28, 3  ;;  %s39_s5 = sadd.s32 1, %s1594_s16 }
  0x4b   : > { %p2308_p8 = scmp.ne.s32.totalorder %s1578_s13, %s1574_s12  ;;  %p2309_p9 = scmp.eq.s32.totalorder %s1598_s17, 0 }
  0x4c   : > { %s101_s8 = sadd.s32 1, %s1566_s10  ;;  %s2340_s5 = smov (!%p37_p7, %s39_s5), %s1594_s16 }
  0x4d   : > { %p1783_p11 = por %p2309_p9, %p2308_p8  ;;  %s43_s27 = smul.u32 3, %s1594_s16 }
  0x4e   : > { %p1226_p1 = scmp.lt.s32.totalorder %s1598_s17, 9  ;;  %p41_p3 = scmp.ge.s32.totalorder %s2340_s5, 3 }
  0x4f   : > { %s2285_s26 = sand.u32 1, %s1578_s13   ;;  %s2342_s28 = smov (%p37_p7, %s36_s28), 0 }
  0x50   : > { %2311 = sst [smem:[#allocation22_spill]] %s2342_s28  ;;  %s2344_s5 = smov (%p41_p3, %s2340_s5), 0 }
  0x51   : > { %2312 = sst [smem:[#allocation23_spill]] %s2344_s5  ;;  %s44_s11 = sadd.s32 %s1590_s15, %s43_s27 }
  0x52   : > { %s1004_s18 = sshll.u32 %s2285_s26, 8  ;;  %s46_s19 = smul.u32 3, %s2344_s5 }
  0x53   : > { %s49_s25 = ssub.s32 %s1594_s16, %s2344_s5  ;;  %s45_s29 = sld [smem:[#allocation3 + %s44_s11]] }
  0x54   : > { %p99_p5 = scmp.eq.s32.totalorder %s49_s25, 0  ;;  %s47_s30 = sadd.s32 %s46_s19, %s2342_s28 }
  0x55   : > { %s48_s6 = sld [smem:[#allocation3 + %s47_s30]]  ;;  %p1809_p10 = pnand %p1226_p1, %p1783_p11 }
  0x56   : > { %s1814_s23 = scalar_select %p99_p5, %s1566_s10, %s101_s8  }
  0x57   : > { %s1203_s27 = scalar_select %p1783_p11, [#allocation3], [#allocation11] }
  0x58   : > { %2314 = sst [smem:[#allocation24_spill]] %s1814_s23  ;;  %s2346_s11 = smov (!%p1783_p11, %s44_s11), 0 }
  0x59   : > { %s2348_s27 = smov (!%p1226_p1, %s1203_s27), [#allocation12]  ;;  %s2350_s11 = smov (!%p1226_p1, %s2346_s11), 0 }
  0x5a   : > { %s158_s30 = sld [smem:[%s2348_s27 + %s2350_s11]]  ;;  %s1200_s5 = smul.u32 192, %s1594_s16 }
  0x5b   : > { %s50_s26 = ssub.s32 %s45_s29, %s48_s6  ;;  %s155_s28 = scalar_lea.vmem [#allocation5], %s1004_s18 }
  0x5c   : > { %s51_s19 = sor.u32 %s50_s26, %s49_s25  ;;  %s168_s15 = sshll.u32 %s155_s28, 4  ;;  %s1830_s15 = int_to_ptr.vmem [resolvable:$true] %s168_s15 }
  0x5d   : > { %p52_p12 = scmp.eq.s32.totalorder %s51_s19, 0  ;;  %s2315_s8 = sadd.s32 1, %s1578_s13 }
  0x5e   : > { %s2316_s26 = sand.u32 1, %s1578_s13   ;;  %p1442_p0 = pneg %p1809_p10 }
  0x5f   : > { %s1828_s23 = scalar_select %p52_p12, %s1578_s13, %s2315_s8  }
  0x60   : > { %s1006_s7 = sshll.u32 %s158_s30, 1  ;;  %s1839_s11 = scalar_lea.sflag [#allocation6], %s2316_s26 }
  0x61   : > { %s165_s10 = sadd.s32 %s1200_s5, %s1006_s7  ;;  %s1445_s4 = scalar_lea.hbm %s2275_s2, 36864 }
  0x62   : > { %s1008_s0 = sshll.u32 %s165_s10, 6 }
  0x63   : > { %s1835_s6 = scalar_lea.hbm %s2275_s2, %s1008_s0 }
  0x64   : > { %s1440_s28 = scalar_lea.hbm %s1835_s6, 4096  ;;  %p1446_p6 = scmp.lt.u32.totalorder %s1835_s6, %s2275_s2 }
  0x65   : > { %p1441_p13 = scmp.ne.s32.totalorder %s1835_s6, %s1440_s28  ;;  %p1447_p7 = scmp.lt.u32.totalorder %s1445_s4, %s1440_s28 }
  0x66   : > { %p1449_p9 = scmp.lt.u32.totalorder %s1440_s28, %s1835_s6 }
  0x67   : > { %p1443_p2 = pnand %p1442_p0, %p1441_p13  ;;  %p1448_p8 = por %p1447_p7, %p1446_p6 }
  0x69   : > { %p1444_p4 = pneg %p1443_p2  ;;  %p1450_p11 = por %p1449_p9, %p1448_p8 }
  0x6b   : > { %p1451_p1 = pnand %p1450_p11, %p1444_p4 }
  0x6d   : > { %1454 = shalt.err (!%p1451_p1)
}
  0x6e   : > { %s1455_s18 = scalar_lea.vmem %s1830_s15, 4096  ;;  %s1605_s25 = smov [#allocation5]  }
  0x6f   : > { %p1456_p3 = scmp.ne.s32.totalorder %s1830_s15, %s1455_s18  ;;  %s1460_s29 = sshll.u32 %s1605_s25, 4  ;;  %s1461_s29 = int_to_ptr.vmem [resolvable:$false] %s1460_s29 }
  0x70   : > { %s1462_s27 = scalar_lea.vmem %s1461_s29, 8192  ;;  %p1463_p13 = scmp.lt.s32.totalorder %s1830_s15, %s1461_s29 }
  0x71   : > { %p1458_p5 = pnand %p1456_p3, %p1442_p0  ;;  %p1464_p2 = scmp.lt.s32.totalorder %s1462_s27, %s1455_s18 }
  0x73   : > { %p1459_p12 = pneg %p1458_p5  ;;  %p1465_p6 = por %p1464_p2, %p1463_p13 }
  0x75   : > { %p1466_p7 = pnand %p1465_p6, %p1459_p12 }
  0x77   : > { %1469 = shalt.err (!%p1466_p7)
}
  0x78   : > { %s1606_s19 = smov 384   ;;  %s1607_s30 = smov 128  }
  0x79   : > { %s1608_s8 = smov 8   ;;  %p2317_p0 = scmp.ne.s32.totalorder %s2305_s24, 0 }
  0x7a   : > { %1220 = dma.hbm_to_vmem [thread:$0]  (!%p1809_p10), %s1835_s6, 4096, %s1830_s15, %s1839_s11, %s1606_s19, %s1607_s30, %s1608_s8  }
  0x7b   : > { %180 = sbr.rel (%p2317_p0) target bundleno = 528 (0x210), region = 28  ;;  %s182_s7 = sand.u32 (!%p2317_p0), 1, %s1574_s12  }
  0x7c   : > { %s1010_s26 = sshll.u32 (!%p2317_p0), %s182_s7, 8  ;;  %s183_s28 = scalar_lea.sflag (!%p2317_p0), [#allocation6], %s182_s7 }
  0x7d   : > { %s1870_s10 = scalar_lea.vmem (!%p2317_p0), [#allocation5], %s1010_s26  ;;  %p2318_p4 = scmp.ne.s32.totalorder (!%p2317_p0), %s2301_s21, 0 }
  0x82   : > { %1545 = dma.done.wait (%p2318_p4), %s183_s28, 4096  }
  0x83   : > { %1547 = vsyncadd (%p2318_p4), %s183_s28, 4294963200  ;;  %p2319_p8 = scmp.ne.s32.totalorder %s2300_s20, 0 }
  0x85   : > { %1549 = dma.done.wait (%p2319_p8), [#allocation9], 6144  }
  0x86   : > { %1551 = vsyncadd (%p2319_p8), [#allocation9], 4294961152  ;;  %s208_s3 = sand.u32 1, %s1562_s9   ;;  %s1882_s15 = sld [smem:[#allocation4 + %s1586_s14]] }
  0x87   : > { %s1012_s24 = sshll.u32 %s208_s3, 8 }
  0x88   : > { %s1886_s6 = scalar_lea.vmem [#allocation10], %s1012_s24 }
  0x8c   : > { %p1013_p10 = scmp.ge.s32.totalorder %s1582_s1, %s1882_s15 }
  0x8d   : > { %s223_s20 = smul.u32 (!%p1013_p10), 3, %s1586_s14  ;;  %v1346_v0 = vld [vmem:[%s1870_s10 + $0x4] ss:$8 sps:$4 sm:$0xff] (!%p1013_p10)   ;;  %v1344_v18 = vld [vmem:[%s1870_s10] ss:$8 sps:$4 sm:$0xff] (!%p1013_p10)   ;;  %p1064_p9 = scmp.ne.s32.totalorder (!%p1013_p10), %s1582_s1, 0 }
  0x8e   : > { %222 = sbr.rel (%p1013_p10) target bundleno = 481 (0x1e1), region = 40  ;;  %v1349_v1 = vld [vmem:[%s1870_s10 + $0x84] ss:$8 sps:$4 sm:$0xff] (!%p1013_p10)   ;;  %583 = vmatprep.mubr.bf16.mxu0 (!%p1013_p10), %v1346_v0  ;;  %v1347_v19 = vld [vmem:[%s1870_s10 + $0x80] ss:$8 sps:$4 sm:$0xff] (!%p1013_p10)  }
  0x8f   : > { %s224_s21 = sadd.s32 (!%p1013_p10), %s1582_s1, %s223_s20  ;;  %647 = vmatprep.mubr.bf16.mxu1 (!%p1013_p10), %v1349_v1  ;;  %v1350_v20 = vld [vmem:[%s1870_s10 + $0x14] ss:$8 sps:$4 sm:$0xff] (!%p1013_p10)   ;;  %v1354_v22 = vld [vmem:[%s1870_s10 + $0x10] ss:$8 sps:$4 sm:$0xff] (!%p1013_p10)   ;;  %v1356_v24 = vld [vmem:[%s1870_s10 + $0x24] ss:$8 sps:$4 sm:$0xff] (!%p1013_p10)  }
  0x90   : > { %s225_s11 = sld [smem:[#allocation3 + %s224_s21]] (!%p1013_p10)  ;;  %v1352_v21 = vld [vmem:[%s1870_s10 + $0x94] ss:$8 sps:$4 sm:$0xff] (!%p1013_p10)   ;;  %v1355_v23 = vld [vmem:[%s1870_s10 + $0x90] ss:$8 sps:$4 sm:$0xff] (!%p1013_p10)  }
  0x91   : > { %v1358_v25 = vld [vmem:[%s1870_s10 + $0xa4] ss:$8 sps:$4 sm:$0xff] (!%p1013_p10)   ;;  %v1360_v26 = vld [vmem:[%s1870_s10 + $0x20] ss:$8 sps:$4 sm:$0xff] (!%p1013_p10)   ;;  %v1362_v28 = vld [vmem:[%s1870_s10 + $0x34] ss:$8 sps:$4 sm:$0xff] (!%p1013_p10)  }
  0x92   : > { %v1361_v27 = vld [vmem:[%s1870_s10 + $0xa0] ss:$8 sps:$4 sm:$0xff] (!%p1013_p10)   ;;  %v1364_v29 = vld [vmem:[%s1870_s10 + $0xb4] ss:$8 sps:$4 sm:$0xff] (!%p1013_p10)   ;;  %v1366_v30 = vld [vmem:[%s1870_s10 + $0x30] ss:$8 sps:$4 sm:$0xff] (!%p1013_p10)  }
  0x93   : > { %v1367_v31 = vld [vmem:[%s1870_s10 + $0xb0] ss:$8 sps:$4 sm:$0xff] (!%p1013_p10)   ;;  %v1368_v32 = vld [vmem:[%s1870_s10 + $0x44] ss:$8 sps:$4 sm:$0xff] (!%p1013_p10)   ;;  %v1372_v34 = vld [vmem:[%s1870_s10 + $0x40] ss:$8 sps:$4 sm:$0xff] (!%p1013_p10)  }
  0x94   : > { %v1370_v33 = vld [vmem:[%s1870_s10 + $0xc4] ss:$8 sps:$4 sm:$0xff] (!%p1013_p10)   ;;  %v1373_v35 = vld [vmem:[%s1870_s10 + $0xc0] ss:$8 sps:$4 sm:$0xff] (!%p1013_p10)   ;;  %v1374_v36 = vld [vmem:[%s1870_s10 + $0x54] ss:$8 sps:$4 sm:$0xff] (!%p1013_p10)  }
  0x95   : > { %v1376_v37 = vld [vmem:[%s1870_s10 + $0xd4] ss:$8 sps:$4 sm:$0xff]   ;;  %v1378_v38 = vld [vmem:[%s1870_s10 + $0x50] ss:$8 sps:$4 sm:$0xff]   ;;  %v1380_v40 = vld [vmem:[%s1870_s10 + $0x64] ss:$8 sps:$4 sm:$0xff]  }
  0x96   : > { %s1014_s5 = sshll.u32 %s225_s11, 8  ;;  %v1379_v39 = vld [vmem:[%s1870_s10 + $0xd0] ss:$8 sps:$4 sm:$0xff]   ;;  %v1382_v41 = vld [vmem:[%s1870_s10 + $0xe4] ss:$8 sps:$4 sm:$0xff]  }
  0x97   : > { %s227_s4 = sshra.s32 %s1014_s5, 3  ;;  %v1384_v42 = vld [vmem:[%s1870_s10 + $0x60] ss:$8 sps:$4 sm:$0xff]   ;;  %v1386_v44 = vld [vmem:[%s1870_s10 + $0x74] ss:$8 sps:$4 sm:$0xff]  }
  0x98   : > { %s1015_s0 = sshll.u32 %s227_s4, 2  ;;  %v1385_v43 = vld [vmem:[%s1870_s10 + $0xe0] ss:$8 sps:$4 sm:$0xff]   ;;  %v1388_v45 = vld [vmem:[%s1870_s10 + $0xf4] ss:$8 sps:$4 sm:$0xff]  }
  0x99   : > { %s1894_s17 = scalar_lea.vmem [#allocation8], %s1015_s0  ;;  %v1390_v46 = vld [vmem:[%s1870_s10 + $0x70] ss:$8 sps:$4 sm:$0xff]  }
  0x9a   : > { %v1328_v2 = vld [vmem:[%s1894_s17 + $0x40] sm:$0xff]   ;;  %v1330_v4 = vld [vmem:[%s1894_s17 + $0x48] sm:$0xff]   ;;  %v1332_v6 = vld [vmem:[%s1894_s17 + $0x50] sm:$0xff]  }
  0x9b   : > { %v1329_v3 = vld [vmem:[%s1894_s17] sm:$0xff]   ;;  %1072 = vmatprep.subr.bf16.mxu0 %v1328_v2  ;;  %1184 = vmatprep.subr.bf16.mxu1 %v1328_v2  ;;  %v1331_v5 = vld [vmem:[%s1894_s17 + $0x8] sm:$0xff]   ;;  %v1333_v7 = vld [vmem:[%s1894_s17 + $0x10] sm:$0xff]  }
  0x9c   : > { %1073 = vmatpush3.bf16.msra.mxu0 %v1329_v3  ;;  %1192 = vmatpush3.bf16.msra.mxu1 %v1329_v3  ;;  %v1334_v8 = vld [vmem:[%s1894_s17 + $0x58] sm:$0xff]   ;;  %v1336_v10 = vld [vmem:[%s1894_s17 + $0x60] sm:$0xff]   ;;  %v1338_v12 = vld [vmem:[%s1894_s17 + $0x68] sm:$0xff]  }
  0x9d   : > { %1074 = vmatprep.subr.bf16.mxu0 %v1330_v4  ;;  %1185 = vmatprep.subr.bf16.mxu1 %v1330_v4  ;;  %v1335_v9 = vld [vmem:[%s1894_s17 + $0x18] sm:$0xff]   ;;  %v1337_v11 = vld [vmem:[%s1894_s17 + $0x20] sm:$0xff]   ;;  %v1339_v13 = vld [vmem:[%s1894_s17 + $0x28] sm:$0xff]  }
  0x9e   : > { %v1340_v14 = vld [vmem:[%s1894_s17 + $0x70] sm:$0xff]   ;;  %v1342_v16 = vld [vmem:[%s1894_s17 + $0x78] sm:$0xff]  }
  0x9f   : > { %v1341_v15 = vld [vmem:[%s1894_s17 + $0x30] sm:$0xff]   ;;  %v1343_v17 = vld [vmem:[%s1894_s17 + $0x38] sm:$0xff]  }
  0xa0   : > { %1075 = vmatpush3.bf16.msra.mxu0 %v1331_v5  ;;  %1193 = vmatpush3.bf16.msra.mxu1 %v1331_v5  ;;  %v1391_v47 = vld [vmem:[%s1870_s10 + $0xf0] ss:$8 sps:$4 sm:$0xff]  }
  0xa1   : > { %1076 = vmatprep.subr.bf16.mxu0 %v1332_v6  ;;  %1186 = vmatprep.subr.bf16.mxu1 %v1332_v6 }
  0xa4   : > { %1077 = vmatpush3.bf16.msra.mxu0 %v1333_v7  ;;  %1194 = vmatpush3.bf16.msra.mxu1 %v1333_v7 }
  0xa5   : > { %1078 = vmatprep.subr.bf16.mxu0 %v1334_v8  ;;  %1187 = vmatprep.subr.bf16.mxu1 %v1334_v8 }
  0xa8   : > { %1079 = vmatpush3.bf16.msra.mxu0 %v1335_v9  ;;  %1195 = vmatpush3.bf16.msra.mxu1 %v1335_v9 }
  0xa9   : > { %1080 = vmatprep.subr.bf16.mxu0 %v1336_v10  ;;  %1188 = vmatprep.subr.bf16.mxu1 %v1336_v10 }
  0xac   : > { %1081 = vmatpush3.bf16.msra.mxu0 %v1337_v11  ;;  %1196 = vmatpush3.bf16.msra.mxu1 %v1337_v11 }
  0xad   : > { %1082 = vmatprep.subr.bf16.mxu0 %v1338_v12  ;;  %1189 = vmatprep.subr.bf16.mxu1 %v1338_v12 }
  0xb0   : > { %1083 = vmatpush3.bf16.msra.mxu0 %v1339_v13  ;;  %1197 = vmatpush3.bf16.msra.mxu1 %v1339_v13 }
  0xb1   : > { %1084 = vmatprep.subr.bf16.mxu0 %v1340_v14  ;;  %1190 = vmatprep.subr.bf16.mxu1 %v1340_v14 }
  0xb4   : > { %1085 = vmatpush3.bf16.msra.mxu0 %v1341_v15  ;;  %1198 = vmatpush3.bf16.msra.mxu1 %v1341_v15 }
  0xb5   : > { %1086 = vmatprep.subr.bf16.mxu0 %v1342_v16  ;;  %1191 = vmatprep.subr.bf16.mxu1 %v1342_v16 }
  0xb8   : > { %1087 = vmatpush3.bf16.msra.mxu0 %v1343_v17  ;;  %1199 = vmatpush3.bf16.msra.mxu1 %v1343_v17 }
  0xbb   : > { %584 = vmatmul.mubr.bf16.vlgmr.msra.gmra.mrb[0].mxu0 %v1344_v18  ;;  %648 = vmatmul.mubr.bf16.vlgmr.msra.gmra.mrb[0].mxu1 %v1347_v19 }
  0xbc   : > { %591 = vmatprep.mubr.bf16.mxu0 %v1350_v20  ;;  %655 = vmatprep.mubr.bf16.mxu1 %v1352_v21 }
  0xc3   : > { %592 = vmatmul.mubr.bf16.gmra.mrb[4].mxu0 %v1354_v22  ;;  %656 = vmatmul.mubr.bf16.gmra.mrb[4].mxu1 %v1355_v23 }
  0xc4   : > { %599 = vmatprep.mubr.bf16.mxu0 %v1356_v24  ;;  %663 = vmatprep.mubr.bf16.mxu1 %v1358_v25 }
  0xcb   : > { %600 = vmatmul.mubr.bf16.gmra.mrb[8].mxu0 %v1360_v26  ;;  %664 = vmatmul.mubr.bf16.gmra.mrb[8].mxu1 %v1361_v27 }
  0xcc   : > { %607 = vmatprep.mubr.bf16.mxu0 %v1362_v28  ;;  %671 = vmatprep.mubr.bf16.mxu1 %v1364_v29 }
  0xd3   : > { %608 = vmatmul.mubr.bf16.gmra.mrb[12].mxu0 %v1366_v30  ;;  %672 = vmatmul.mubr.bf16.gmra.mrb[12].mxu1 %v1367_v31 }
  0xd4   : > { %615 = vmatprep.mubr.bf16.mxu0 %v1368_v32  ;;  %679 = vmatprep.mubr.bf16.mxu1 %v1370_v33 }
  0xdb   : > { %616 = vmatmul.mubr.bf16.gmra.mrb[16].mxu0 %v1372_v34  ;;  %680 = vmatmul.mubr.bf16.gmra.mrb[16].mxu1 %v1373_v35 }
  0xdc   : > { %623 = vmatprep.mubr.bf16.mxu0 %v1374_v36  ;;  %687 = vmatprep.mubr.bf16.mxu1 %v1376_v37 }
  0xe3   : > { %624 = vmatmul.mubr.bf16.gmra.mrb[20].mxu0 %v1378_v38  ;;  %688 = vmatmul.mubr.bf16.gmra.mrb[20].mxu1 %v1379_v39 }
  0xe4   : > { %631 = vmatprep.mubr.bf16.mxu0 %v1380_v40  ;;  %695 = vmatprep.mubr.bf16.mxu1 %v1382_v41 }
  0xeb   : > { %632 = vmatmul.mubr.bf16.gmra.mrb[24].mxu0 %v1384_v42  ;;  %696 = vmatmul.mubr.bf16.gmra.mrb[24].mxu1 %v1385_v43 }
  0xec   : > { %639 = vmatprep.mubr.bf16.mxu0 %v1386_v44  ;;  %703 = vmatprep.mubr.bf16.mxu1 %v1388_v45 }
  0xf3   : > { %640 = vmatmul.mubr.bf16.gmra.mrb[28].mxu0 %v1390_v46  ;;  %704 = vmatmul.mubr.bf16.gmra.mrb[28].mxu1 %v1391_v47 }
 0x18e   : > { %v1088_v48 = vpop.f32.mrb[0].mxu0  ;;  %v1136_v49 = vpop.f32.mrb[0].mxu1 }
 0x18f   : > { %v1089_v50 = vpop.f32.mrb[1].mxu0  ;;  %v1137_v51 = vpop.f32.mrb[1].mxu1 }
 0x190   : > { %v1942_v52 = vadd.f32 %v1089_v50, %v1088_v48  ;;  %v1944_v53 = vadd.f32 %v1137_v51, %v1136_v49  ;;  %v1091_v54 = vpop.f32.mrb[2].mxu0  ;;  %v1139_v55 = vpop.f32.mrb[2].mxu1 }
 0x191   : > { %v1092_v56 = vpop.f32.mrb[3].mxu0  ;;  %v1140_v57 = vpop.f32.mrb[3].mxu1 }
 0x192   : > { %v1946_v58 = vadd.f32 %v1092_v56, %v1091_v54  ;;  %v1948_v59 = vadd.f32 %v1140_v57, %v1139_v55  ;;  %716 = vst [vmem:[%s1886_s6] sm:$0xff] (!%p1064_p9), %v1942_v52  ;;  %732 = vst [vmem:[%s1886_s6 + $0x80] sm:$0xff] (!%p1064_p9), %v1944_v53 }
 0x194   : > { %717 = vst [vmem:[%s1886_s6 + $0x8] sm:$0xff] (!%p1064_p9), %v1946_v58  ;;  %733 = vst [vmem:[%s1886_s6 + $0x88] sm:$0xff] (!%p1064_p9), %v1948_v59 }
 0x196   : > { %v1094_v60 = vpop.f32.mrb[4].mxu0  ;;  %v1142_v61 = vpop.f32.mrb[4].mxu1 }
 0x197   : > { %v1095_v62 = vpop.f32.mrb[5].mxu0  ;;  %v1143_v63 = vpop.f32.mrb[5].mxu1 }
 0x198   : > { %v1950_v0 = vadd.f32 %v1095_v62, %v1094_v60  ;;  %v1952_v1 = vadd.f32 %v1143_v63, %v1142_v61  ;;  %v1097_v2 = vpop.f32.mrb[6].mxu0  ;;  %v1145_v3 = vpop.f32.mrb[6].mxu1 }
 0x199   : > { %v1098_v4 = vpop.f32.mrb[7].mxu0  ;;  %v1146_v5 = vpop.f32.mrb[7].mxu1 }
 0x19a   : > { %v1954_v6 = vadd.f32 %v1098_v4, %v1097_v2  ;;  %v1956_v7 = vadd.f32 %v1146_v5, %v1145_v3  ;;  %718 = vst [vmem:[%s1886_s6 + $0x10] sm:$0xff] (!%p1064_p9), %v1950_v0  ;;  %734 = vst [vmem:[%s1886_s6 + $0x90] sm:$0xff] (!%p1064_p9), %v1952_v1 }
 0x19c   : > { %719 = vst [vmem:[%s1886_s6 + $0x18] sm:$0xff] (!%p1064_p9), %v1954_v6  ;;  %735 = vst [vmem:[%s1886_s6 + $0x98] sm:$0xff] (!%p1064_p9), %v1956_v7 }
 0x19e   : > { %v1100_v8 = vpop.f32.mrb[8].mxu0  ;;  %v1148_v9 = vpop.f32.mrb[8].mxu1 }
 0x19f   : > { %v1101_v10 = vpop.f32.mrb[9].mxu0  ;;  %v1149_v11 = vpop.f32.mrb[9].mxu1 }
 0x1a0   : > { %v1958_v12 = vadd.f32 %v1101_v10, %v1100_v8  ;;  %v1960_v13 = vadd.f32 %v1149_v11, %v1148_v9  ;;  %v1103_v14 = vpop.f32.mrb[10].mxu0  ;;  %v1151_v15 = vpop.f32.mrb[10].mxu1 }
 0x1a1   : > { %v1104_v16 = vpop.f32.mrb[11].mxu0  ;;  %v1152_v17 = vpop.f32.mrb[11].mxu1 }
 0x1a2   : > { %v1962_v18 = vadd.f32 %v1104_v16, %v1103_v14  ;;  %v1964_v19 = vadd.f32 %v1152_v17, %v1151_v15  ;;  %720 = vst [vmem:[%s1886_s6 + $0x20] sm:$0xff] (!%p1064_p9), %v1958_v12  ;;  %736 = vst [vmem:[%s1886_s6 + $0xa0] sm:$0xff] (!%p1064_p9), %v1960_v13 }
 0x1a4   : > { %721 = vst [vmem:[%s1886_s6 + $0x28] sm:$0xff] (!%p1064_p9), %v1962_v18  ;;  %737 = vst [vmem:[%s1886_s6 + $0xa8] sm:$0xff] (!%p1064_p9), %v1964_v19 }
 0x1a6   : > { %v1106_v20 = vpop.f32.mrb[12].mxu0  ;;  %v1154_v21 = vpop.f32.mrb[12].mxu1 }
 0x1a7   : > { %v1107_v22 = vpop.f32.mrb[13].mxu0  ;;  %v1155_v23 = vpop.f32.mrb[13].mxu1 }
 0x1a8   : > { %v1966_v24 = vadd.f32 %v1107_v22, %v1106_v20  ;;  %v1968_v25 = vadd.f32 %v1155_v23, %v1154_v21  ;;  %v1109_v26 = vpop.f32.mrb[14].mxu0  ;;  %v1157_v27 = vpop.f32.mrb[14].mxu1 }
 0x1a9   : > { %v1110_v28 = vpop.f32.mrb[15].mxu0  ;;  %v1158_v29 = vpop.f32.mrb[15].mxu1 }
 0x1aa   : > { %v1970_v30 = vadd.f32 %v1110_v28, %v1109_v26  ;;  %v1972_v31 = vadd.f32 %v1158_v29, %v1157_v27  ;;  %722 = vst [vmem:[%s1886_s6 + $0x30] sm:$0xff] (!%p1064_p9), %v1966_v24  ;;  %738 = vst [vmem:[%s1886_s6 + $0xb0] sm:$0xff] (!%p1064_p9), %v1968_v25 }
 0x1ac   : > { %723 = vst [vmem:[%s1886_s6 + $0x38] sm:$0xff] (!%p1064_p9), %v1970_v30  ;;  %739 = vst [vmem:[%s1886_s6 + $0xb8] sm:$0xff] (!%p1064_p9), %v1972_v31 }
 0x1ae   : > { %v1112_v32 = vpop.f32.mrb[16].mxu0  ;;  %v1160_v33 = vpop.f32.mrb[16].mxu1 }
 0x1af   : > { %v1113_v34 = vpop.f32.mrb[17].mxu0  ;;  %v1161_v35 = vpop.f32.mrb[17].mxu1 }
 0x1b0   : > { %v1974_v36 = vadd.f32 %v1113_v34, %v1112_v32  ;;  %v1976_v37 = vadd.f32 %v1161_v35, %v1160_v33  ;;  %v1115_v38 = vpop.f32.mrb[18].mxu0  ;;  %v1163_v39 = vpop.f32.mrb[18].mxu1 }
 0x1b1   : > { %v1116_v40 = vpop.f32.mrb[19].mxu0  ;;  %v1164_v41 = vpop.f32.mrb[19].mxu1 }
 0x1b2   : > { %v1978_v42 = vadd.f32 %v1116_v40, %v1115_v38  ;;  %v1980_v43 = vadd.f32 %v1164_v41, %v1163_v39  ;;  %724 = vst [vmem:[%s1886_s6 + $0x40] sm:$0xff] (!%p1064_p9), %v1974_v36  ;;  %740 = vst [vmem:[%s1886_s6 + $0xc0] sm:$0xff] (!%p1064_p9), %v1976_v37 }
 0x1b4   : > { %725 = vst [vmem:[%s1886_s6 + $0x48] sm:$0xff] (!%p1064_p9), %v1978_v42  ;;  %741 = vst [vmem:[%s1886_s6 + $0xc8] sm:$0xff] (!%p1064_p9), %v1980_v43 }
 0x1b6   : > { %v1118_v44 = vpop.f32.mrb[20].mxu0  ;;  %v1166_v45 = vpop.f32.mrb[20].mxu1 }
 0x1b7   : > { %v1119_v46 = vpop.f32.mrb[21].mxu0  ;;  %v1167_v47 = vpop.f32.mrb[21].mxu1 }
 0x1b8   : > { %v1982_v48 = vadd.f32 %v1119_v46, %v1118_v44  ;;  %v1984_v49 = vadd.f32 %v1167_v47, %v1166_v45  ;;  %v1121_v50 = vpop.f32.mrb[22].mxu0  ;;  %v1169_v51 = vpop.f32.mrb[22].mxu1 }
 0x1b9   : > { %v1122_v54 = vpop.f32.mrb[23].mxu0  ;;  %v1170_v55 = vpop.f32.mrb[23].mxu1 }
 0x1ba   : > { %v1986_v56 = vadd.f32 %v1122_v54, %v1121_v50  ;;  %v1988_v57 = vadd.f32 %v1170_v55, %v1169_v51  ;;  %726 = vst [vmem:[%s1886_s6 + $0x50] sm:$0xff] (!%p1064_p9), %v1982_v48  ;;  %742 = vst [vmem:[%s1886_s6 + $0xd0] sm:$0xff] (!%p1064_p9), %v1984_v49 }
 0x1bc   : > { %727 = vst [vmem:[%s1886_s6 + $0x58] sm:$0xff] (!%p1064_p9), %v1986_v56  ;;  %743 = vst [vmem:[%s1886_s6 + $0xd8] sm:$0xff] (!%p1064_p9), %v1988_v57 }
 0x1be   : > { %v1124_v60 = vpop.f32.mrb[24].mxu0  ;;  %v1172_v61 = vpop.f32.mrb[24].mxu1 }
 0x1bf   : > { %v1125_v62 = vpop.f32.mrb[25].mxu0  ;;  %v1173_v63 = vpop.f32.mrb[25].mxu1 }
 0x1c0   : > { %v1990_v2 = vadd.f32 %v1125_v62, %v1124_v60  ;;  %v1992_v3 = vadd.f32 %v1173_v63, %v1172_v61  ;;  %v1127_v4 = vpop.f32.mrb[26].mxu0  ;;  %v1175_v5 = vpop.f32.mrb[26].mxu1 }
 0x1c1   : > { %v1128_v8 = vpop.f32.mrb[27].mxu0  ;;  %v1176_v9 = vpop.f32.mrb[27].mxu1 }
 0x1c2   : > { %v1994_v10 = vadd.f32 %v1128_v8, %v1127_v4  ;;  %v1996_v11 = vadd.f32 %v1176_v9, %v1175_v5  ;;  %728 = vst [vmem:[%s1886_s6 + $0x60] sm:$0xff] (!%p1064_p9), %v1990_v2  ;;  %744 = vst [vmem:[%s1886_s6 + $0xe0] sm:$0xff] (!%p1064_p9), %v1992_v3 }
 0x1c4   : > { %715 = sbr.rel (%p1064_p9) target bundleno = 461 (0x1cd), region = 44  ;;  %729 = vst [vmem:[%s1886_s6 + $0x68] sm:$0xff] (!%p1064_p9), %v1994_v10  ;;  %745 = vst [vmem:[%s1886_s6 + $0xe8] sm:$0xff] (!%p1064_p9), %v1996_v11 }
 0x1c6   : > { %v1130_v14 = vpop.f32.mrb[28].mxu0  ;;  %v1178_v15 = vpop.f32.mrb[28].mxu1 }
 0x1c7   : > { %v1131_v16 = vpop.f32.mrb[29].mxu0  ;;  %v1179_v17 = vpop.f32.mrb[29].mxu1 }
 0x1c8   : > { %v1998_v20 = vadd.f32 %v1131_v16, %v1130_v14  ;;  %v2000_v21 = vadd.f32 %v1179_v17, %v1178_v15  ;;  %v1133_v22 = vpop.f32.mrb[30].mxu0  ;;  %v1181_v23 = vpop.f32.mrb[30].mxu1 }
 0x1c9   : > { %v1134_v26 = vpop.f32.mrb[31].mxu0  ;;  %v1182_v27 = vpop.f32.mrb[31].mxu1 }
 0x1ca   : > { %v2002_v28 = vadd.f32 %v1134_v26, %v1133_v22  ;;  %v2004_v29 = vadd.f32 %v1182_v27, %v1181_v23  ;;  %730 = vst [vmem:[%s1886_s6 + $0x70] sm:$0xff] (!%p1064_p9), %v1998_v20  ;;  %746 = vst [vmem:[%s1886_s6 + $0xf0] sm:$0xff] (!%p1064_p9), %v2000_v21 }
 0x1cc   : > { %731 = vst [vmem:[%s1886_s6 + $0x78] sm:$0xff] %v2002_v28  ;;  %747 = vst [vmem:[%s1886_s6 + $0xf8] sm:$0xff] %v2004_v29 }
 0x1cd PF: > { %p1065_p11 = scmp.le.s32.totalorder %s1582_s1, 0 }
 0x1ce   : > { %v752_v32 = vld [vmem:[%s1886_s6] sm:$0xff] (!%p1065_p11)  ;;  %v753_v33 = vld [vmem:[%s1886_s6 + $0x8] sm:$0xff] (!%p1065_p11)  ;;  %v754_v34 = vld [vmem:[%s1886_s6 + $0x10] sm:$0xff] (!%p1065_p11) }
 0x1cf   : > { %751 = sbr.rel (%p1065_p11) target bundleno = 481 (0x1e1), region = 48  ;;  %v784_v35 = vadd.f32 (!%p1065_p11), %v1942_v52, %v752_v32  ;;  %v785_v38 = vadd.f32 (!%p1065_p11), %v1946_v58, %v753_v33  ;;  %v786_v39 = vadd.f32 (!%p1065_p11), %v1950_v0, %v754_v34  ;;  %v755_v40 = vld [vmem:[%s1886_s6 + $0x18] sm:$0xff] (!%p1065_p11)  ;;  %v756_v41 = vld [vmem:[%s1886_s6 + $0x20] sm:$0xff] (!%p1065_p11)  ;;  %v757_v44 = vld [vmem:[%s1886_s6 + $0x28] sm:$0xff] (!%p1065_p11) }
 0x1d0   : > { %v787_v45 = vadd.f32 (!%p1065_p11), %v1954_v6, %v755_v40  ;;  %v788_v46 = vadd.f32 (!%p1065_p11), %v1958_v12, %v756_v41  ;;  %v789_v47 = vadd.f32 (!%p1065_p11), %v1962_v18, %v757_v44  ;;  %v758_v52 = vld [vmem:[%s1886_s6 + $0x30] sm:$0xff] (!%p1065_p11)  ;;  %v759_v50 = vld [vmem:[%s1886_s6 + $0x38] sm:$0xff] (!%p1065_p11)  ;;  %v760_v58 = vld [vmem:[%s1886_s6 + $0x40] sm:$0xff] (!%p1065_p11) }
 0x1d1   : > { %816 = vst [vmem:[%s1886_s6] sm:$0xff] (!%p1065_p11), %v784_v35  ;;  %817 = vst [vmem:[%s1886_s6 + $0x8] sm:$0xff] (!%p1065_p11), %v785_v38  ;;  %v790_v0 = vadd.f32 (!%p1065_p11), %v1966_v24, %v758_v52  ;;  %v791_v6 = vadd.f32 (!%p1065_p11), %v1970_v30, %v759_v50  ;;  %v792_v12 = vadd.f32 (!%p1065_p11), %v1974_v36, %v760_v58  ;;  %v761_v51 = vld [vmem:[%s1886_s6 + $0x48] sm:$0xff] (!%p1065_p11)  ;;  %v762_v18 = vld [vmem:[%s1886_s6 + $0x50] sm:$0xff] (!%p1065_p11) }
 0x1d2   : > { %818 = vst [vmem:[%s1886_s6 + $0x10] sm:$0xff] (!%p1065_p11), %v786_v39  ;;  %v763_v54 = vld [vmem:[%s1886_s6 + $0x58] sm:$0xff] (!%p1065_p11)  ;;  %819 = vst [vmem:[%s1886_s6 + $0x18] sm:$0xff] (!%p1065_p11), %v787_v45  ;;  %v793_v55 = vadd.f32 (!%p1065_p11), %v1978_v42, %v761_v51  ;;  %v794_v24 = vadd.f32 (!%p1065_p11), %v1982_v48, %v762_v18  ;;  %v764_v60 = vld [vmem:[%s1886_s6 + $0x60] sm:$0xff] (!%p1065_p11) }
 0x1d3   : > { %820 = vst [vmem:[%s1886_s6 + $0x20] sm:$0xff] (!%p1065_p11), %v788_v46  ;;  %821 = vst [vmem:[%s1886_s6 + $0x28] sm:$0xff] (!%p1065_p11), %v789_v47  ;;  %v795_v30 = vadd.f32 (!%p1065_p11), %v1986_v56, %v763_v54  ;;  %v765_v36 = vld [vmem:[%s1886_s6 + $0x68] sm:$0xff] (!%p1065_p11)  ;;  %v766_v61 = vld [vmem:[%s1886_s6 + $0x70] sm:$0xff] (!%p1065_p11)  ;;  %v796_v62 = vadd.f32 (!%p1065_p11), %v1990_v2, %v764_v60 }
 0x1d4   : > { %822 = vst [vmem:[%s1886_s6 + $0x30] sm:$0xff] (!%p1065_p11), %v790_v0  ;;  %823 = vst [vmem:[%s1886_s6 + $0x38] sm:$0xff] (!%p1065_p11), %v791_v6  ;;  %v797_v42 = vadd.f32 (!%p1065_p11), %v1994_v10, %v765_v36  ;;  %v798_v48 = vadd.f32 (!%p1065_p11), %v1998_v20, %v766_v61  ;;  %v767_v63 = vld [vmem:[%s1886_s6 + $0x78] sm:$0xff] (!%p1065_p11)  ;;  %v768_v56 = vld [vmem:[%s1886_s6 + $0x80] sm:$0xff] (!%p1065_p11) }
 0x1d5   : > { %824 = vst [vmem:[%s1886_s6 + $0x40] sm:$0xff] (!%p1065_p11), %v792_v12  ;;  %v769_v4 = vld [vmem:[%s1886_s6 + $0x88] sm:$0xff] (!%p1065_p11)  ;;  %825 = vst [vmem:[%s1886_s6 + $0x48] sm:$0xff] (!%p1065_p11), %v793_v55  ;;  %v799_v5 = vadd.f32 (!%p1065_p11), %v2002_v28, %v767_v63  ;;  %v800_v2 = vadd.f32 (!%p1065_p11), %v1944_v53, %v768_v56  ;;  %v770_v9 = vld [vmem:[%s1886_s6 + $0x90] sm:$0xff] (!%p1065_p11) }
 0x1d6   : > { %826 = vst [vmem:[%s1886_s6 + $0x50] sm:$0xff] %v794_v24  ;;  %827 = vst [vmem:[%s1886_s6 + $0x58] sm:$0xff] %v795_v30  ;;  %v801_v8 = vadd.f32 %v1948_v59, %v769_v4  ;;  %v771_v10 = vld [vmem:[%s1886_s6 + $0x98] sm:$0xff]  ;;  %v772_v14 = vld [vmem:[%s1886_s6 + $0xa0] sm:$0xff]  ;;  %v802_v15 = vadd.f32 %v1952_v1, %v770_v9 }
 0x1d7   : > { %828 = vst [vmem:[%s1886_s6 + $0x60] sm:$0xff] %v796_v62  ;;  %829 = vst [vmem:[%s1886_s6 + $0x68] sm:$0xff] %v797_v42  ;;  %v803_v16 = vadd.f32 %v1956_v7, %v771_v10  ;;  %v804_v53 = vadd.f32 %v1960_v13, %v772_v14  ;;  %v773_v17 = vld [vmem:[%s1886_s6 + $0xa8] sm:$0xff]  ;;  %v774_v59 = vld [vmem:[%s1886_s6 + $0xb0] sm:$0xff] }
 0x1d8   : > { %830 = vst [vmem:[%s1886_s6 + $0x70] sm:$0xff] %v798_v48  ;;  %v775_v20 = vld [vmem:[%s1886_s6 + $0xb8] sm:$0xff]  ;;  %831 = vst [vmem:[%s1886_s6 + $0x78] sm:$0xff] %v799_v5  ;;  %v805_v22 = vadd.f32 %v1964_v19, %v773_v17  ;;  %v806_v1 = vadd.f32 %v1968_v25, %v774_v59  ;;  %v776_v23 = vld [vmem:[%s1886_s6 + $0xc0] sm:$0xff] }
 0x1d9   : > { %832 = vst [vmem:[%s1886_s6 + $0x80] sm:$0xff] %v800_v2  ;;  %833 = vst [vmem:[%s1886_s6 + $0x88] sm:$0xff] %v801_v8  ;;  %v807_v7 = vadd.f32 %v1972_v31, %v775_v20  ;;  %v777_v13 = vld [vmem:[%s1886_s6 + $0xc8] sm:$0xff]  ;;  %v778_v26 = vld [vmem:[%s1886_s6 + $0xd0] sm:$0xff]  ;;  %v808_v27 = vadd.f32 %v1976_v37, %v776_v23 }
 0x1da   : > { %834 = vst [vmem:[%s1886_s6 + $0x90] sm:$0xff] %v802_v15  ;;  %835 = vst [vmem:[%s1886_s6 + $0x98] sm:$0xff] %v803_v16  ;;  %v809_v19 = vadd.f32 %v1980_v43, %v777_v13  ;;  %v810_v25 = vadd.f32 %v1984_v49, %v778_v26  ;;  %v779_v28 = vld [vmem:[%s1886_s6 + $0xd8] sm:$0xff]  ;;  %v780_v31 = vld [vmem:[%s1886_s6 + $0xe0] sm:$0xff] }
 0x1db   : > { %836 = vst [vmem:[%s1886_s6 + $0xa0] sm:$0xff] %v804_v53  ;;  %v781_v32 = vld [vmem:[%s1886_s6 + $0xe8] sm:$0xff]  ;;  %837 = vst [vmem:[%s1886_s6 + $0xa8] sm:$0xff] %v805_v22  ;;  %v811_v33 = vadd.f32 %v1988_v57, %v779_v28  ;;  %v812_v37 = vadd.f32 %v1992_v3, %v780_v31  ;;  %v782_v43 = vld [vmem:[%s1886_s6 + $0xf0] sm:$0xff] }
 0x1dc   : > { %838 = vst [vmem:[%s1886_s6 + $0xb0] sm:$0xff] %v806_v1  ;;  %839 = vst [vmem:[%s1886_s6 + $0xb8] sm:$0xff] %v807_v7  ;;  %v813_v34 = vadd.f32 %v1996_v11, %v781_v32  ;;  %v783_v35 = vld [vmem:[%s1886_s6 + $0xf8] sm:$0xff]  ;;  %v814_v49 = vadd.f32 %v2000_v21, %v782_v43 }
 0x1dd   : > { %840 = vst [vmem:[%s1886_s6 + $0xc0] sm:$0xff] %v808_v27  ;;  %841 = vst [vmem:[%s1886_s6 + $0xc8] sm:$0xff] %v809_v19  ;;  %v815_v38 = vadd.f32 %v2004_v29, %v783_v35 }
 0x1de   : > { %842 = vst [vmem:[%s1886_s6 + $0xd0] sm:$0xff] %v810_v25  ;;  %843 = vst [vmem:[%s1886_s6 + $0xd8] sm:$0xff] %v811_v33 }
 0x1df   : > { %844 = vst [vmem:[%s1886_s6 + $0xe0] sm:$0xff] %v812_v37  ;;  %845 = vst [vmem:[%s1886_s6 + $0xe8] sm:$0xff] %v813_v34 }
 0x1e0   : > { %846 = vst [vmem:[%s1886_s6 + $0xf0] sm:$0xff] %v814_v49  ;;  %847 = vst [vmem:[%s1886_s6 + $0xf8] sm:$0xff] %v815_v38 }
 0x1e1 PF: > { %p848_p1 = scmp.eq.s32.totalorder %s1582_s1, 0  ;;  %p849_p3 = scmp.eq.s32.totalorder %s1882_s15, 0 }
 0x1e3   : > { %p850_p5 = pnand %p849_p3, %p848_p1 }
 0x1e4   : > { %v1609_v57 = vmov (!%p850_p5), 0.0  }
 0x1e5   : > { %853 = sbr.rel (%p850_p5) target bundleno = 501 (0x1f5), region = 52  ;;  %854 = vst [vmem:[%s1886_s6] sm:$0xff] (!%p850_p5), %v1609_v57  ;;  %855 = vst [vmem:[%s1886_s6 + $0x8] sm:$0xff] (!%p850_p5), %v1609_v57 }
 0x1e6   : > { %856 = vst [vmem:[%s1886_s6 + $0x10] sm:$0xff] (!%p850_p5), %v1609_v57  ;;  %857 = vst [vmem:[%s1886_s6 + $0x18] sm:$0xff] (!%p850_p5), %v1609_v57 }
 0x1e7   : > { %858 = vst [vmem:[%s1886_s6 + $0x20] sm:$0xff] (!%p850_p5), %v1609_v57  ;;  %859 = vst [vmem:[%s1886_s6 + $0x28] sm:$0xff] (!%p850_p5), %v1609_v57 }
 0x1e8   : > { %860 = vst [vmem:[%s1886_s6 + $0x30] sm:$0xff] (!%p850_p5), %v1609_v57  ;;  %861 = vst [vmem:[%s1886_s6 + $0x38] sm:$0xff] (!%p850_p5), %v1609_v57 }
 0x1e9   : > { %862 = vst [vmem:[%s1886_s6 + $0x40] sm:$0xff] (!%p850_p5), %v1609_v57  ;;  %863 = vst [vmem:[%s1886_s6 + $0x48] sm:$0xff] (!%p850_p5), %v1609_v57 }
 0x1ea   : > { %864 = vst [vmem:[%s1886_s6 + $0x50] sm:$0xff] (!%p850_p5), %v1609_v57  ;;  %865 = vst [vmem:[%s1886_s6 + $0x58] sm:$0xff] (!%p850_p5), %v1609_v57 }
 0x1eb   : > { %866 = vst [vmem:[%s1886_s6 + $0x60] sm:$0xff] (!%p850_p5), %v1609_v57  ;;  %867 = vst [vmem:[%s1886_s6 + $0x68] sm:$0xff] (!%p850_p5), %v1609_v57 }
 0x1ec   : > { %868 = vst [vmem:[%s1886_s6 + $0x70] sm:$0xff] %v1609_v57  ;;  %869 = vst [vmem:[%s1886_s6 + $0x78] sm:$0xff] %v1609_v57 }
 0x1ed   : > { %870 = vst [vmem:[%s1886_s6 + $0x80] sm:$0xff] %v1609_v57  ;;  %871 = vst [vmem:[%s1886_s6 + $0x88] sm:$0xff] %v1609_v57 }
 0x1ee   : > { %872 = vst [vmem:[%s1886_s6 + $0x90] sm:$0xff] %v1609_v57  ;;  %873 = vst [vmem:[%s1886_s6 + $0x98] sm:$0xff] %v1609_v57 }
 0x1ef   : > { %874 = vst [vmem:[%s1886_s6 + $0xa0] sm:$0xff] %v1609_v57  ;;  %875 = vst [vmem:[%s1886_s6 + $0xa8] sm:$0xff] %v1609_v57 }
 0x1f0   : > { %876 = vst [vmem:[%s1886_s6 + $0xb0] sm:$0xff] %v1609_v57  ;;  %877 = vst [vmem:[%s1886_s6 + $0xb8] sm:$0xff] %v1609_v57 }
 0x1f1   : > { %878 = vst [vmem:[%s1886_s6 + $0xc0] sm:$0xff] %v1609_v57  ;;  %879 = vst [vmem:[%s1886_s6 + $0xc8] sm:$0xff] %v1609_v57 }
 0x1f2   : > { %880 = vst [vmem:[%s1886_s6 + $0xd0] sm:$0xff] %v1609_v57  ;;  %881 = vst [vmem:[%s1886_s6 + $0xd8] sm:$0xff] %v1609_v57 }
 0x1f3   : > { %882 = vst [vmem:[%s1886_s6 + $0xe0] sm:$0xff] %v1609_v57  ;;  %883 = vst [vmem:[%s1886_s6 + $0xe8] sm:$0xff] %v1609_v57 }
 0x1f4   : > { %884 = vst [vmem:[%s1886_s6 + $0xf0] sm:$0xff] %v1609_v57  ;;  %885 = vst [vmem:[%s1886_s6 + $0xf8] sm:$0xff] %v1609_v57 }
 0x1f5 PF: > { %s1071_s1 = sshll.u32 %s1586_s14, 12  ;;  %s2320_s29 = sld [smem:[#allocation26_spill]] }
 0x1f6   : > { %s900_s19 = sshll.u32 %s1886_s6, 4  ;;  %s2213_s30 = scalar_lea.sflag [#allocation7], %s208_s3  ;;  %s2209_s19 = int_to_ptr.vmem [resolvable:$true] %s900_s19 }
 0x1f7   : > { %s1470_s8 = scalar_lea.vmem %s2209_s19, 4096  ;;  %p2321_p13 = scmp.ne.s32.totalorder %s2302_s22, 0 }
 0x1f8   : > { %p1471_p12 = scmp.ne.s32.totalorder %s2209_s19, %s1470_s8  ;;  %s1610_s14 = smov [#allocation10]  }
 0x1f9   : > { %s1474_s7 = sshll.u32 %s1610_s14, 4  ;;  %s1475_s7 = int_to_ptr.vmem [resolvable:$false] %s1474_s7 }
 0x1fa   : > { %p1472_p2 = pnand %p1471_p12, %p2321_p13  ;;  %s1476_s26 = scalar_lea.vmem %s1475_s7, 8192 }
 0x1fb   : > { %s2206_s27 = scalar_lea.hbm %s2320_s29, %s1071_s1  ;;  %p1477_p7 = scmp.lt.s32.totalorder %s2209_s19, %s1475_s7 }
 0x1fc   : > { %p1473_p6 = pneg %p1472_p2  ;;  %p1478_p0 = scmp.lt.s32.totalorder %s1476_s26, %s1470_s8 }
 0x1fe   : > { %p1479_p4 = por %p1478_p0, %p1477_p7 }
 0x200   : > { %p1480_p8 = pnand %p1479_p4, %p1473_p6 }
 0x202   : > { %1483 = shalt.err (!%p1480_p8)
}
 0x203   : > { %s1484_s28 = scalar_lea.hbm %s2206_s27, 4096  ;;  %s1488_s15 = scalar_lea.hbm %s2320_s29, 12288 }
 0x204   : > { %p1485_p10 = scmp.ne.s32.totalorder %s2206_s27, %s1484_s28  ;;  %p1489_p1 = scmp.lt.u32.totalorder %s2206_s27, %s2320_s29 }
 0x205   : > { %p1490_p3 = scmp.lt.u32.totalorder %s1488_s15, %s1484_s28  ;;  %p1492_p12 = scmp.lt.u32.totalorder %s1484_s28, %s2206_s27 }
 0x206   : > { %p1486_p9 = pnand %p1485_p10, %p2321_p13 }
 0x207   : > { %p1491_p5 = por %p1490_p3, %p1489_p1 }
 0x208   : > { %p1487_p11 = pneg %p1486_p9 }
 0x209   : > { %p1493_p2 = por %p1492_p12, %p1491_p5 }
 0x20b   : > { %p1494_p6 = pnand %p1493_p2, %p1487_p11 }
 0x20d   : > { %1497 = shalt.err (!%p1494_p6)
}
 0x20e   : > { %s1611_s20 = smov 128   ;;  %s1612_s21 = smov 8  }
 0x20f   : > { %1209 = dma.vmem_to_hbm [thread:$0]  (%p2321_p13), %s2209_s19, 4096, %s2206_s27, %s2213_s30, %s1611_s20, %s1611_s20, %s1612_s21  }
 0x210 PF: > { %s2322_s11 = sld [smem:[#allocation20_spill]]  ;;  %s2323_s5 = sld [smem:[#allocation17_spill]] }
 0x211   : > { %s2324_s4 = sld [smem:[#allocation21_spill]] }
 0x216   : > { %p1228_p7 = scmp.ge.s32.totalorder %s2322_s11, 2  ;;  %s915_s0 = sand.u32 1, %s2323_s5  }
 0x217   : > { %p2325_p0 = scmp.ne.s32.totalorder %s2324_s4, 0  ;;  %s916_s17 = scalar_lea.sflag [#allocation7], %s915_s0 }
 0x219   : > { %p1222_p4 = pnand %p1228_p7, %p2325_p0 }
 0x21b   : > { %1553 = dma.done.wait (!%p1222_p4), %s916_s17, 4096  }
 0x21c   : > { %1555 = vsyncadd (!%p1222_p4), %s916_s17, 4294963200  ;;  %s27_s17 = sadd.s32 1, %s2322_s11   ;;  %s2326_s1 = sld [smem:[#allocation18_spill]] }
 0x21d   : > { %p24_p8 = scmp.ge.s32.totalorder %s27_s17, 11   ;;  %s2327_s10 = sld [smem:[#allocation24_spill]] }
 0x21e   : > { %s2328_s22 = sld [smem:[#allocation19_spill]]  ;;  %s2329_s15 = sld [smem:[#allocation22_spill]] }
 0x21f   : > { %s2330_s18 = sld [smem:[#allocation23_spill]]  ;;  %s2331_s0 = smov %s1562_s9 }
 0x220   : > { %s2333_s11 = smov %s1574_s12  ;;  %s2334_s12 = smov %s1578_s13 }
 0x221   : > { %s2335_s13 = smov %s1828_s23  ;;  %s2337_s14 = smov %s1594_s16 }
 0x222   : > { %s2332_s9 = smov %s2326_s1  ;;  %26 = sbr.rel (!%p24_p8) target bundleno = 30 (0x1e), region = 94 }
 0x224   : > { %s2336_s1 = smov %s2328_s22 }
 0x225   : > { %s2338_s16 = smov %s2330_s18 }
 0x229   :  { %921 = vsyncpa [#allocation6], 1 }
 0x22a   :  { %923 = vsyncpa [#allocation6 + $0x1], 1 }
 0x22b   :  { %924 = vsyncpa [#allocation9], 1 }
 0x22c   :  { %925 = vsyncpa [#allocation7], 1 }
 0x22d   :  { %927 = vsyncpa [#allocation7 + $0x1], 1 }

// kernel: tpu_custom_call.1
= control target key start
LH: loop header
LB: loop body
LE: loop exit
PB: predicated region body
PF: predicated region fallthrough
CT: control target
= control target key end

     0   :  { %s2447_s0 = inlined_call_operand.hbm [shape: s32[9], index: 0, kind: input, shape index: {}]   ;;  %s2448_s2 = inlined_call_operand.hbm [shape: bf16[768,768], index: 2, kind: input, shape index: {}]   ;;  %s2449_s3 = inlined_call_operand.hbm [shape: bf16[768,128], index: 3, kind: input, shape index: {}]   ;;  %s2450_s4 = inlined_call_operand.hbm [shape: f32[768,128], index: 4, kind: output, shape index: {}]   ;;  %s2451_s1 = inlined_call_operand.hbm [shape: s32[3], index: 1, kind: input, shape index: {}]  }
   0x1   :  { %2464 = sst [smem:[#allocation26_spill]] %s2448_s2  ;;  %s1456_s17 = scalar_lea.hbm %s2447_s0, 16 }
   0x2   :  { %2465 = sst [smem:[#allocation27_spill]] %s2449_s3  ;;  %p1457_p0 = scmp.ne.s32.totalorder %s2447_s0, %s1456_s17 }
   0x3   :  { %2466 = sst [smem:[#allocation28_spill]] %s2450_s4  ;;  %p1460_p1 = scmp.lt.u32.totalorder %s1456_s17, %s2447_s0 }
   0x5   :  { %p1462_p2 = pnand %p1460_p1, %p1457_p0 }
   0x7   :  { %1465 = shalt.err (!%p1462_p2)  }
   0x8   :  { %s1690_s22 = smov [#allocation3]   ;;  %s1466_s27 = scalar_lea.hbm %s2451_s1, 16 }
   0x9   :  { %10 = dma.hbm_to_smem %s2447_s0, 16, %s1690_s22, [#allocation2] }
   0xa   :  { %p1467_p3 = scmp.ne.s32.totalorder %s2451_s1, %s1466_s27  ;;  %p1470_p4 = scmp.lt.u32.totalorder %s1466_s27, %s2451_s1 }
   0xc   :  { %p1472_p5 = pnand %p1470_p4, %p1467_p3 }
   0xe   :  { %1475 = shalt.err (!%p1472_p5)  }
   0xf   :  { %s1691_s6 = smov [#allocation4]  }
  0x10   :  { %12 = dma.hbm_to_smem %s2451_s1, 16, %s1691_s6, [#allocation2] }
  0x11   :  { %1620 = dma.done.wait [#allocation2], 32 }
  0x12   :  { %1621 = vsyncadd [#allocation2], 4294967264 }
  0x13   :  { %14 = sfence }
  0x14   :  { %15 = vsyncpa [#allocation6], 0 }
  0x15   :  { %17 = vsyncpa [#allocation6 + $0x1], 0 }
  0x16   :  { %18 = vsyncpa [#allocation9], 0 }
  0x17   :  { %20 = vsyncpa [#allocation9 + $0x1], 0 }
  0x18   :  { %21 = vsyncpa [#allocation7], 0 }
  0x19   :  { %23 = vsyncpa [#allocation7 + $0x1], 0  ;;  %s1752_s0 = smov 0   ;;  %s1754_s9 = smov 0  }
  0x1a   :  { %s1756_s10 = smov 0   ;;  %s1758_s11 = smov 0  }
  0x1b   :  { %s1760_s12 = smov 0   ;;  %s1762_s1 = smov 0  }
  0x1c   :  { %s1764_s13 = smov 0   ;;  %s1766_s14 = smov 0  }
  0x1d   :  { %s1768_s15 = smov 0   ;;  %s1770_s16 = smov 0  }
  0x1e   :  { %s1772_s17 = smov 0   ;;  %s1774_s18 = smov 0  }
  0x1f   :  { %s1776_s19 = smov 0   ;;  %s1778_s20 = smov 0  }
  0x20 LB: > { %2467 = sst [smem:[#allocation19_spill]] %s1672_s16  ;;  %s38_s21 = sadd.s32 1, %s1680_s18  ;;  %s1688_s20 = sphi %s1778_s20, %s29_s20   ;;  %s1684_s19 = sphi %s1776_s19, %s2509_s19   ;;  %s1680_s18 = sphi %s1774_s18, %s2508_s18   ;;  %s1676_s17 = sphi %s1772_s17, %s2519_s17   ;;  %s1672_s16 = sphi %s1770_s16, %s2506_s16   ;;  %s1668_s15 = sphi %s1768_s15, %s2518_s15   ;;  %s1664_s14 = sphi %s1766_s14, %s2517_s14   ;;  %s1660_s13 = sphi %s1764_s13, %s2516_s13   ;;  %s1656_s1 = sphi %s1762_s1, %s2515_s1   ;;  %s1652_s12 = sphi %s1760_s12, %s2514_s12   ;;  %s1648_s11 = sphi %s1758_s11, %s2513_s11   ;;  %s1644_s10 = sphi %s1756_s10, %s2512_s10   ;;  %s1640_s9 = sphi %s1754_s9, %s2511_s9   ;;  %s1636_s0 = sphi %s1752_s0, %s2510_s0  }
  0x21   : > { %2468 = sst [smem:[#allocation20_spill]] %s1676_s17  ;;  %s41_s22 = sadd.s32 1, %s1684_s19 }
  0x22   : > { %2469 = sst [smem:[#allocation21_spill]] %s1680_s18  ;;  %p39_p6 = scmp.ge.s32.totalorder %s38_s21, 3 }
  0x23   : > { %2470 = sst [smem:[#allocation22_spill]] %s1684_s19  ;;  %s45_s23 = smul.u32 3, %s1684_s19 }
  0x24   : > { %p63_p7 = scmp.ne.s32.totalorder %s1668_s15, %s1664_s14  ;;  %s2521_s21 = smov (%p39_p6, %s38_s21), 0 }
  0x25   : > { %2471 = sst [smem:[#allocation23_spill]] %s2521_s21  ;;  %s2523_s22 = smov (!%p39_p6, %s41_s22), %s1684_s19 }
  0x26   : > { %s1832_s25 = sadd.s32 %s1680_s18, %s45_s23  ;;  %p2460_p8 = scmp.eq.s32.totalorder %s1688_s20, 0 }
  0x27   : > { %2472 = sst [smem:[#allocation24_spill]] %s1832_s25  ;;  %p43_p9 = scmp.ge.s32.totalorder %s2523_s22, 3 }
  0x28   : > { %s47_s26 = sld [smem:[#allocation3 + %s1832_s25]]  ;;  %p1838_p10 = por %p2460_p8, %p63_p7 }
  0x29   : > { %s2525_s22 = smov (%p43_p9, %s2523_s22), 0  ;;  %s1847_s28 = sld [smem:[#allocation3 + %s1832_s25]] }
  0x2a   : > { %2474 = sst [smem:[#allocation25_spill]] %s2525_s22  ;;  %s48_s29 = smul.u32 3, %s2525_s22 }
  0x2b   : > { %s1852_s30 = ssub.s32 %s1684_s19, %s2525_s22  ;;  %p2459_p13 = scmp.lt.s32.totalorder %s1688_s20, 9 }
  0x2c   : > { %s1857_s5 = sadd.s32 %s48_s29, %s2521_s21  ;;  %s151_s6 = sand.u32 1, %s1668_s15  }
  0x2d   : > { %s50_s7 = sld [smem:[#allocation3 + %s1857_s5]]  ;;  %s1044_s8 = sshll.u32 %s151_s6, 8 }
  0x2e   : > { %s1242_s23 = smul.u32 192, %s1684_s19  ;;  %p1866_p0 = pnand %p2459_p13, %p1838_p10 }
  0x2f   : > { %s1243_s22 = scalar_select %p1838_p10, [#allocation3], [#allocation11] }
  0x30   : > { %s1244_s29 = scalar_select %p1838_p10, %s1832_s25, 0 }
  0x31   : > { %s2527_s22 = smov (!%p2459_p13, %s1243_s22), [#allocation13]  ;;  %s155_s18 = scalar_lea.vmem [#allocation5], %s1044_s8 }
  0x32   : > { %s168_s4 = sshll.u32 %s155_s18, 4  ;;  %s2529_s29 = smov (!%p2459_p13, %s1244_s29), 0  ;;  %s1878_s4 = int_to_ptr.vmem [resolvable:$true] %s168_s4 }
  0x33   : > { %s52_s21 = ssub.s32 %s47_s26, %s50_s7  ;;  %s2476_s19 = sadd.s32 1, %s1668_s15 }
  0x34   : > { %s53_s16 = sor.u32 %s52_s21, %s1852_s30  ;;  %s158_s3 = sld [smem:[%s2527_s22 + %s2529_s29]] }
  0x35   : > { %p54_p1 = scmp.eq.s32.totalorder %s53_s16, 0  ;;  %p1052_p2 = scmp.ge.s32.totalorder %s1688_s20, 1 }
  0x36   : > { %p200_p3 = scmp.lt.s32.totalorder %s1688_s20, 10  ;;  %s2478_s2 = sld [smem:[#allocation26_spill]] }
  0x37   : > { %s1885_s17 = scalar_select %p54_p1, %s1668_s15, %s2476_s19  }
  0x38   : > { %p1889_p4 = pnand %p1052_p2, %p200_p3  ;;  %s1898_s16 = scalar_lea.sflag [#allocation6], %s151_s6 }
  0x39   : > { %p1478_p6 = pneg %p1866_p0 }
  0x3a   : > { %s1046_s26 = sshll.u32 %s158_s3, 1 }
  0x3b   : > { %s165_s18 = sadd.s32 %s1242_s23, %s1046_s26 }
  0x3c   : > { %s1048_s21 = sshll.u32 %s165_s18, 6  ;;  %s1481_s23 = scalar_lea.hbm %s2478_s2, 36864 }
  0x3d   : > { %s1896_s25 = scalar_lea.hbm %s2478_s2, %s1048_s21 }
  0x3e   : > { %s1476_s19 = scalar_lea.hbm %s1896_s25, 4096  ;;  %p1482_p10 = scmp.lt.u32.totalorder %s1896_s25, %s2478_s2 }
  0x3f   : > { %p1477_p5 = scmp.ne.s32.totalorder %s1896_s25, %s1476_s19  ;;  %p1483_p1 = scmp.lt.u32.totalorder %s1481_s23, %s1476_s19 }
  0x40   : > { %p1485_p3 = scmp.lt.u32.totalorder %s1476_s19, %s1896_s25 }
  0x41   : > { %p1479_p7 = pnand %p1478_p6, %p1477_p5  ;;  %p1484_p2 = por %p1483_p1, %p1482_p10 }
  0x43   : > { %p1480_p9 = pneg %p1479_p7  ;;  %p1486_p13 = por %p1485_p3, %p1484_p2 }
  0x45   : > { %p1487_p12 = pnand %p1486_p13, %p1480_p9 }
  0x47   : > { %1490 = shalt.err (!%p1487_p12)
}
  0x48   : > { %s1491_s6 = scalar_lea.vmem %s1878_s4, 4096  ;;  %s1692_s18 = smov [#allocation5]  }
  0x49   : > { %p1492_p5 = scmp.ne.s32.totalorder %s1878_s4, %s1491_s6  ;;  %s1496_s21 = sshll.u32 %s1692_s18, 4  ;;  %s1497_s21 = int_to_ptr.vmem [resolvable:$false] %s1496_s21 }
  0x4a   : > { %s1498_s7 = scalar_lea.vmem %s1497_s21, 8192  ;;  %p1499_p11 = scmp.lt.s32.totalorder %s1878_s4, %s1497_s21 }
  0x4b   : > { %p1494_p7 = pnand %p1492_p5, %p1478_p6  ;;  %p1500_p10 = scmp.lt.s32.totalorder %s1498_s7, %s1491_s6 }
  0x4d   : > { %p1495_p8 = pneg %p1494_p7  ;;  %p1501_p1 = por %p1500_p10, %p1499_p11 }
  0x4f   : > { %p1502_p2 = pnand %p1501_p1, %p1495_p8 }
  0x51   : > { %1505 = shalt.err (!%p1502_p2)
}
  0x52   : > { %s1693_s8 = smov 384   ;;  %s1694_s19 = smov 128  }
  0x53   : > { %s1695_s3 = smov 8   ;;  %s1040_s22 = sadd.s32 4294967295, %s1688_s20  }
  0x54   : > { %1258 = dma.hbm_to_vmem [thread:$0]  (!%p1866_p0), %s1896_s25, 4096, %s1878_s4, %s1898_s16, %s1693_s8, %s1694_s19, %s1695_s3  }
  0x55   : > { %s1041_s23 = sadd.s32 4294967294, %s1688_s20   ;;  %p70_p8 = scmp.eq.s32.totalorder %s1040_s22, 0 }
  0x56   : > { %s84_s29 = sld [smem:[#allocation3 + %s1857_s5]]  ;;  %s88_s26 = sadd.s32 1, %s1656_s1 }
  0x57   : > { %p2479_p11 = scmp.ne.s32.totalorder %s1664_s14, %s1660_s13  ;;  %p95_p13 = scmp.ne.s32.totalorder %s1656_s1, %s1652_s12 }
  0x58   : > { %p101_p6 = scmp.ne.s32.totalorder %s1652_s12, %s1648_s11  ;;  %s114_s24 = sadd.s32 1, %s1644_s10 }
  0x59   : > { %p1933_p12 = por %p70_p8, %p2479_p11  ;;  %p2481_p9 = scmp.eq.s32.totalorder %s1688_s20, 0 }
  0x5a   : > { %s2483_s25 = sld [smem:[#allocation24_spill]]  ;;  %p124_p3 = scmp.ne.s32.totalorder %s1644_s10, %s1640_s9 }
  0x5b   : > { %s2480_s6 = scalar_select %p1933_p12, 1, 0 }
  0x5c   : > { %p1944_p0 = por %p95_p13, %p2481_p9  ;;  %p1950_p5 = por %p101_p6, %p70_p8 }
  0x5d   : > { %p125_p7 = scmp.eq.s32.totalorder %s1040_s22, 8  ;;  %p2485_p10 = scmp.eq.s32.totalorder %s1852_s30, 0 }
  0x5e   : > { %s2484_s13 = scalar_select %p1950_p5, 1, 0 }
  0x5f   : > { %s1957_s11 = scalar_select %p2485_p10, %s1644_s10, %s114_s24  }
  0x60   : > { %s85_s5 = ssub.s32 %s1847_s28, %s84_s29  ;;  %p1960_p1 = por %p125_p7, %p124_p3 }
  0x61   : > { %p86_p2 = scmp.eq.s32.totalorder %s85_s5, 0  ;;  %p130_p11 = scmp.ne.s32.totalorder %s1640_s9, %s1636_s0 }
  0x62   : > { %s2486_s16 = scalar_select %p1960_p1, 1, 0 }
  0x63   : > { %p131_p13 = scmp.eq.s32.totalorder %s1041_s23, 8  ;;  %s178_s18 = sand.u32 1, %s1656_s1  }
  0x64   : > { %s1968_s21 = scalar_select %p86_p2, %s1656_s1, %s88_s26  }
  0x65   : > { %p1970_p8 = por %p131_p13, %p130_p11  ;;  %s1049_s8 = sshll.u32 %s178_s18, 7 }
  0x66   : > { %p2488_p6 = scmp.lt.s32.totalorder %s1688_s20, 9  ;;  %s2531_s25 = smov (!%p1944_p0, %s2483_s25), 0 }
  0x67   : > { %s2487_s7 = scalar_select %p1970_p8, 1, 0 }
  0x68   : > { %p1978_p9 = pnand %p2488_p6, %p1944_p0  ;;  %p2490_p3 = pmov %p2488_p6 }
  0x69   : > { %s1246_s28 = scalar_select %p1944_p0, [#allocation3], [#allocation12] }
  0x6a   : > { %p2491_p7 = pmov %p2490_p3  ;;  %s182_s3 = scalar_lea.vmem [#allocation8], %s1049_s8 }
  0x6b   : > { %s2533_s28 = smov (!%p2490_p3, %s1246_s28), [#allocation14]  ;;  %s192_s22 = sshll.u32 %s182_s3, 4  ;;  %s1991_s22 = int_to_ptr.vmem [resolvable:$true] %s192_s22 }
  0x6c   : > { %s2535_s25 = smov (!%p2491_p7, %s2531_s25), 0  ;;  %s2492_s24 = sld [smem:[#allocation27_spill]] }
  0x6d   : > { %s185_s19 = sld [smem:[%s2533_s28 + %s2535_s25]]  ;;  %s1998_s4 = scalar_lea.sflag [#allocation9], %s178_s18 }
  0x6e   : > { %p1508_p10 = pneg %p1978_p9 }
  0x72   : > { %s1511_s28 = scalar_lea.hbm %s2492_s24, 6144 }
  0x73   : > { %s1112_s23 = sshll.u32 %s185_s19, 11 }
  0x74   : > { %s1996_s5 = scalar_lea.hbm %s2492_s24, %s1112_s23 }
  0x75   : > { %s1506_s2 = scalar_lea.hbm %s1996_s5, 2048  ;;  %p1512_p13 = scmp.lt.u32.totalorder %s1996_s5, %s2492_s24 }
  0x76   : > { %p1507_p0 = scmp.ne.s32.totalorder %s1996_s5, %s1506_s2  ;;  %p1513_p6 = scmp.lt.u32.totalorder %s1511_s28, %s1506_s2 }
  0x77   : > { %p1515_p7 = scmp.lt.u32.totalorder %s1506_s2, %s1996_s5 }
  0x78   : > { %p1509_p2 = pnand %p1508_p10, %p1507_p0  ;;  %p1514_p3 = por %p1513_p6, %p1512_p13 }
  0x7a   : > { %p1510_p11 = pneg %p1509_p2  ;;  %p1516_p8 = por %p1515_p7, %p1514_p3 }
  0x7c   : > { %p1517_p1 = pnand %p1516_p8, %p1510_p11 }
  0x7e   : > { %1520 = shalt.err (!%p1517_p1)
}
  0x7f   : > { %s1521_s18 = scalar_lea.vmem %s1991_s22, 2048  ;;  %s1696_s23 = smov [#allocation8]  }
  0x80   : > { %p1522_p0 = scmp.ne.s32.totalorder %s1991_s22, %s1521_s18  ;;  %s1526_s29 = sshll.u32 %s1696_s23, 4  ;;  %s1527_s29 = int_to_ptr.vmem [resolvable:$false] %s1526_s29 }
  0x81   : > { %s1528_s26 = scalar_lea.vmem %s1527_s29, 4096  ;;  %p1529_p12 = scmp.lt.s32.totalorder %s1991_s22, %s1527_s29 }
  0x82   : > { %p1524_p2 = pnand %p1522_p0, %p1508_p10  ;;  %p1530_p13 = scmp.lt.s32.totalorder %s1528_s26, %s1521_s18 }
  0x84   : > { %p1525_p5 = pneg %p1524_p2  ;;  %p1531_p6 = por %p1530_p13, %p1529_p12 }
  0x86   : > { %p1532_p3 = pnand %p1531_p6, %p1525_p5 }
  0x88   : > { %1535 = shalt.err (!%p1532_p3)
}
  0x89   : > { %s1697_s2 = smov 64   ;;  %s1698_s25 = smov 4  }
  0x8a   : > { %1263 = dma.hbm_to_vmem [thread:$0]  (!%p1978_p9), %s1996_s5, 2048, %s1991_s22, %s1998_s4, %s1697_s2, %s1697_s2, %s1698_s25  }
  0x8b   : > { %204 = sbr.rel (%p1889_p4) target bundleno = 551 (0x227), region = 28  ;;  %s206_s8 = sand.u32 (!%p1889_p4), 1, %s1664_s14  }
  0x8c   : > { %s1053_s28 = sshll.u32 (!%p1889_p4), %s206_s8, 8  ;;  %s207_s19 = scalar_lea.sflag (!%p1889_p4), [#allocation6], %s206_s8 }
  0x8d   : > { %s2029_s3 = scalar_lea.vmem (!%p1889_p4), [#allocation5], %s1053_s28  ;;  %p2493_p12 = scmp.ne.s32.totalorder (!%p1889_p4), %s2480_s6, 0 }
  0x92   : > { %1623 = dma.done.wait (%p2493_p12), %s207_s19, 4096  }
  0x93   : > { %1625 = vsyncadd (%p2493_p12), %s207_s19, 4294963200  ;;  %s215_s18 = sand.u32 1, %s1652_s12   ;;  %p2494_p4 = scmp.ne.s32.totalorder %s2484_s13, 0 }
  0x94   : > { %s1054_s30 = sshll.u32 %s215_s18, 7  ;;  %s216_s22 = scalar_lea.sflag [#allocation9], %s215_s18 }
  0x95   : > { %s2036_s5 = scalar_lea.vmem [#allocation8], %s1054_s30 }
  0x96   : > { %1627 = dma.done.wait (%p2494_p4), %s216_s22, 2048  }
  0x97   : > { %1629 = vsyncadd (%p2494_p4), %s216_s22, 4294965248  ;;  %s2495_s27 = sld [smem:[#allocation20_spill]]  ;;  %s242_s4 = sand.u32 1, %s1640_s9  }
  0x98   : > { %s1055_s6 = sshll.u32 %s242_s4, 8  ;;  %s2496_s26 = sld [smem:[#allocation19_spill]] }
  0x99   : > { %s2048_s29 = scalar_lea.vmem [#allocation10], %s1055_s6 }
  0x9d   : > { %s2044_s23 = sld [smem:[#allocation4 + %s2495_s27]] }
  0xa3   : > { %p1056_p5 = scmp.ge.s32.totalorder %s2496_s26, %s2044_s23 }
  0xa4   : > { %v1392_v0 = vld [vmem:[%s2036_s5 + $0x40] sm:$0xff] (!%p1056_p5)   ;;  %v1394_v2 = vld [vmem:[%s2036_s5 + $0x48] sm:$0xff] (!%p1056_p5)   ;;  %v1396_v4 = vld [vmem:[%s2036_s5 + $0x50] sm:$0xff] (!%p1056_p5)   ;;  %s2497_s13 = sld [smem:[#allocation19_spill]] (!%p1056_p5) }
  0xa5   : > { %260 = sbr.rel (%p1056_p5) target bundleno = 497 (0x1f1), region = 40  ;;  %v1393_v1 = vld [vmem:[%s2036_s5] sm:$0xff] (!%p1056_p5)   ;;  %1114 = vmatprep.subr.bf16.mxu0 (!%p1056_p5), %v1392_v0  ;;  %1226 = vmatprep.subr.bf16.mxu1 (!%p1056_p5), %v1392_v0  ;;  %v1395_v3 = vld [vmem:[%s2036_s5 + $0x8] sm:$0xff] (!%p1056_p5)   ;;  %v1397_v5 = vld [vmem:[%s2036_s5 + $0x10] sm:$0xff] (!%p1056_p5)  }
  0xa6   : > { %1115 = vmatpush3.bf16.msra.mxu0 (!%p1056_p5), %v1393_v1  ;;  %1234 = vmatpush3.bf16.msra.mxu1 (!%p1056_p5), %v1393_v1  ;;  %v1398_v6 = vld [vmem:[%s2036_s5 + $0x58] sm:$0xff] (!%p1056_p5)   ;;  %v1400_v8 = vld [vmem:[%s2036_s5 + $0x60] sm:$0xff] (!%p1056_p5)   ;;  %v1402_v10 = vld [vmem:[%s2036_s5 + $0x68] sm:$0xff] (!%p1056_p5)  }
  0xa7   : > { %1116 = vmatprep.subr.bf16.mxu0 (!%p1056_p5), %v1394_v2  ;;  %1227 = vmatprep.subr.bf16.mxu1 (!%p1056_p5), %v1394_v2  ;;  %v1399_v7 = vld [vmem:[%s2036_s5 + $0x18] sm:$0xff] (!%p1056_p5)   ;;  %v1401_v9 = vld [vmem:[%s2036_s5 + $0x20] sm:$0xff] (!%p1056_p5)   ;;  %v1403_v13 = vld [vmem:[%s2036_s5 + $0x28] sm:$0xff] (!%p1056_p5)  }
  0xa8   : > { %v1410_v11 = vld [vmem:[%s2029_s3 + $0x4] ss:$8 sps:$4 sm:$0xff] (!%p1056_p5)   ;;  %v1404_v14 = vld [vmem:[%s2036_s5 + $0x70] sm:$0xff] (!%p1056_p5)   ;;  %v1406_v16 = vld [vmem:[%s2036_s5 + $0x78] sm:$0xff] (!%p1056_p5)  }
  0xa9   : > { %v1413_v12 = vld [vmem:[%s2029_s3 + $0x84] ss:$8 sps:$4 sm:$0xff] (!%p1056_p5)   ;;  %613 = vmatprep.mubr.bf16.mxu0 (!%p1056_p5), %v1410_v11  ;;  %v1405_v15 = vld [vmem:[%s2036_s5 + $0x30] sm:$0xff] (!%p1056_p5)   ;;  %v1407_v17 = vld [vmem:[%s2036_s5 + $0x38] sm:$0xff] (!%p1056_p5)  }
  0xaa   : > { %1117 = vmatpush3.bf16.msra.mxu0 (!%p1056_p5), %v1395_v3  ;;  %1235 = vmatpush3.bf16.msra.mxu1 (!%p1056_p5), %v1395_v3  ;;  %v1408_v18 = vld [vmem:[%s2029_s3] ss:$8 sps:$4 sm:$0xff] (!%p1056_p5)   ;;  %v1414_v20 = vld [vmem:[%s2029_s3 + $0x14] ss:$8 sps:$4 sm:$0xff] (!%p1056_p5)   ;;  %v1418_v22 = vld [vmem:[%s2029_s3 + $0x10] ss:$8 sps:$4 sm:$0xff] (!%p1056_p5)  }
  0xab   : > { %1118 = vmatprep.subr.bf16.mxu0 (!%p1056_p5), %v1396_v4  ;;  %1228 = vmatprep.subr.bf16.mxu1 (!%p1056_p5), %v1396_v4  ;;  %v1411_v19 = vld [vmem:[%s2029_s3 + $0x80] ss:$8 sps:$4 sm:$0xff] (!%p1056_p5)   ;;  %v1416_v21 = vld [vmem:[%s2029_s3 + $0x94] ss:$8 sps:$4 sm:$0xff] (!%p1056_p5)   ;;  %v1419_v23 = vld [vmem:[%s2029_s3 + $0x90] ss:$8 sps:$4 sm:$0xff] (!%p1056_p5)  }
  0xac   : > { %677 = vmatprep.mubr.bf16.mxu1 %v1413_v12  ;;  %v1420_v24 = vld [vmem:[%s2029_s3 + $0x24] ss:$8 sps:$4 sm:$0xff]   ;;  %v1424_v26 = vld [vmem:[%s2029_s3 + $0x20] ss:$8 sps:$4 sm:$0xff]   ;;  %v1426_v28 = vld [vmem:[%s2029_s3 + $0x34] ss:$8 sps:$4 sm:$0xff]  }
  0xad   : > { %v1422_v25 = vld [vmem:[%s2029_s3 + $0xa4] ss:$8 sps:$4 sm:$0xff]   ;;  %v1425_v27 = vld [vmem:[%s2029_s3 + $0xa0] ss:$8 sps:$4 sm:$0xff]   ;;  %v1428_v29 = vld [vmem:[%s2029_s3 + $0xb4] ss:$8 sps:$4 sm:$0xff]  }
  0xae   : > { %1119 = vmatpush3.bf16.msra.mxu0 %v1397_v5  ;;  %1236 = vmatpush3.bf16.msra.mxu1 %v1397_v5  ;;  %v1430_v30 = vld [vmem:[%s2029_s3 + $0x30] ss:$8 sps:$4 sm:$0xff]   ;;  %v1432_v32 = vld [vmem:[%s2029_s3 + $0x44] ss:$8 sps:$4 sm:$0xff]   ;;  %v1436_v34 = vld [vmem:[%s2029_s3 + $0x40] ss:$8 sps:$4 sm:$0xff]  }
  0xaf   : > { %1120 = vmatprep.subr.bf16.mxu0 %v1398_v6  ;;  %1229 = vmatprep.subr.bf16.mxu1 %v1398_v6  ;;  %v1431_v31 = vld [vmem:[%s2029_s3 + $0xb0] ss:$8 sps:$4 sm:$0xff]   ;;  %v1434_v33 = vld [vmem:[%s2029_s3 + $0xc4] ss:$8 sps:$4 sm:$0xff]   ;;  %v1437_v35 = vld [vmem:[%s2029_s3 + $0xc0] ss:$8 sps:$4 sm:$0xff]  }
  0xb0   : > { %v1438_v36 = vld [vmem:[%s2029_s3 + $0x54] ss:$8 sps:$4 sm:$0xff]   ;;  %v1442_v38 = vld [vmem:[%s2029_s3 + $0x50] ss:$8 sps:$4 sm:$0xff]   ;;  %v1444_v40 = vld [vmem:[%s2029_s3 + $0x64] ss:$8 sps:$4 sm:$0xff]  }
  0xb1   : > { %v1440_v37 = vld [vmem:[%s2029_s3 + $0xd4] ss:$8 sps:$4 sm:$0xff]   ;;  %v1443_v39 = vld [vmem:[%s2029_s3 + $0xd0] ss:$8 sps:$4 sm:$0xff]   ;;  %v1446_v41 = vld [vmem:[%s2029_s3 + $0xe4] ss:$8 sps:$4 sm:$0xff]  }
  0xb2   : > { %1121 = vmatpush3.bf16.msra.mxu0 %v1399_v7  ;;  %1237 = vmatpush3.bf16.msra.mxu1 %v1399_v7  ;;  %v1448_v42 = vld [vmem:[%s2029_s3 + $0x60] ss:$8 sps:$4 sm:$0xff]   ;;  %v1450_v44 = vld [vmem:[%s2029_s3 + $0x74] ss:$8 sps:$4 sm:$0xff]   ;;  %v1454_v46 = vld [vmem:[%s2029_s3 + $0x70] ss:$8 sps:$4 sm:$0xff]  }
  0xb3   : > { %1122 = vmatprep.subr.bf16.mxu0 %v1400_v8  ;;  %1230 = vmatprep.subr.bf16.mxu1 %v1400_v8  ;;  %v1449_v43 = vld [vmem:[%s2029_s3 + $0xe0] ss:$8 sps:$4 sm:$0xff]   ;;  %v1452_v45 = vld [vmem:[%s2029_s3 + $0xf4] ss:$8 sps:$4 sm:$0xff]   ;;  %v1455_v47 = vld [vmem:[%s2029_s3 + $0xf0] ss:$8 sps:$4 sm:$0xff]  }
  0xb4   : > { %p1105_p1 = scmp.ne.s32.totalorder %s2497_s13, 0 }
  0xb6   : > { %1123 = vmatpush3.bf16.msra.mxu0 %v1401_v9  ;;  %1238 = vmatpush3.bf16.msra.mxu1 %v1401_v9 }
  0xb7   : > { %1124 = vmatprep.subr.bf16.mxu0 %v1402_v10  ;;  %1231 = vmatprep.subr.bf16.mxu1 %v1402_v10 }
  0xba   : > { %1125 = vmatpush3.bf16.msra.mxu0 %v1403_v13  ;;  %1239 = vmatpush3.bf16.msra.mxu1 %v1403_v13 }
  0xbb   : > { %1126 = vmatprep.subr.bf16.mxu0 %v1404_v14  ;;  %1232 = vmatprep.subr.bf16.mxu1 %v1404_v14 }
  0xbe   : > { %1127 = vmatpush3.bf16.msra.mxu0 %v1405_v15  ;;  %1240 = vmatpush3.bf16.msra.mxu1 %v1405_v15 }
  0xbf   : > { %1128 = vmatprep.subr.bf16.mxu0 %v1406_v16  ;;  %1233 = vmatprep.subr.bf16.mxu1 %v1406_v16 }
  0xc2   : > { %1129 = vmatpush3.bf16.msra.mxu0 %v1407_v17  ;;  %1241 = vmatpush3.bf16.msra.mxu1 %v1407_v17 }
  0xc5   : > { %614 = vmatmul.mubr.bf16.vlgmr.msra.gmra.mrb[0].mxu0 %v1408_v18  ;;  %678 = vmatmul.mubr.bf16.vlgmr.msra.gmra.mrb[0].mxu1 %v1411_v19 }
  0xc6   : > { %621 = vmatprep.mubr.bf16.mxu0 %v1414_v20  ;;  %685 = vmatprep.mubr.bf16.mxu1 %v1416_v21 }
  0xcd   : > { %622 = vmatmul.mubr.bf16.gmra.mrb[4].mxu0 %v1418_v22  ;;  %686 = vmatmul.mubr.bf16.gmra.mrb[4].mxu1 %v1419_v23 }
  0xce   : > { %629 = vmatprep.mubr.bf16.mxu0 %v1420_v24  ;;  %693 = vmatprep.mubr.bf16.mxu1 %v1422_v25 }
  0xd5   : > { %630 = vmatmul.mubr.bf16.gmra.mrb[8].mxu0 %v1424_v26  ;;  %694 = vmatmul.mubr.bf16.gmra.mrb[8].mxu1 %v1425_v27 }
  0xd6   : > { %637 = vmatprep.mubr.bf16.mxu0 %v1426_v28  ;;  %701 = vmatprep.mubr.bf16.mxu1 %v1428_v29 }
  0xdd   : > { %638 = vmatmul.mubr.bf16.gmra.mrb[12].mxu0 %v1430_v30  ;;  %702 = vmatmul.mubr.bf16.gmra.mrb[12].mxu1 %v1431_v31 }
  0xde   : > { %645 = vmatprep.mubr.bf16.mxu0 %v1432_v32  ;;  %709 = vmatprep.mubr.bf16.mxu1 %v1434_v33 }
  0xe5   : > { %646 = vmatmul.mubr.bf16.gmra.mrb[16].mxu0 %v1436_v34  ;;  %710 = vmatmul.mubr.bf16.gmra.mrb[16].mxu1 %v1437_v35 }
  0xe6   : > { %653 = vmatprep.mubr.bf16.mxu0 %v1438_v36  ;;  %717 = vmatprep.mubr.bf16.mxu1 %v1440_v37 }
  0xed   : > { %654 = vmatmul.mubr.bf16.gmra.mrb[20].mxu0 %v1442_v38  ;;  %718 = vmatmul.mubr.bf16.gmra.mrb[20].mxu1 %v1443_v39 }
  0xee   : > { %661 = vmatprep.mubr.bf16.mxu0 %v1444_v40  ;;  %725 = vmatprep.mubr.bf16.mxu1 %v1446_v41 }
  0xf5   : > { %662 = vmatmul.mubr.bf16.gmra.mrb[24].mxu0 %v1448_v42  ;;  %726 = vmatmul.mubr.bf16.gmra.mrb[24].mxu1 %v1449_v43 }
  0xf6   : > { %669 = vmatprep.mubr.bf16.mxu0 %v1450_v44  ;;  %733 = vmatprep.mubr.bf16.mxu1 %v1452_v45 }
  0xfd   : > { %670 = vmatmul.mubr.bf16.gmra.mrb[28].mxu0 %v1454_v46  ;;  %734 = vmatmul.mubr.bf16.gmra.mrb[28].mxu1 %v1455_v47 }
 0x198   : > { %v1130_v48 = vpop.f32.mrb[0].mxu0  ;;  %v1178_v49 = vpop.f32.mrb[0].mxu1 }
 0x199   : > { %v1131_v50 = vpop.f32.mrb[1].mxu0  ;;  %v1179_v51 = vpop.f32.mrb[1].mxu1 }
 0x19a   : > { %v2100_v52 = vadd.f32 %v1131_v50, %v1130_v48  ;;  %v2102_v53 = vadd.f32 %v1179_v51, %v1178_v49  ;;  %v1133_v54 = vpop.f32.mrb[2].mxu0  ;;  %v1181_v55 = vpop.f32.mrb[2].mxu1 }
 0x19b   : > { %v1134_v56 = vpop.f32.mrb[3].mxu0  ;;  %v1182_v57 = vpop.f32.mrb[3].mxu1 }
 0x19c   : > { %v2104_v58 = vadd.f32 %v1134_v56, %v1133_v54  ;;  %v2106_v59 = vadd.f32 %v1182_v57, %v1181_v55  ;;  %746 = vst [vmem:[%s2048_s29] sm:$0xff] (!%p1105_p1), %v2100_v52  ;;  %762 = vst [vmem:[%s2048_s29 + $0x80] sm:$0xff] (!%p1105_p1), %v2102_v53 }
 0x19e   : > { %747 = vst [vmem:[%s2048_s29 + $0x8] sm:$0xff] (!%p1105_p1), %v2104_v58  ;;  %763 = vst [vmem:[%s2048_s29 + $0x88] sm:$0xff] (!%p1105_p1), %v2106_v59 }
 0x1a0   : > { %v1136_v60 = vpop.f32.mrb[4].mxu0  ;;  %v1184_v61 = vpop.f32.mrb[4].mxu1 }
 0x1a1   : > { %v1137_v62 = vpop.f32.mrb[5].mxu0  ;;  %v1185_v63 = vpop.f32.mrb[5].mxu1 }
 0x1a2   : > { %v2108_v0 = vadd.f32 %v1137_v62, %v1136_v60  ;;  %v2110_v1 = vadd.f32 %v1185_v63, %v1184_v61  ;;  %v1139_v2 = vpop.f32.mrb[6].mxu0  ;;  %v1187_v3 = vpop.f32.mrb[6].mxu1 }
 0x1a3   : > { %v1140_v4 = vpop.f32.mrb[7].mxu0  ;;  %v1188_v5 = vpop.f32.mrb[7].mxu1 }
 0x1a4   : > { %v2112_v6 = vadd.f32 %v1140_v4, %v1139_v2  ;;  %v2114_v7 = vadd.f32 %v1188_v5, %v1187_v3  ;;  %748 = vst [vmem:[%s2048_s29 + $0x10] sm:$0xff] (!%p1105_p1), %v2108_v0  ;;  %764 = vst [vmem:[%s2048_s29 + $0x90] sm:$0xff] (!%p1105_p1), %v2110_v1 }
 0x1a6   : > { %749 = vst [vmem:[%s2048_s29 + $0x18] sm:$0xff] (!%p1105_p1), %v2112_v6  ;;  %765 = vst [vmem:[%s2048_s29 + $0x98] sm:$0xff] (!%p1105_p1), %v2114_v7 }
 0x1a8   : > { %v1142_v8 = vpop.f32.mrb[8].mxu0  ;;  %v1190_v9 = vpop.f32.mrb[8].mxu1 }
 0x1a9   : > { %v1143_v10 = vpop.f32.mrb[9].mxu0  ;;  %v1191_v11 = vpop.f32.mrb[9].mxu1 }
 0x1aa   : > { %v2116_v12 = vadd.f32 %v1143_v10, %v1142_v8  ;;  %v2118_v13 = vadd.f32 %v1191_v11, %v1190_v9  ;;  %v1145_v14 = vpop.f32.mrb[10].mxu0  ;;  %v1193_v15 = vpop.f32.mrb[10].mxu1 }
 0x1ab   : > { %v1146_v16 = vpop.f32.mrb[11].mxu0  ;;  %v1194_v17 = vpop.f32.mrb[11].mxu1 }
 0x1ac   : > { %v2120_v18 = vadd.f32 %v1146_v16, %v1145_v14  ;;  %v2122_v19 = vadd.f32 %v1194_v17, %v1193_v15  ;;  %750 = vst [vmem:[%s2048_s29 + $0x20] sm:$0xff] (!%p1105_p1), %v2116_v12  ;;  %766 = vst [vmem:[%s2048_s29 + $0xa0] sm:$0xff] (!%p1105_p1), %v2118_v13 }
 0x1ae   : > { %751 = vst [vmem:[%s2048_s29 + $0x28] sm:$0xff] (!%p1105_p1), %v2120_v18  ;;  %767 = vst [vmem:[%s2048_s29 + $0xa8] sm:$0xff] (!%p1105_p1), %v2122_v19 }
 0x1b0   : > { %v1148_v20 = vpop.f32.mrb[12].mxu0  ;;  %v1196_v21 = vpop.f32.mrb[12].mxu1 }
 0x1b1   : > { %v1149_v22 = vpop.f32.mrb[13].mxu0  ;;  %v1197_v23 = vpop.f32.mrb[13].mxu1 }
 0x1b2   : > { %v2124_v24 = vadd.f32 %v1149_v22, %v1148_v20  ;;  %v2126_v25 = vadd.f32 %v1197_v23, %v1196_v21  ;;  %v1151_v26 = vpop.f32.mrb[14].mxu0  ;;  %v1199_v27 = vpop.f32.mrb[14].mxu1 }
 0x1b3   : > { %v1152_v28 = vpop.f32.mrb[15].mxu0  ;;  %v1200_v29 = vpop.f32.mrb[15].mxu1 }
 0x1b4   : > { %v2128_v30 = vadd.f32 %v1152_v28, %v1151_v26  ;;  %v2130_v31 = vadd.f32 %v1200_v29, %v1199_v27  ;;  %752 = vst [vmem:[%s2048_s29 + $0x30] sm:$0xff] (!%p1105_p1), %v2124_v24  ;;  %768 = vst [vmem:[%s2048_s29 + $0xb0] sm:$0xff] (!%p1105_p1), %v2126_v25 }
 0x1b6   : > { %753 = vst [vmem:[%s2048_s29 + $0x38] sm:$0xff] (!%p1105_p1), %v2128_v30  ;;  %769 = vst [vmem:[%s2048_s29 + $0xb8] sm:$0xff] (!%p1105_p1), %v2130_v31 }
 0x1b8   : > { %v1154_v32 = vpop.f32.mrb[16].mxu0  ;;  %v1202_v33 = vpop.f32.mrb[16].mxu1 }
 0x1b9   : > { %v1155_v34 = vpop.f32.mrb[17].mxu0  ;;  %v1203_v35 = vpop.f32.mrb[17].mxu1 }
 0x1ba   : > { %v2132_v36 = vadd.f32 %v1155_v34, %v1154_v32  ;;  %v2134_v37 = vadd.f32 %v1203_v35, %v1202_v33  ;;  %v1157_v38 = vpop.f32.mrb[18].mxu0  ;;  %v1205_v39 = vpop.f32.mrb[18].mxu1 }
 0x1bb   : > { %v1158_v40 = vpop.f32.mrb[19].mxu0  ;;  %v1206_v41 = vpop.f32.mrb[19].mxu1 }
 0x1bc   : > { %v2136_v42 = vadd.f32 %v1158_v40, %v1157_v38  ;;  %v2138_v43 = vadd.f32 %v1206_v41, %v1205_v39  ;;  %754 = vst [vmem:[%s2048_s29 + $0x40] sm:$0xff] (!%p1105_p1), %v2132_v36  ;;  %770 = vst [vmem:[%s2048_s29 + $0xc0] sm:$0xff] (!%p1105_p1), %v2134_v37 }
 0x1be   : > { %755 = vst [vmem:[%s2048_s29 + $0x48] sm:$0xff] (!%p1105_p1), %v2136_v42  ;;  %771 = vst [vmem:[%s2048_s29 + $0xc8] sm:$0xff] (!%p1105_p1), %v2138_v43 }
 0x1c0   : > { %v1160_v44 = vpop.f32.mrb[20].mxu0  ;;  %v1208_v45 = vpop.f32.mrb[20].mxu1 }
 0x1c1   : > { %v1161_v46 = vpop.f32.mrb[21].mxu0  ;;  %v1209_v47 = vpop.f32.mrb[21].mxu1 }
 0x1c2   : > { %v2140_v48 = vadd.f32 %v1161_v46, %v1160_v44  ;;  %v2142_v49 = vadd.f32 %v1209_v47, %v1208_v45  ;;  %v1163_v50 = vpop.f32.mrb[22].mxu0  ;;  %v1211_v51 = vpop.f32.mrb[22].mxu1 }
 0x1c3   : > { %v1164_v54 = vpop.f32.mrb[23].mxu0  ;;  %v1212_v55 = vpop.f32.mrb[23].mxu1 }
 0x1c4   : > { %v2144_v56 = vadd.f32 %v1164_v54, %v1163_v50  ;;  %v2146_v57 = vadd.f32 %v1212_v55, %v1211_v51  ;;  %756 = vst [vmem:[%s2048_s29 + $0x50] sm:$0xff] (!%p1105_p1), %v2140_v48  ;;  %772 = vst [vmem:[%s2048_s29 + $0xd0] sm:$0xff] (!%p1105_p1), %v2142_v49 }
 0x1c6   : > { %757 = vst [vmem:[%s2048_s29 + $0x58] sm:$0xff] (!%p1105_p1), %v2144_v56  ;;  %773 = vst [vmem:[%s2048_s29 + $0xd8] sm:$0xff] (!%p1105_p1), %v2146_v57 }
 0x1c8   : > { %v1166_v60 = vpop.f32.mrb[24].mxu0  ;;  %v1214_v61 = vpop.f32.mrb[24].mxu1 }
 0x1c9   : > { %v1167_v62 = vpop.f32.mrb[25].mxu0  ;;  %v1215_v63 = vpop.f32.mrb[25].mxu1 }
 0x1ca   : > { %v2148_v2 = vadd.f32 %v1167_v62, %v1166_v60  ;;  %v2150_v3 = vadd.f32 %v1215_v63, %v1214_v61  ;;  %v1169_v4 = vpop.f32.mrb[26].mxu0  ;;  %v1217_v5 = vpop.f32.mrb[26].mxu1 }
 0x1cb   : > { %v1170_v8 = vpop.f32.mrb[27].mxu0  ;;  %v1218_v9 = vpop.f32.mrb[27].mxu1 }
 0x1cc   : > { %v2152_v10 = vadd.f32 %v1170_v8, %v1169_v4  ;;  %v2154_v11 = vadd.f32 %v1218_v9, %v1217_v5  ;;  %758 = vst [vmem:[%s2048_s29 + $0x60] sm:$0xff] (!%p1105_p1), %v2148_v2  ;;  %774 = vst [vmem:[%s2048_s29 + $0xe0] sm:$0xff] (!%p1105_p1), %v2150_v3 }
 0x1ce   : > { %745 = sbr.rel (%p1105_p1) target bundleno = 471 (0x1d7), region = 44  ;;  %759 = vst [vmem:[%s2048_s29 + $0x68] sm:$0xff] (!%p1105_p1), %v2152_v10  ;;  %775 = vst [vmem:[%s2048_s29 + $0xe8] sm:$0xff] (!%p1105_p1), %v2154_v11 }
 0x1d0   : > { %v1172_v14 = vpop.f32.mrb[28].mxu0  ;;  %v1220_v15 = vpop.f32.mrb[28].mxu1 }
 0x1d1   : > { %v1173_v16 = vpop.f32.mrb[29].mxu0  ;;  %v1221_v17 = vpop.f32.mrb[29].mxu1 }
 0x1d2   : > { %v2156_v20 = vadd.f32 %v1173_v16, %v1172_v14  ;;  %v2158_v21 = vadd.f32 %v1221_v17, %v1220_v15  ;;  %v1175_v22 = vpop.f32.mrb[30].mxu0  ;;  %v1223_v23 = vpop.f32.mrb[30].mxu1 }
 0x1d3   : > { %v1176_v26 = vpop.f32.mrb[31].mxu0  ;;  %v1224_v27 = vpop.f32.mrb[31].mxu1 }
 0x1d4   : > { %v2160_v28 = vadd.f32 %v1176_v26, %v1175_v22  ;;  %v2162_v29 = vadd.f32 %v1224_v27, %v1223_v23  ;;  %760 = vst [vmem:[%s2048_s29 + $0x70] sm:$0xff] (!%p1105_p1), %v2156_v20  ;;  %776 = vst [vmem:[%s2048_s29 + $0xf0] sm:$0xff] (!%p1105_p1), %v2158_v21 }
 0x1d6   : > { %761 = vst [vmem:[%s2048_s29 + $0x78] sm:$0xff] %v2160_v28  ;;  %777 = vst [vmem:[%s2048_s29 + $0xf8] sm:$0xff] %v2162_v29 }
 0x1d7 PF: > { %s2498_s2 = sld [smem:[#allocation19_spill]] }
 0x1dd   : > { %p1106_p8 = scmp.le.s32.totalorder %s2498_s2, 0 }
 0x1de   : > { %v782_v32 = vld [vmem:[%s2048_s29] sm:$0xff] (!%p1106_p8)  ;;  %v783_v33 = vld [vmem:[%s2048_s29 + $0x8] sm:$0xff] (!%p1106_p8)  ;;  %v784_v34 = vld [vmem:[%s2048_s29 + $0x10] sm:$0xff] (!%p1106_p8) }
 0x1df   : > { %781 = sbr.rel (%p1106_p8) target bundleno = 497 (0x1f1), region = 48  ;;  %v814_v35 = vadd.f32 (!%p1106_p8), %v2100_v52, %v782_v32  ;;  %v815_v38 = vadd.f32 (!%p1106_p8), %v2104_v58, %v783_v33  ;;  %v816_v39 = vadd.f32 (!%p1106_p8), %v2108_v0, %v784_v34  ;;  %v785_v40 = vld [vmem:[%s2048_s29 + $0x18] sm:$0xff] (!%p1106_p8)  ;;  %v786_v41 = vld [vmem:[%s2048_s29 + $0x20] sm:$0xff] (!%p1106_p8)  ;;  %v787_v44 = vld [vmem:[%s2048_s29 + $0x28] sm:$0xff] (!%p1106_p8) }
 0x1e0   : > { %v817_v45 = vadd.f32 (!%p1106_p8), %v2112_v6, %v785_v40  ;;  %v818_v46 = vadd.f32 (!%p1106_p8), %v2116_v12, %v786_v41  ;;  %v819_v47 = vadd.f32 (!%p1106_p8), %v2120_v18, %v787_v44  ;;  %v788_v52 = vld [vmem:[%s2048_s29 + $0x30] sm:$0xff] (!%p1106_p8)  ;;  %v789_v50 = vld [vmem:[%s2048_s29 + $0x38] sm:$0xff] (!%p1106_p8)  ;;  %v790_v58 = vld [vmem:[%s2048_s29 + $0x40] sm:$0xff] (!%p1106_p8) }
 0x1e1   : > { %846 = vst [vmem:[%s2048_s29] sm:$0xff] (!%p1106_p8), %v814_v35  ;;  %847 = vst [vmem:[%s2048_s29 + $0x8] sm:$0xff] (!%p1106_p8), %v815_v38  ;;  %v820_v0 = vadd.f32 (!%p1106_p8), %v2124_v24, %v788_v52  ;;  %v821_v6 = vadd.f32 (!%p1106_p8), %v2128_v30, %v789_v50  ;;  %v822_v12 = vadd.f32 (!%p1106_p8), %v2132_v36, %v790_v58  ;;  %v791_v51 = vld [vmem:[%s2048_s29 + $0x48] sm:$0xff] (!%p1106_p8)  ;;  %v792_v18 = vld [vmem:[%s2048_s29 + $0x50] sm:$0xff] (!%p1106_p8) }
 0x1e2   : > { %848 = vst [vmem:[%s2048_s29 + $0x10] sm:$0xff] (!%p1106_p8), %v816_v39  ;;  %v793_v54 = vld [vmem:[%s2048_s29 + $0x58] sm:$0xff] (!%p1106_p8)  ;;  %849 = vst [vmem:[%s2048_s29 + $0x18] sm:$0xff] (!%p1106_p8), %v817_v45  ;;  %v823_v55 = vadd.f32 (!%p1106_p8), %v2136_v42, %v791_v51  ;;  %v824_v24 = vadd.f32 (!%p1106_p8), %v2140_v48, %v792_v18  ;;  %v794_v60 = vld [vmem:[%s2048_s29 + $0x60] sm:$0xff] (!%p1106_p8) }
 0x1e3   : > { %850 = vst [vmem:[%s2048_s29 + $0x20] sm:$0xff] (!%p1106_p8), %v818_v46  ;;  %851 = vst [vmem:[%s2048_s29 + $0x28] sm:$0xff] (!%p1106_p8), %v819_v47  ;;  %v825_v30 = vadd.f32 (!%p1106_p8), %v2144_v56, %v793_v54  ;;  %v795_v36 = vld [vmem:[%s2048_s29 + $0x68] sm:$0xff] (!%p1106_p8)  ;;  %v796_v61 = vld [vmem:[%s2048_s29 + $0x70] sm:$0xff] (!%p1106_p8)  ;;  %v826_v62 = vadd.f32 (!%p1106_p8), %v2148_v2, %v794_v60 }
 0x1e4   : > { %852 = vst [vmem:[%s2048_s29 + $0x30] sm:$0xff] (!%p1106_p8), %v820_v0  ;;  %853 = vst [vmem:[%s2048_s29 + $0x38] sm:$0xff] (!%p1106_p8), %v821_v6  ;;  %v827_v42 = vadd.f32 (!%p1106_p8), %v2152_v10, %v795_v36  ;;  %v828_v48 = vadd.f32 (!%p1106_p8), %v2156_v20, %v796_v61  ;;  %v797_v63 = vld [vmem:[%s2048_s29 + $0x78] sm:$0xff] (!%p1106_p8)  ;;  %v798_v56 = vld [vmem:[%s2048_s29 + $0x80] sm:$0xff] (!%p1106_p8) }
 0x1e5   : > { %854 = vst [vmem:[%s2048_s29 + $0x40] sm:$0xff] (!%p1106_p8), %v822_v12  ;;  %v799_v4 = vld [vmem:[%s2048_s29 + $0x88] sm:$0xff] (!%p1106_p8)  ;;  %855 = vst [vmem:[%s2048_s29 + $0x48] sm:$0xff] (!%p1106_p8), %v823_v55  ;;  %v829_v5 = vadd.f32 (!%p1106_p8), %v2160_v28, %v797_v63  ;;  %v830_v2 = vadd.f32 (!%p1106_p8), %v2102_v53, %v798_v56  ;;  %v800_v9 = vld [vmem:[%s2048_s29 + $0x90] sm:$0xff] (!%p1106_p8) }
 0x1e6   : > { %856 = vst [vmem:[%s2048_s29 + $0x50] sm:$0xff] %v824_v24  ;;  %857 = vst [vmem:[%s2048_s29 + $0x58] sm:$0xff] %v825_v30  ;;  %v831_v8 = vadd.f32 %v2106_v59, %v799_v4  ;;  %v801_v10 = vld [vmem:[%s2048_s29 + $0x98] sm:$0xff]  ;;  %v802_v14 = vld [vmem:[%s2048_s29 + $0xa0] sm:$0xff]  ;;  %v832_v15 = vadd.f32 %v2110_v1, %v800_v9 }
 0x1e7   : > { %858 = vst [vmem:[%s2048_s29 + $0x60] sm:$0xff] %v826_v62  ;;  %859 = vst [vmem:[%s2048_s29 + $0x68] sm:$0xff] %v827_v42  ;;  %v833_v16 = vadd.f32 %v2114_v7, %v801_v10  ;;  %v834_v53 = vadd.f32 %v2118_v13, %v802_v14  ;;  %v803_v17 = vld [vmem:[%s2048_s29 + $0xa8] sm:$0xff]  ;;  %v804_v59 = vld [vmem:[%s2048_s29 + $0xb0] sm:$0xff] }
 0x1e8   : > { %860 = vst [vmem:[%s2048_s29 + $0x70] sm:$0xff] %v828_v48  ;;  %v805_v20 = vld [vmem:[%s2048_s29 + $0xb8] sm:$0xff]  ;;  %861 = vst [vmem:[%s2048_s29 + $0x78] sm:$0xff] %v829_v5  ;;  %v835_v22 = vadd.f32 %v2122_v19, %v803_v17  ;;  %v836_v1 = vadd.f32 %v2126_v25, %v804_v59  ;;  %v806_v23 = vld [vmem:[%s2048_s29 + $0xc0] sm:$0xff] }
 0x1e9   : > { %862 = vst [vmem:[%s2048_s29 + $0x80] sm:$0xff] %v830_v2  ;;  %863 = vst [vmem:[%s2048_s29 + $0x88] sm:$0xff] %v831_v8  ;;  %v837_v7 = vadd.f32 %v2130_v31, %v805_v20  ;;  %v807_v13 = vld [vmem:[%s2048_s29 + $0xc8] sm:$0xff]  ;;  %v808_v26 = vld [vmem:[%s2048_s29 + $0xd0] sm:$0xff]  ;;  %v838_v27 = vadd.f32 %v2134_v37, %v806_v23 }
 0x1ea   : > { %864 = vst [vmem:[%s2048_s29 + $0x90] sm:$0xff] %v832_v15  ;;  %865 = vst [vmem:[%s2048_s29 + $0x98] sm:$0xff] %v833_v16  ;;  %v839_v19 = vadd.f32 %v2138_v43, %v807_v13  ;;  %v840_v25 = vadd.f32 %v2142_v49, %v808_v26  ;;  %v809_v28 = vld [vmem:[%s2048_s29 + $0xd8] sm:$0xff]  ;;  %v810_v31 = vld [vmem:[%s2048_s29 + $0xe0] sm:$0xff] }
 0x1eb   : > { %866 = vst [vmem:[%s2048_s29 + $0xa0] sm:$0xff] %v834_v53  ;;  %v811_v32 = vld [vmem:[%s2048_s29 + $0xe8] sm:$0xff]  ;;  %867 = vst [vmem:[%s2048_s29 + $0xa8] sm:$0xff] %v835_v22  ;;  %v841_v33 = vadd.f32 %v2146_v57, %v809_v28  ;;  %v842_v37 = vadd.f32 %v2150_v3, %v810_v31  ;;  %v812_v43 = vld [vmem:[%s2048_s29 + $0xf0] sm:$0xff] }
 0x1ec   : > { %868 = vst [vmem:[%s2048_s29 + $0xb0] sm:$0xff] %v836_v1  ;;  %869 = vst [vmem:[%s2048_s29 + $0xb8] sm:$0xff] %v837_v7  ;;  %v843_v34 = vadd.f32 %v2154_v11, %v811_v32  ;;  %v813_v35 = vld [vmem:[%s2048_s29 + $0xf8] sm:$0xff]  ;;  %v844_v49 = vadd.f32 %v2158_v21, %v812_v43 }
 0x1ed   : > { %870 = vst [vmem:[%s2048_s29 + $0xc0] sm:$0xff] %v838_v27  ;;  %871 = vst [vmem:[%s2048_s29 + $0xc8] sm:$0xff] %v839_v19  ;;  %v845_v38 = vadd.f32 %v2162_v29, %v813_v35 }
 0x1ee   : > { %872 = vst [vmem:[%s2048_s29 + $0xd0] sm:$0xff] %v840_v25  ;;  %873 = vst [vmem:[%s2048_s29 + $0xd8] sm:$0xff] %v841_v33 }
 0x1ef   : > { %874 = vst [vmem:[%s2048_s29 + $0xe0] sm:$0xff] %v842_v37  ;;  %875 = vst [vmem:[%s2048_s29 + $0xe8] sm:$0xff] %v843_v34 }
 0x1f0   : > { %876 = vst [vmem:[%s2048_s29 + $0xf0] sm:$0xff] %v844_v49  ;;  %877 = vst [vmem:[%s2048_s29 + $0xf8] sm:$0xff] %v845_v38 }
 0x1f1 PF: > { %s2499_s25 = sld [smem:[#allocation19_spill]]  ;;  %p879_p10 = scmp.eq.s32.totalorder %s2044_s23, 0 }
 0x1f7   : > { %p878_p9 = scmp.eq.s32.totalorder %s2499_s25, 0 }
 0x1f9   : > { %p880_p11 = pnand %p879_p10, %p878_p9 }
 0x1fa   : > { %v1699_v57 = vmov (!%p880_p11), 0.0  }
 0x1fb   : > { %883 = sbr.rel (%p880_p11) target bundleno = 523 (0x20b), region = 52  ;;  %884 = vst [vmem:[%s2048_s29] sm:$0xff] (!%p880_p11), %v1699_v57  ;;  %885 = vst [vmem:[%s2048_s29 + $0x8] sm:$0xff] (!%p880_p11), %v1699_v57 }
 0x1fc   : > { %886 = vst [vmem:[%s2048_s29 + $0x10] sm:$0xff] (!%p880_p11), %v1699_v57  ;;  %887 = vst [vmem:[%s2048_s29 + $0x18] sm:$0xff] (!%p880_p11), %v1699_v57 }
 0x1fd   : > { %888 = vst [vmem:[%s2048_s29 + $0x20] sm:$0xff] (!%p880_p11), %v1699_v57  ;;  %889 = vst [vmem:[%s2048_s29 + $0x28] sm:$0xff] (!%p880_p11), %v1699_v57 }
 0x1fe   : > { %890 = vst [vmem:[%s2048_s29 + $0x30] sm:$0xff] (!%p880_p11), %v1699_v57  ;;  %891 = vst [vmem:[%s2048_s29 + $0x38] sm:$0xff] (!%p880_p11), %v1699_v57 }
 0x1ff   : > { %892 = vst [vmem:[%s2048_s29 + $0x40] sm:$0xff] (!%p880_p11), %v1699_v57  ;;  %893 = vst [vmem:[%s2048_s29 + $0x48] sm:$0xff] (!%p880_p11), %v1699_v57 }
 0x200   : > { %894 = vst [vmem:[%s2048_s29 + $0x50] sm:$0xff] (!%p880_p11), %v1699_v57  ;;  %895 = vst [vmem:[%s2048_s29 + $0x58] sm:$0xff] (!%p880_p11), %v1699_v57 }
 0x201   : > { %896 = vst [vmem:[%s2048_s29 + $0x60] sm:$0xff] (!%p880_p11), %v1699_v57  ;;  %897 = vst [vmem:[%s2048_s29 + $0x68] sm:$0xff] (!%p880_p11), %v1699_v57 }
 0x202   : > { %898 = vst [vmem:[%s2048_s29 + $0x70] sm:$0xff] %v1699_v57  ;;  %899 = vst [vmem:[%s2048_s29 + $0x78] sm:$0xff] %v1699_v57 }
 0x203   : > { %900 = vst [vmem:[%s2048_s29 + $0x80] sm:$0xff] %v1699_v57  ;;  %901 = vst [vmem:[%s2048_s29 + $0x88] sm:$0xff] %v1699_v57 }
 0x204   : > { %902 = vst [vmem:[%s2048_s29 + $0x90] sm:$0xff] %v1699_v57  ;;  %903 = vst [vmem:[%s2048_s29 + $0x98] sm:$0xff] %v1699_v57 }
 0x205   : > { %904 = vst [vmem:[%s2048_s29 + $0xa0] sm:$0xff] %v1699_v57  ;;  %905 = vst [vmem:[%s2048_s29 + $0xa8] sm:$0xff] %v1699_v57 }
 0x206   : > { %906 = vst [vmem:[%s2048_s29 + $0xb0] sm:$0xff] %v1699_v57  ;;  %907 = vst [vmem:[%s2048_s29 + $0xb8] sm:$0xff] %v1699_v57 }
 0x207   : > { %908 = vst [vmem:[%s2048_s29 + $0xc0] sm:$0xff] %v1699_v57  ;;  %909 = vst [vmem:[%s2048_s29 + $0xc8] sm:$0xff] %v1699_v57 }
 0x208   : > { %910 = vst [vmem:[%s2048_s29 + $0xd0] sm:$0xff] %v1699_v57  ;;  %911 = vst [vmem:[%s2048_s29 + $0xd8] sm:$0xff] %v1699_v57 }
 0x209   : > { %912 = vst [vmem:[%s2048_s29 + $0xe0] sm:$0xff] %v1699_v57  ;;  %913 = vst [vmem:[%s2048_s29 + $0xe8] sm:$0xff] %v1699_v57 }
 0x20a   : > { %914 = vst [vmem:[%s2048_s29 + $0xf0] sm:$0xff] %v1699_v57  ;;  %915 = vst [vmem:[%s2048_s29 + $0xf8] sm:$0xff] %v1699_v57 }
 0x20b PF: > { %s2500_s8 = sld [smem:[#allocation20_spill]]  ;;  %s2501_s18 = sld [smem:[#allocation28_spill]] }
 0x20c   : > { %s930_s5 = sshll.u32 %s2048_s29, 4  ;;  %s2371_s27 = scalar_lea.sflag [#allocation7], %s242_s4  ;;  %s2367_s5 = int_to_ptr.vmem [resolvable:$true] %s930_s5 }
 0x20d   : > { %s1536_s23 = scalar_lea.vmem %s2367_s5, 4096  ;;  %p2503_p0 = scmp.ne.s32.totalorder %s2486_s16, 0 }
 0x20e   : > { %p1537_p7 = scmp.ne.s32.totalorder %s2367_s5, %s1536_s23  ;;  %s1700_s6 = smov [#allocation10]  }
 0x20f   : > { %s1540_s26 = sshll.u32 %s1700_s6, 4  ;;  %s1541_s26 = int_to_ptr.vmem [resolvable:$false] %s1540_s26 }
 0x210   : > { %p1538_p2 = pnand %p1537_p7, %p2503_p0  ;;  %s1542_s13 = scalar_lea.vmem %s1541_s26, 8192 }
 0x211   : > { %s1113_s28 = sshll.u32 %s2500_s8, 12  ;;  %s2502_s30 = smov %s2501_s18 }
 0x212   : > { %s2364_s22 = scalar_lea.hbm %s2501_s18, %s1113_s28  ;;  %p1539_p13 = pneg %p1538_p2 }
 0x213   : > { %p1543_p6 = scmp.lt.s32.totalorder %s2367_s5, %s1541_s26  ;;  %p1544_p3 = scmp.lt.s32.totalorder %s1542_s13, %s1536_s23 }
 0x215   : > { %p1545_p12 = por %p1544_p3, %p1543_p6 }
 0x217   : > { %p1546_p4 = pnand %p1545_p12, %p1539_p13 }
 0x219   : > { %1549 = shalt.err (!%p1546_p4)
}
 0x21a   : > { %s1550_s4 = scalar_lea.hbm %s2364_s22, 4096  ;;  %s1554_s25 = scalar_lea.hbm %s2502_s30, 12288 }
 0x21b   : > { %p1551_p5 = scmp.ne.s32.totalorder %s2364_s22, %s1550_s4  ;;  %p1555_p9 = scmp.lt.u32.totalorder %s2364_s22, %s2502_s30 }
 0x21c   : > { %p1556_p10 = scmp.lt.u32.totalorder %s1554_s25, %s1550_s4  ;;  %p1558_p7 = scmp.lt.u32.totalorder %s1550_s4, %s2364_s22 }
 0x21d   : > { %p1552_p1 = pnand %p1551_p5, %p2503_p0 }
 0x21e   : > { %p1557_p11 = por %p1556_p10, %p1555_p9 }
 0x21f   : > { %p1553_p8 = pneg %p1552_p1 }
 0x220   : > { %p1559_p2 = por %p1558_p7, %p1557_p11 }
 0x222   : > { %p1560_p13 = pnand %p1559_p2, %p1553_p8 }
 0x224   : > { %1563 = shalt.err (!%p1560_p13)
}
 0x225   : > { %s1701_s19 = smov 128   ;;  %s1702_s3 = smov 8  }
 0x226   : > { %1251 = dma.vmem_to_hbm [thread:$0]  (%p2503_p0), %s2367_s5, 4096, %s2364_s22, %s2371_s27, %s1701_s19, %s1701_s19, %s1702_s3  }
 0x227 PF: > { %p1269_p6 = scmp.ge.s32.totalorder %s1688_s20, 2  ;;  %s945_s18 = sand.u32 1, %s1636_s0  }
 0x228   : > { %p2504_p3 = scmp.ne.s32.totalorder %s2487_s7, 0  ;;  %s946_s23 = scalar_lea.sflag [#allocation7], %s945_s18 }
 0x22a   : > { %p1265_p12 = pnand %p1269_p6, %p2504_p3 }
 0x22c   : > { %1631 = dma.done.wait (!%p1265_p12), %s946_s23, 4096  }
 0x22d   : > { %1633 = vsyncadd (!%p1265_p12), %s946_s23, 4294963200  ;;  %s29_s20 = sadd.s32 1, %s1688_s20   ;;  %s2506_s16 = sld [smem:[#allocation21_spill]] }
 0x22e   : > { %p2400_p4 = scmp.ge.s32.totalorder %s29_s20, 11   ;;  %s2507_s7 = sld [smem:[#allocation22_spill]] }
 0x22f   : > { %s2508_s18 = sld [smem:[#allocation23_spill]]  ;;  %s2509_s19 = sld [smem:[#allocation25_spill]] }
 0x230   : > { %s2510_s0 = smov %s1640_s9  ;;  %s2511_s9 = smov %s1644_s10 }
 0x231   : > { %s2512_s10 = smov %s1957_s11  ;;  %s2513_s11 = smov %s1652_s12 }
 0x232   : > { %s2514_s12 = smov %s1656_s1  ;;  %s2515_s1 = smov %s1968_s21 }
 0x233   : > { %s2516_s13 = smov %s1664_s14  ;;  %s2517_s14 = smov %s1668_s15 }
 0x234   : > { %s2518_s15 = smov %s1885_s17  ;;  %s2519_s17 = smov %s2507_s7 }
 0x235   :  { %28 = sbr.rel (!%p2400_p4) target bundleno = 32 (0x20), region = 102 }
 0x23c   :  { %951 = vsyncpa [#allocation6], 1 }
 0x23d   :  { %953 = vsyncpa [#allocation6 + $0x1], 1 }
 0x23e   :  { %954 = vsyncpa [#allocation9], 1 }
 0x23f   :  { %956 = vsyncpa [#allocation9 + $0x1], 1 }
 0x240   :  { %957 = vsyncpa [#allocation7], 1 }
 0x241   :  { %959 = vsyncpa [#allocation7 + $0x1], 1 }

</bundles_post_ra>
